<compile_context>
chip_gen: v5e
topology: v5e:2x2
jax: 0.10.0
libtpu: 0.0.40
codegen_flags: <defaults>
</compile_context>

<pallas_src>
import jax
import jax.numpy as jnp
from jax.experimental import pallas as pl
from jax.experimental.pallas import tpu as pltpu


D_IN = 784
H_PAD = 1024     # hidden 1000 padded to a multiple of 128 (lane-dense)
C_PAD = 128      # classes 10 padded to one full lane tile
NUM_CLASSES = 10


def mlp_kernel(x_ref, w1_ref, b1_ref, w2_ref, b2_ref, o_ref):
    # fc1 + ReLU: bf16 x @ bf16 W1 on the MXU, f32 accumulation.
    h = jnp.dot(x_ref[...], w1_ref[...],
                preferred_element_type=jnp.float32)            # (bm, 1024)
    h = jnp.maximum(h + b1_ref[...], 0.0)

    # fc2 in f32 (fc2 is tiny relative to fc1; drops one bf16 rounding stage).
    logits = jnp.dot(h, w2_ref[...].astype(jnp.float32),
                     preferred_element_type=jnp.float32)       # (bm, 128)
    logits = logits + b2_ref[...]

    # Mask padded class lanes so they contribute nothing to the softmax denom.
    col = jax.lax.broadcasted_iota(jnp.int32, logits.shape, 1)
    logits = jnp.where(col < NUM_CLASSES, logits, -1e30)

    m = jnp.max(logits, axis=-1, keepdims=True)
    shifted = logits - m
    lse = jnp.log(jnp.sum(jnp.exp(shifted), axis=-1, keepdims=True))
    o_ref[...] = (shifted - lse).astype(o_ref.dtype)


def pack_params(w1, b1, w2, b2):
    """Pad params to lane-dense shapes; weights bf16, biases f32 (zero-padded)."""
    din, h = w1.shape
    _, c = w2.shape
    w1p = jnp.zeros((din, H_PAD), jnp.bfloat16).at[:, :h].set(w1.astype(jnp.bfloat16))
    b1p = jnp.zeros((1, H_PAD), jnp.float32).at[:, :h].set(b1)
    w2p = jnp.zeros((H_PAD, C_PAD), jnp.bfloat16).at[:h, :c].set(w2.astype(jnp.bfloat16))
    b2p = jnp.zeros((1, C_PAD), jnp.float32).at[:, :c].set(b2)
    return w1p, b1p, w2p, b2p


def mlp_forward(x, w1p, b1p, w2p, b2p, *, max_bm=256):
    """Forward pass. x: any leading shape, flattened to (-1, 784) like the module."""
    x = x.reshape(-1, D_IN)
    B = x.shape[0]

    # Pad the batch to a sublane-friendly size and pick the batch tile.
    # Small batches (B <= max_bm) collapse to a single grid step.
    B8 = ((B + 7) // 8) * 8
    bm = B8 if B8 <= max_bm else max_bm
    B_pad = ((B8 + bm - 1) // bm) * bm
    n_tiles = B_pad // bm

    # Ship x as bf16 (halves x HBM traffic; no per-step in-kernel cast).
    xb = jnp.zeros((B_pad, D_IN), jnp.bfloat16).at[:B].set(x.astype(jnp.bfloat16))

    cost = pl.CostEstimate(
        flops=2 * B_pad * (D_IN * H_PAD + H_PAD * C_PAD),
        transcendentals=B_pad * C_PAD,
        bytes_accessed=(xb.size * 2 + w1p.size * 2 + w2p.size * 2
                        + b1p.size * 4 + b2p.size * 4 + B_pad * C_PAD * 4),
    )

    out_padded = pl.pallas_call(
        mlp_kernel,
        out_shape=jax.ShapeDtypeStruct((B_pad, C_PAD), jnp.float32),
        grid_spec=pltpu.PrefetchScalarGridSpec(
            num_scalar_prefetch=0,
            grid=(n_tiles,),
            in_specs=[
                pl.BlockSpec((bm, D_IN), lambda i: (i, 0)),       # x batch tile
                pl.BlockSpec((D_IN, H_PAD), lambda i: (0, 0)),    # W1 (resident)
                pl.BlockSpec((1, H_PAD), lambda i: (0, 0)),       # b1 (resident)
                pl.BlockSpec((H_PAD, C_PAD), lambda i: (0, 0)),   # W2 (resident)
                pl.BlockSpec((1, C_PAD), lambda i: (0, 0)),       # b2 (resident)
            ],
            out_specs=pl.BlockSpec((bm, C_PAD), lambda i: (i, 0)),
        ),
        compiler_params=pltpu.CompilerParams(
            # Batch tiles are independent -> shard across v7x's two TensorCores.
            dimension_semantics=("parallel",),
        ),
        cost_estimate=cost,
    )(xb, w1p, b1p, w2p, b2p)

    return out_padded[:B, :NUM_CLASSES]


def init_params(key):
    # Deterministic init mimicking nn.Linear defaults: U(-1/sqrt(fan_in), ...)
    k1, k2, k3, k4 = jax.random.split(key, 4)
    in1, out1 = 784, 1000
    in2, out2 = 1000, 10
    bound1 = 1.0 / jnp.sqrt(in1)
    bound2 = 1.0 / jnp.sqrt(in2)
    w1 = jax.random.uniform(k1, (in1, out1), jnp.float32, -bound1, bound1)
    b1 = jax.random.uniform(k2, (out1,), jnp.float32, -bound1, bound1)
    w2 = jax.random.uniform(k3, (in2, out2), jnp.float32, -bound2, bound2)
    b2 = jax.random.uniform(k4, (out2,), jnp.float32, -bound2, bound2)
    return w1, b1, w2, b2


def reference_forward(x, w1, b1, w2, b2):
    x = x.reshape(-1, 784)
    h = jnp.maximum(x @ w1 + b1, 0.0)
    logits = h @ w2 + b2
    return jax.nn.log_softmax(logits, axis=-1)


if __name__ == "__main__":
    key = jax.random.PRNGKey(0)
    kx, kp = jax.random.split(key)

    # Input shaped like flattened MNIST images: (B, 1, 28, 28) -> view(-1, 784)
    B = 8
    x_img = jax.random.normal(kx, (B, 1, 28, 28), jnp.float32)

    w1, b1, w2, b2 = init_params(kp)
    w1p, b1p, w2p, b2p = pack_params(w1, b1, w2, b2)

    out = mlp_forward(x_img, w1p, b1p, w2p, b2p)
    jax.block_until_ready(out)

    ref = reference_forward(x_img, w1, b1, w2, b2)
    assert out.shape == (B, 10)
    # bf16 weights/x -> loosened tolerance vs the f32 reference (expected trade).
    assert jnp.allclose(out, ref, atol=5e-2, rtol=5e-2), "mismatch vs reference"

    print("KERNEL_OK")
</pallas_src>

<mosaic_0001>
module attributes {stable_mosaic.version = 11 : i64} {
  func.func @mlp_kernel(%arg0: i32, %arg1: memref<8x784xbf16, #tpu.memory_space<vmem>>, %arg2: memref<784x1024xbf16, #tpu.memory_space<vmem>>, %arg3: memref<1x1024xf32, #tpu.memory_space<vmem>>, %arg4: memref<1024x128xbf16, #tpu.memory_space<vmem>>, %arg5: memref<1x128xf32, #tpu.memory_space<vmem>>, %arg6: memref<8x128xf32, #tpu.memory_space<vmem>>) attributes {dimension_semantics = [#tpu.dimension_semantics<parallel>], iteration_bounds = array<i64: 1>, scalar_prefetch = 0 : i64, scratch_operands = 0 : i64, tpu.core_type = #tpu.core_type<tc>, window_params = [{transform_indices = @transform_0, window_bounds = array<i64: 8, 784>}, {pipeline_mode = #tpu.pipeline_mode<synchronous>, transform_indices = @transform_1, window_bounds = array<i64: 784, 1024>}, {pipeline_mode = #tpu.pipeline_mode<synchronous>, transform_indices = @transform_2, window_bounds = array<i64: 1, 1024>}, {pipeline_mode = #tpu.pipeline_mode<synchronous>, transform_indices = @transform_3, window_bounds = array<i64: 1024, 128>}, {pipeline_mode = #tpu.pipeline_mode<synchronous>, transform_indices = @transform_4, window_bounds = array<i64: 1, 128>}, {transform_indices = @transform_5, window_bounds = array<i64: 8, 128>}]} {
    %c0 = arith.constant 0 : index
    %c0_0 = arith.constant 0 : index
    %0 = vector.load %arg1[%c0, %c0_0] : memref<8x784xbf16, #tpu.memory_space<vmem>>, vector<8x784xbf16>
    %c0_1 = arith.constant 0 : index
    %c0_2 = arith.constant 0 : index
    %1 = vector.load %arg2[%c0_1, %c0_2] : memref<784x1024xbf16, #tpu.memory_space<vmem>>, vector<784x1024xbf16>
    %cst = arith.constant dense<0.000000e+00> : vector<8x1024xf32>
    %2 = tpu.matmul %0, %1, %cst {dimension_numbers = #tpu.dot_dimension_numbers<[1], [0], [0], [1], [0, 0, 1, 1], [], []>} : vector<8x784xbf16>, vector<784x1024xbf16>, vector<8x1024xf32> -> vector<8x1024xf32>
    %c0_3 = arith.constant 0 : index
    %c0_4 = arith.constant 0 : index
    %3 = vector.load %arg3[%c0_3, %c0_4] : memref<1x1024xf32, #tpu.memory_space<vmem>>, vector<1x1024xf32>
    %4 = vector.broadcast %3 : vector<1x1024xf32> to vector<8x1024xf32>
    %5 = arith.addf %2, %4 : vector<8x1024xf32>
    %cst_5 = arith.constant 0.000000e+00 : f32
    %6 = vector.broadcast %cst_5 : f32 to vector<8x1024xf32>
    %7 = arith.maximumf %5, %6 : vector<8x1024xf32>
    %c0_6 = arith.constant 0 : index
    %c0_7 = arith.constant 0 : index
    %8 = vector.load %arg4[%c0_6, %c0_7] : memref<1024x128xbf16, #tpu.memory_space<vmem>>, vector<1024x128xbf16>
    %9 = arith.extf %8 : vector<1024x128xbf16> to vector<1024x128xf32>
    %cst_8 = arith.constant dense<0.000000e+00> : vector<8x128xf32>
    %10 = tpu.matmul %7, %9, %cst_8 {dimension_numbers = #tpu.dot_dimension_numbers<[1], [0], [0], [1], [0, 0, 1, 1], [], []>} : vector<8x1024xf32>, vector<1024x128xf32>, vector<8x128xf32> -> vector<8x128xf32>
    %c0_9 = arith.constant 0 : index
    %c0_10 = arith.constant 0 : index
    %11 = vector.load %arg5[%c0_9, %c0_10] : memref<1x128xf32, #tpu.memory_space<vmem>>, vector<1x128xf32>
    %12 = vector.broadcast %11 : vector<1x128xf32> to vector<8x128xf32>
    %13 = arith.addf %10, %12 : vector<8x128xf32>
    %14 = tpu.iota {dimensions = array<i32: 1>} : vector<8x128xi32>
    %c10_i32 = arith.constant 10 : i32
    %15 = vector.broadcast %c10_i32 : i32 to vector<8x128xi32>
    %16 = arith.cmpi slt, %14, %15 : vector<8x128xi32>
    %cst_11 = arith.constant -1.000000e+30 : f32
    %17 = vector.broadcast %cst_11 : f32 to vector<8x128xf32>
    %18 = arith.select %16, %13, %17 : vector<8x128xi1>, vector<8x128xf32>
    %cst_12 = arith.constant dense<0xFF800000> : vector<8xf32>
    %19 = vector.multi_reduction <maximumf>, %18, %cst_12 [1] : vector<8x128xf32> to vector<8xf32>
    %20 = vector.shape_cast %19 : vector<8xf32> to vector<8x1xf32>
    %21 = vector.broadcast %20 : vector<8x1xf32> to vector<8x128xf32>
    %22 = arith.subf %18, %21 : vector<8x128xf32>
    %23 = math.exp %22 : vector<8x128xf32>
    %cst_13 = arith.constant dense<0.000000e+00> : vector<8xf32>
    %24 = vector.multi_reduction <add>, %23, %cst_13 [1] : vector<8x128xf32> to vector<8xf32>
    %25 = vector.shape_cast %24 : vector<8xf32> to vector<8x1xf32>
    %26 = math.log %25 : vector<8x1xf32>
    %27 = vector.broadcast %26 : vector<8x1xf32> to vector<8x128xf32>
    %28 = arith.subf %22, %27 : vector<8x128xf32>
    %c0_14 = arith.constant 0 : index
    %c0_15 = arith.constant 0 : index
    %29 = vector.load %arg6[%c0_14, %c0_15] : memref<8x128xf32, #tpu.memory_space<vmem>>, vector<8x128xf32>
    tpu.vector_store %arg6[%c0_14, %c0_15], %28 {strides = array<i32>} : memref<8x128xf32, #tpu.memory_space<vmem>>, vector<8x128xf32>,
    return
  }
  func.func @transform_0(%arg0: i32) -> (i32, i32) {
    %c0_i32 = arith.constant 0 : i32
    %c0_i32_0 = arith.constant 0 : i32
    return %arg0, %c0_i32 : i32, i32
  }
  func.func @transform_1(%arg0: i32) -> (i32, i32) {
    %c0_i32 = arith.constant 0 : i32
    %c0_i32_0 = arith.constant 0 : i32
    %c0_i32_1 = arith.constant 0 : i32
    return %c0_i32, %c0_i32_0 : i32, i32
  }
  func.func @transform_2(%arg0: i32) -> (i32, i32) {
    %c0_i32 = arith.constant 0 : i32
    %c0_i32_0 = arith.constant 0 : i32
    %c0_i32_1 = arith.constant 0 : i32
    return %c0_i32, %c0_i32_0 : i32, i32
  }
  func.func @transform_3(%arg0: i32) -> (i32, i32) {
    %c0_i32 = arith.constant 0 : i32
    %c0_i32_0 = arith.constant 0 : i32
    %c0_i32_1 = arith.constant 0 : i32
    return %c0_i32, %c0_i32_0 : i32, i32
  }
  func.func @transform_4(%arg0: i32) -> (i32, i32) {
    %c0_i32 = arith.constant 0 : i32
    %c0_i32_0 = arith.constant 0 : i32
    %c0_i32_1 = arith.constant 0 : i32
    return %c0_i32, %c0_i32_0 : i32, i32
  }
  func.func @transform_5(%arg0: i32) -> (i32, i32) {
    %c0_i32 = arith.constant 0 : i32
    %c0_i32_0 = arith.constant 0 : i32
    return %arg0, %c0_i32 : i32, i32
  }
}

</mosaic_0001>

<bundles_post_ra>
// kernel: tpu_custom_call.1
= control target key start
LH: loop header
LB: loop body
LE: loop exit
PB: predicated region body
PF: predicated region fallthrough
CT: control target
= control target key end

     0   :  { %10 = vsyncpa [#allocation3], 0  ;;  %s6343_s0 = inlined_call_operand.hbm [shape: bf16[8,784], index: 0, kind: input, shape index: {}]   ;;  %s6344_s1 = inlined_call_operand.hbm [shape: bf16[784,1024], index: 1, kind: input, shape index: {}]   ;;  %s6345_s2 = inlined_call_operand.hbm [shape: f32[1,1024], index: 2, kind: input, shape index: {}]   ;;  %s6346_s3 = inlined_call_operand.hbm [shape: bf16[1024,128], index: 3, kind: input, shape index: {}]   ;;  %s6347_s4 = inlined_call_operand.hbm [shape: f32[1,128], index: 4, kind: input, shape index: {}]   ;;  %s6348_s5 = inlined_call_operand.hbm [shape: f32[8,128], index: 5, kind: output, shape index: {}]  }
   0x1   :  { %11 = vsyncpa [#allocation6], 0 }
   0x2   :  { %12 = vsyncpa [#allocation9], 0  ;;  %s29_s20 = sshll.u32 %s6344_s1, 4  ;;  %s30_s20 = int_to_ptr.hbm [resolvable:$true] %s29_s20 }
   0x3   :  { %13 = vsyncpa [#allocation4], 0  ;;  %s6142_s21 = smov [#allocation5]   ;;  %s53_s25 = sshll.u32 %s6346_s3, 4  ;;  %s54_s25 = int_to_ptr.hbm [resolvable:$true] %s53_s25 }
   0x4   :  { %s31_s22 = sshll.u32 %s6142_s21, 4  ;;  %s6143_s26 = smov 512   ;;  %s32_s22 = int_to_ptr.vmem [resolvable:$true] %s31_s22 }
   0x5   :  { %s6144_s27 = smov 32   ;;  %s6145_s28 = smov [#allocation8]  }
   0x6   :  { %37 = dma.hbm_to_vmem [thread:$0]  %s30_s20, 50176, %s32_s22, [#allocation6], %s6143_s26, %s6143_s26, %s6144_s27  }
   0x7   :  { %s55_s29 = sshll.u32 %s6145_s28, 4  ;;  %s6146_s30 = smov 64   ;;  %s56_s29 = int_to_ptr.vmem [resolvable:$true] %s55_s29 }
   0x8   :  { %s6147_s6 = smov 4   ;;  %s19_s8 = sshll.u32 %s6343_s0, 4  ;;  %s20_s8 = int_to_ptr.hbm [resolvable:$true] %s19_s8 }
   0x9   :  { %61 = dma.hbm_to_vmem [thread:$0]  %s54_s25, 8192, %s56_s29, [#allocation9], %s6146_s30, %s6146_s30, %s6147_s6  }
   0xa   :  { %s6148_s9 = smov [#allocation2]   ;;  %s43_s12 = sshll.u32 %s6345_s2, 4  ;;  %s44_s12 = int_to_ptr.hbm [resolvable:$true] %s43_s12 }
   0xb   :  { %s21_s10 = sshll.u32 %s6148_s9, 4  ;;  %s6149_s13 = smov [#allocation7]   ;;  %s22_s10 = int_to_ptr.vmem [resolvable:$true] %s21_s10 }
   0xc   :  { %24 = dma.hbm_to_vmem [thread:$0]  %s20_s8, 448, %s22_s10, [#allocation3]  }
   0xd   :  { %s45_s14 = sshll.u32 %s6149_s13, 4  ;;  %s67_s17 = sshll.u32 %s6347_s4, 4  ;;  %s46_s14 = int_to_ptr.vmem [resolvable:$true] %s45_s14  ;;  %s68_s17 = int_to_ptr.hbm [resolvable:$true] %s67_s17 }
   0xe   :  { %48 = dma.hbm_to_vmem [thread:$0]  %s44_s12, 128, %s46_s14, [#allocation6]  }
   0xf   :  { %s6150_s0 = smov [#allocation10]  }
  0x10   :  { %s69_s18 = sshll.u32 %s6150_s0, 4  ;;  %s70_s18 = int_to_ptr.vmem [resolvable:$true] %s69_s18 }
  0x11   :  { %72 = dma.hbm_to_vmem [thread:$0]  %s68_s17, 16, %s70_s18, [#allocation9]  }
  0x12   :  { %6134 = dma.done.wait [#allocation3], 448  }
  0x13   :  { %6135 = vsyncadd [#allocation3], 4294966848 }
  0x14   :  { %6136 = dma.done.wait [#allocation6], 50304  }
  0x15   :  { %6137 = vsyncadd [#allocation6], 4294916992 }
  0x16   :  { %6138 = dma.done.wait [#allocation9], 8208  }
  0x17   :  { %6139 = vsyncadd [#allocation9], 4294959088  ;;  %v3912_v0 = vld [vmem:[#allocation5 + $0x1c0] sm:$0xf]  ;;  %vm2492_vm0 = vcmask 130048   ;;  %s6151_s2 = smov [#allocation11]  }
  0x18   :  { %v5322_v1 = vld [vmem:[#allocation5 + $0x1dc] sm:$0xf0]  ;;  %s3672_s4 = sshll.u32 %s6151_s2, 4  ;;  %s3674_s21 = sshll.u32 %s6348_s5, 4  ;;  %s3673_s4 = int_to_ptr.vmem [resolvable:$true] %s3672_s4  ;;  %s3675_s21 = int_to_ptr.hbm [resolvable:$true] %s3674_s21 }
  0x19   :  { %v4168_v2 = vld [vmem:[#allocation5 + $0x3c0] sm:$0xf]  ;;  %v3913_v3 = vor.u32 %v5322_v1, %v3912_v0 }
  0x1a   :  { %v5386_v4 = vld [vmem:[#allocation5 + $0x3dc] sm:$0xf0] }
  0x1b   :  { %v4424_v5 = vld [vmem:[#allocation5 + $0x5c0] sm:$0xf]  ;;  %v4169_v7 = vor.u32 %v5386_v4, %v4168_v2  ;;  %2496 = vmatpush.bf16.msra.mxu0 %v3913_v3 }
  0x1c   :  { %v5450_v6 = vld [vmem:[#allocation5 + $0x5dc] sm:$0xf0] }
  0x1d   :  { %v4425_v8 = vor.u32 %v5450_v6, %v4424_v5  ;;  %v4680_v9 = vld [vmem:[#allocation5 + $0x7c0] sm:$0xf]  ;;  %2509 = vmatpush.bf16.msra.mxu1 %v4169_v7 }
  0x1e   :  { %v5514_v10 = vld [vmem:[#allocation5 + $0x7dc] sm:$0xf0] }
  0x1f   :  { %v3880_v11 = vld [vmem:[#allocation5 + $0x180] sm:$0xf]  ;;  %v4681_v12 = vor.u32 %v5514_v10, %v4680_v9  ;;  %2522 = vmatpush.bf16.msra.mxu2 %v4425_v8 }
  0x20   :  { %v5314_v13 = vld [vmem:[#allocation5 + $0x19c] sm:$0xf0] }
  0x21   :  { %v4136_v14 = vld [vmem:[#allocation5 + $0x380] sm:$0xf]  ;;  %v3881_v16 = vor.u32 %v5314_v13, %v3880_v11  ;;  %2535 = vmatpush.bf16.msra.mxu3 %v4681_v12 }
  0x22   :  { %v5378_v15 = vld [vmem:[#allocation5 + $0x39c] sm:$0xf0] }
  0x23   :  { %v4137_v17 = vor.u32 %v5378_v15, %v4136_v14  ;;  %v4392_v18 = vld [vmem:[#allocation5 + $0x580] sm:$0xf]  ;;  %2497 = vmatpush.bf16.msra.mxu0 %v3881_v16 }
  0x24   :  { %v5442_v19 = vld [vmem:[#allocation5 + $0x59c] sm:$0xf0] }
  0x25   :  { %v4648_v20 = vld [vmem:[#allocation5 + $0x780] sm:$0xf]  ;;  %v4393_v21 = vor.u32 %v5442_v19, %v4392_v18  ;;  %2510 = vmatpush.bf16.msra.mxu1 %v4137_v17 }
  0x26   :  { %v5506_v22 = vld [vmem:[#allocation5 + $0x79c] sm:$0xf0] }
  0x27   :  { %v3848_v23 = vld [vmem:[#allocation5 + $0x140] sm:$0xf]  ;;  %v4649_v25 = vor.u32 %v5506_v22, %v4648_v20  ;;  %2523 = vmatpush.bf16.msra.mxu2 %v4393_v21 }
  0x28   :  { %v5306_v24 = vld [vmem:[#allocation5 + $0x15c] sm:$0xf0] }
  0x29   :  { %v4104_v26 = vld [vmem:[#allocation5 + $0x340] sm:$0xf]  ;;  %v3849_v29 = vor.u32 %v5306_v24, %v3848_v23  ;;  %2536 = vmatpush.bf16.msra.mxu3 %v4649_v25  ;;  %v95_v25 = vld [vmem:[#allocation2 + $0x8] sm:$0xff] }
  0x2a   :  { %v5370_v27 = vld [vmem:[#allocation5 + $0x35c] sm:$0xf0] }
  0x2b   :  { %v4360_v28 = vld [vmem:[#allocation5 + $0x540] sm:$0xf]  ;;  %v4105_v33 = vor.u32 %v5370_v27, %v4104_v26  ;;  %2498 = vmatpush.bf16.msra.mxu0 %v3849_v29 }
  0x2c   :  { %v5434_v30 = vld [vmem:[#allocation5 + $0x55c] sm:$0xf0] }
  0x2d   :  { %v4616_v31 = vld [vmem:[#allocation5 + $0x740] sm:$0xf]  ;;  %v4361_v34 = vor.u32 %v5434_v30, %v4360_v28  ;;  %2511 = vmatpush.bf16.msra.mxu1 %v4105_v33 }
  0x2e   :  { %v5498_v32 = vld [vmem:[#allocation5 + $0x75c] sm:$0xf0] }
  0x2f   :  { %v3816_v35 = vld [vmem:[#allocation5 + $0x100] sm:$0xf]  ;;  %v4617_v38 = vor.u32 %v5498_v32, %v4616_v31  ;;  %2524 = vmatpush.bf16.msra.mxu2 %v4361_v34  ;;  %v5318_v34 = vld [vmem:[#allocation5 + $0x1c4] sm:$0xf] }
  0x30   :  { %v5298_v36 = vld [vmem:[#allocation5 + $0x11c] sm:$0xf0] }
  0x31   :  { %v4072_v37 = vld [vmem:[#allocation5 + $0x300] sm:$0xf]  ;;  %v3817_v44 = vor.u32 %v5298_v36, %v3816_v35  ;;  %2537 = vmatpush.bf16.msra.mxu3 %v4617_v38  ;;  %v3914_v35 = vld [vmem:[#allocation5 + $0x1e0] sm:$0xf0]  ;;  %v514_v36 = vunpack.c.l.b16 %v95_v25 }
  0x32   :  { %v5362_v39 = vld [vmem:[#allocation5 + $0x31c] sm:$0xf0] }
  0x33   :  { %v4328_v40 = vld [vmem:[#allocation5 + $0x500] sm:$0xf]  ;;  %v4073_v45 = vor.u32 %v5362_v39, %v4072_v37  ;;  %2499 = vmatpush.bf16.msra.mxu0 %v3817_v44  ;;  %v94_v37 = vld [vmem:[#allocation2] sm:$0xff] }
  0x34   :  { %v5426_v41 = vld [vmem:[#allocation5 + $0x51c] sm:$0xf0] }
  0x35   :  { %v4584_v42 = vld [vmem:[#allocation5 + $0x700] sm:$0xf]  ;;  %v4329_v46 = vor.u32 %v5426_v41, %v4328_v40  ;;  %2512 = vmatpush.bf16.msra.mxu1 %v4073_v45  ;;  %v512_v41 = vunpack.c.l.b16 %v94_v37 }
  0x36   :  { %v5490_v43 = vld [vmem:[#allocation5 + $0x71c] sm:$0xf0] }
  0x37   :  { %v3784_v47 = vld [vmem:[#allocation5 + $0xc0] sm:$0xf]  ;;  %v4585_v50 = vor.u32 %v5490_v43, %v4584_v42  ;;  %2525 = vmatpush.bf16.msra.mxu2 %v4329_v46  ;;  %v515_v42 = vunpack.c.h.b16 %v95_v25  ;;  %v5382_v46 = vld [vmem:[#allocation5 + $0x3c4] sm:$0xf] }
  0x38   :  { %v5290_v48 = vld [vmem:[#allocation5 + $0xdc] sm:$0xf0]  ;;  %v5358_v25 = vld [vmem:[#allocation5 + $0x304] sm:$0xf] }
  0x39   :  { %v4040_v49 = vld [vmem:[#allocation5 + $0x2c0] sm:$0xf]  ;;  %v3785_v56 = vor.u32 %v5290_v48, %v3784_v47  ;;  %2538 = vmatpush.bf16.msra.mxu3 %v4585_v50  ;;  %v4170_v47 = vld [vmem:[#allocation5 + $0x3e0] sm:$0xf0] }
  0x3a   :  { %v5354_v51 = vld [vmem:[#allocation5 + $0x2dc] sm:$0xf0] }
  0x3b   :  { %v4296_v52 = vld [vmem:[#allocation5 + $0x4c0] sm:$0xf]  ;;  %v4041_v57 = vor.u32 %v5354_v51, %v4040_v49  ;;  %2500 = vmatpush.bf16.msra.mxu0 %v3785_v56  ;;  %v3917_v49 = vor.u32 %v5318_v34, %v3914_v35  ;;  %v3882_v56 = vld [vmem:[#allocation5 + $0x1a0] sm:$0xf0] }
  0x3c   :  { %v5418_v53 = vld [vmem:[#allocation5 + $0x4dc] sm:$0xf0]  ;;  %v3786_v34 = vld [vmem:[#allocation5 + $0xe0] sm:$0xf0] }
  0x3d   :  { %v4552_v54 = vld [vmem:[#allocation5 + $0x6c0] sm:$0xf]  ;;  %v4297_v58 = vor.u32 %v5418_v53, %v4296_v52  ;;  %2513 = vmatpush.bf16.msra.mxu1 %v4041_v57  ;;  %v6197_v53 = vpack.c.b16 %v514_v36, %v514_v36  ;;  %v6199_v57 = vpack.c.b16 %v512_v41, %v512_v41 }
  0x3e   :  { %v5482_v55 = vld [vmem:[#allocation5 + $0x6dc] sm:$0xf0] }
  0x3f   :  { %v3752_v59 = vld [vmem:[#allocation5 + $0x80] sm:$0xf]  ;;  %v4553_v62 = vor.u32 %v5482_v55, %v4552_v54  ;;  %2526 = vmatpush.bf16.msra.mxu2 %v4297_v58  ;;  %v5310_v55 = vld [vmem:[#allocation5 + $0x184] sm:$0xf]  ;;  %v513_v58 = vunpack.c.h.b16 %v94_v37 }
  0x40   :  { %v5282_v60 = vld [vmem:[#allocation5 + $0x9c] sm:$0xf0] }
  0x41   :  { %v4008_v61 = vld [vmem:[#allocation5 + $0x280] sm:$0xf]  ;;  %v3753_v4 = vor.u32 %v5282_v60, %v3752_v59  ;;  %2539 = vmatpush.bf16.msra.mxu3 %v4553_v62  ;;  %v6201_v60 = vpack.c.b16 %v515_v42, %v515_v42 }
  0x42   :  { %v5346_v63 = vld [vmem:[#allocation5 + $0x29c] sm:$0xf0] }
  0x43   :  { %v4264_v0 = vld [vmem:[#allocation5 + $0x480] sm:$0xf]  ;;  %v4009_v5 = vor.u32 %v5346_v63, %v4008_v61  ;;  %2501 = vmatpush.bf16.msra.mxu0 %v3753_v4  ;;  %v4173_v61 = vor.u32 %v5382_v46, %v4170_v47  ;;  %v5374_v63 = vld [vmem:[#allocation5 + $0x384] sm:$0xf] }
  0x44   :  { %v5410_v1 = vld [vmem:[#allocation5 + $0x49c] sm:$0xf0]  ;;  %v5278_v46 = vld [vmem:[#allocation5 + $0x84] sm:$0xf] }
  0x45   :  { %v4520_v2 = vld [vmem:[#allocation5 + $0x680] sm:$0xf]  ;;  %v4265_v6 = vor.u32 %v5410_v1, %v4264_v0  ;;  %2514 = vmatpush.bf16.msra.mxu1 %v4009_v5  ;;  %v4138_v0 = vld [vmem:[#allocation5 + $0x3a0] sm:$0xf0] }
  0x46   :  { %v5474_v3 = vld [vmem:[#allocation5 + $0x69c] sm:$0xf0]  ;;  %v3754_v47 = vld [vmem:[#allocation5 + $0xa0] sm:$0xf0] }
  0x47   :  { %v3720_v7 = vld [vmem:[#allocation5 + $0x40] sm:$0xf]  ;;  %v4521_v10 = vor.u32 %v5474_v3, %v4520_v2  ;;  %2527 = vmatpush.bf16.msra.mxu2 %v4265_v6  ;;  %v3885_v2 = vor.u32 %v5310_v55, %v3882_v56  ;;  %v3757_v55 = vor.u32 %v5278_v46, %v3754_v47  ;;  %v5162_v46 = vld [vmem:[#allocation5 + $0xba0] sm:$0xf0] }
  0x48   :  { %v5274_v8 = vld [vmem:[#allocation5 + $0x5c] sm:$0xf0]  ;;  %v5430_v47 = vld [vmem:[#allocation5 + $0x544] sm:$0xf] }
  0x49   :  { %v3976_v9 = vld [vmem:[#allocation5 + $0x240] sm:$0xf]  ;;  %v3721_v17 = vor.u32 %v5274_v8, %v3720_v7  ;;  %2540 = vmatpush.bf16.msra.mxu3 %v4521_v10  ;;  %v5302_v7 = vld [vmem:[#allocation5 + $0x144] sm:$0xf]  ;;  %v4141_v10 = vor.u32 %v5374_v63, %v4138_v0 }
  0x4a   :  { %v5338_v11 = vld [vmem:[#allocation5 + $0x25c] sm:$0xf0]  ;;  %v3850_v8 = vld [vmem:[#allocation5 + $0x160] sm:$0xf0] }
  0x4b   :  { %v4232_v12 = vld [vmem:[#allocation5 + $0x440] sm:$0xf]  ;;  %v3977_v21 = vor.u32 %v5338_v11, %v3976_v9  ;;  %2502 = vmatpush.bf16.msra.mxu0 %v3721_v17  ;;  %v6205_v9 = vpack.c.b16 %v513_v58, %v513_v58  ;;  %v3722_v63 = vld [vmem:[#allocation5 + $0x60] sm:$0xf0] }
  0x4c   :  { %v5402_v13 = vld [vmem:[#allocation5 + $0x45c] sm:$0xf0]  ;;  %v5334_v0 = vld [vmem:[#allocation5 + $0x244] sm:$0xf] }
  0x4d   :  { %v4488_v14 = vld [vmem:[#allocation5 + $0x640] sm:$0xf]  ;;  %v4233_v22 = vor.u32 %v5402_v13, %v4232_v12  ;;  %2515 = vmatpush.bf16.msra.mxu1 %v3977_v21  ;;  %v5366_v12 = vld [vmem:[#allocation5 + $0x344] sm:$0xf] }
  0x4e   :  { %v5466_v15 = vld [vmem:[#allocation5 + $0x65c] sm:$0xf0]  ;;  %v4106_v13 = vld [vmem:[#allocation5 + $0x360] sm:$0xf0] }
  0x4f   :  { %v3688_v16 = vld [vmem:[#allocation5] sm:$0xf]  ;;  %v4489_v26 = vor.u32 %v5466_v15, %v4488_v14  ;;  %2528 = vmatpush.bf16.msra.mxu2 %v4233_v22  ;;  %v3853_v15 = vor.u32 %v5302_v7, %v3850_v8  ;;  %v3818_v21 = vld [vmem:[#allocation5 + $0x120] sm:$0xf0]  ;;  %v97_v22 = vld [vmem:[#allocation2 + $0x18] sm:$0xf] }
  0x50   :  { %v5266_v18 = vld [vmem:[#allocation5 + $0x1c] sm:$0xf0]  ;;  %v518_v35 = vunpack.c.l.b16 %v97_v22  ;;  %v4938_v22 = vld [vmem:[#allocation5 + $0x9e0] sm:$0xf0] }
  0x51   :  { %v3944_v19 = vld [vmem:[#allocation5 + $0x200] sm:$0xf]  ;;  %v3689_v33 = vor.u32 %v5266_v18, %v3688_v16  ;;  %2541 = vmatpush.bf16.msra.mxu3 %v4489_v26  ;;  %v4074_v26 = vld [vmem:[#allocation5 + $0x320] sm:$0xf0] }
  0x52   :  { %v5330_v20 = vld [vmem:[#allocation5 + $0x21c] sm:$0xf0]  ;;  %v4077_v36 = vor.u32 %v5358_v25, %v4074_v26  ;;  %v5326_v26 = vld [vmem:[#allocation5 + $0x204] sm:$0xf] }
  0x53   :  { %v4200_v23 = vld [vmem:[#allocation5 + $0x400] sm:$0xf]  ;;  %v3945_v38 = vor.u32 %v5330_v20, %v3944_v19  ;;  %2503 = vmatpush.bf16.msra.mxu0 %v3689_v33  ;;  %v5294_v20 = vld [vmem:[#allocation5 + $0x104] sm:$0xf] }
  0x54   :  { %v5394_v24 = vld [vmem:[#allocation5 + $0x41c] sm:$0xf0]  ;;  %v5286_v33 = vld [vmem:[#allocation5 + $0xc4] sm:$0xf] }
  0x55   :  { %v4456_v27 = vld [vmem:[#allocation5 + $0x600] sm:$0xf]  ;;  %v4201_v39 = vor.u32 %v5394_v24, %v4200_v23  ;;  %2516 = vmatpush.bf16.msra.mxu1 %v3945_v38  ;;  %v4109_v23 = vor.u32 %v5366_v12, %v4106_v13  ;;  %v5350_v38 = vld [vmem:[#allocation5 + $0x2c4] sm:$0xf]  ;;  %v3789_v41 = vor.u32 %v5286_v33, %v3786_v34 }
  0x56   :  { %v5458_v28 = vld [vmem:[#allocation5 + $0x61c] sm:$0xf0]  ;;  %2504 = vmatmul.bf16.vlgmr.msra.gmra.mxu0 %v6199_v57  ;;  %v5262_v12 = vld [vmem:[#allocation5 + $0x4] sm:$0xf] }
  0x57   :  { %v4936_v29 = vld [vmem:[#allocation5 + $0x9c0] sm:$0xf]  ;;  %v4457_v43 = vor.u32 %v5458_v28, %v4456_v27  ;;  %2529 = vmatpush.bf16.msra.mxu2 %v4201_v39  ;;  %v3821_v28 = vor.u32 %v5294_v20, %v3818_v21  ;;  %v4042_v39 = vld [vmem:[#allocation5 + $0x2e0] sm:$0xf0] }
  0x58   :  { %v5578_v30 = vld [vmem:[#allocation5 + $0x9dc] sm:$0xf0]  ;;  %2517 = vmatmul.bf16.vlgmr.msra.gmra.mxu1 %v6205_v9  ;;  %v3690_v13 = vld [vmem:[#allocation5 + $0x20] sm:$0xf0] }
  0x59   :  { %v5192_v31 = vld [vmem:[#allocation5 + $0xbc0] sm:$0xf]  ;;  %v4937_v44 = vor.u32 %v5578_v30, %v4936_v29  ;;  %2542 = vmatpush.bf16.msra.mxu3 %v4457_v43  ;;  %v5574_v21 = vld [vmem:[#allocation5 + $0x9c4] sm:$0xf]  ;;  %v3693_v25 = vor.u32 %v5262_v12, %v3690_v13 }
  0x5a   :  { %v5642_v32 = vld [vmem:[#allocation5 + $0xbdc] sm:$0xf0]  ;;  %2530 = vmatmul.bf16.vlgmr.msra.gmra.mxu2 %v6197_v53  ;;  %v4941_v33 = vor.u32 %v5574_v21, %v4938_v22  ;;  %v5414_v12 = vld [vmem:[#allocation5 + $0x4c4] sm:$0xf] }
  0x5b   :  { %v5224_v40 = vld [vmem:[#allocation5 + $0xc00] sm:$0xf]  ;;  %v5193_v48 = vor.u32 %v5642_v32, %v5192_v31  ;;  %2548 = vmatpush.bf16.msrb.mxu0 %v4937_v44  ;;  %v5606_v22 = vld [vmem:[#allocation5 + $0xac4] sm:$0xf] }
  0x5c   :  { %v5650_v45 = vld [vmem:[#allocation5 + $0xc1c] sm:$0xf0]  ;;  %2543 = vmatmul.bf16.vlgmr.msra.gmra.mxu3 %v6201_v60 }
  0x5d   :  { %v4904_v50 = vld [vmem:[#allocation5 + $0x980] sm:$0xf]  ;;  %v5225_v59 = vor.u32 %v5650_v45, %v5224_v40  ;;  %2561 = vmatpush.bf16.msrb.mxu1 %v5193_v48  ;;  %2587 = vmatpush.bf16.msrb.mxu3 %v3917_v49  ;;  %v6209_v48 = vpack.c.b16 %v518_v35, %v518_v35  ;;  %v4045_v49 = vor.u32 %v5350_v38, %v4042_v39  ;;  %v4394_v35 = vld [vmem:[#allocation5 + $0x5a0] sm:$0xf0] }
  0x5e   :  { %v5570_v51 = vld [vmem:[#allocation5 + $0x99c] sm:$0xf0] }
  0x5f   :  { %v5160_v52 = vld [vmem:[#allocation5 + $0xb80] sm:$0xf]  ;;  %v4905_v62 = vor.u32 %v5570_v51, %v4904_v50  ;;  %2581 = vmatpush.bf16.msrb.mxu2 %v5225_v59  ;;  %v5342_v51 = vld [vmem:[#allocation5 + $0x284] sm:$0xf] }
  0x60   :  { %v5634_v54 = vld [vmem:[#allocation5 + $0xb9c] sm:$0xf0] }
  0x61   :  { %v5161_v1 = vor.u32 %v5634_v54, %v5160_v52  ;;  %v4872_v3 = vld [vmem:[#allocation5 + $0x940] sm:$0xf]  ;;  %2549 = vmatpush.bf16.msrb.mxu0 %v4905_v62  ;;  %2588 = vmatpush.bf16.msrb.mxu3 %v3885_v2  ;;  %v4010_v52 = vld [vmem:[#allocation5 + $0x2a0] sm:$0xf0] }
  0x62   :  { %v5562_v4 = vld [vmem:[#allocation5 + $0x95c] sm:$0xf0]  ;;  %v5270_v62 = vld [vmem:[#allocation5 + $0x44] sm:$0xf] }
  0x63   :  { %v5128_v5 = vld [vmem:[#allocation5 + $0xb40] sm:$0xf]  ;;  %2600 = vmatpush.bf16.msra.mxu2 %v4173_v61  ;;  %v4873_v11 = vor.u32 %v5562_v4, %v4872_v3  ;;  %2562 = vmatpush.bf16.msrb.mxu1 %v5161_v1  ;;  %v4013_v1 = vor.u32 %v5342_v51, %v4010_v52  ;;  %v3978_v3 = vld [vmem:[#allocation5 + $0x260] sm:$0xf0]  ;;  %v3725_v7 = vor.u32 %v5270_v62, %v3722_v63 }
  0x64   :  { %v5626_v6 = vld [vmem:[#allocation5 + $0xb5c] sm:$0xf0]  ;;  %v5494_v51 = vld [vmem:[#allocation5 + $0x744] sm:$0xf] }
  0x65   :  { %v5129_v14 = vor.u32 %v5626_v6, %v5128_v5  ;;  %v4840_v16 = vld [vmem:[#allocation5 + $0x900] sm:$0xf]  ;;  %2550 = vmatpush.bf16.msrb.mxu0 %v4873_v11  ;;  %2589 = vmatpush.bf16.msrb.mxu3 %v3853_v15  ;;  %v96_v5 = vld [vmem:[#allocation2 + $0x10] sm:$0xff]  ;;  %v4426_v15 = vld [vmem:[#allocation5 + $0x5e0] sm:$0xf0] }
  0x66   :  { %v5554_v17 = vld [vmem:[#allocation5 + $0x91c] sm:$0xf0]  ;;  %v4618_v52 = vld [vmem:[#allocation5 + $0x760] sm:$0xf0] }
  0x67   :  { %v5096_v18 = vld [vmem:[#allocation5 + $0xb00] sm:$0xf]  ;;  %2601 = vmatpush.bf16.msra.mxu2 %v4141_v10  ;;  %v4841_v24 = vor.u32 %v5554_v17, %v4840_v16  ;;  %2563 = vmatpush.bf16.msrb.mxu1 %v5129_v14  ;;  %v5446_v14 = vld [vmem:[#allocation5 + $0x5c4] sm:$0xf] }
  0x68   :  { %v5618_v19 = vld [vmem:[#allocation5 + $0xb1c] sm:$0xf0]  ;;  %v5510_v16 = vld [vmem:[#allocation5 + $0x7c4] sm:$0xf] }
  0x69   :  { %v5097_v27 = vor.u32 %v5618_v19, %v5096_v18  ;;  %v4808_v29 = vld [vmem:[#allocation5 + $0x8c0] sm:$0xf]  ;;  %2551 = vmatpush.bf16.msrb.mxu0 %v4841_v24  ;;  %2590 = vmatpush.bf16.msrb.mxu3 %v3821_v28  ;;  %v4682_v17 = vld [vmem:[#allocation5 + $0x7e0] sm:$0xf0]  ;;  %v516_v18 = vunpack.c.l.b16 %v96_v5  ;;  %v3981_v19 = vor.u32 %v5334_v0, %v3978_v3  ;;  %v4429_v28 = vor.u32 %v5446_v14, %v4426_v15 }
  0x6a   :  { %v5546_v30 = vld [vmem:[#allocation5 + $0x8dc] sm:$0xf0]  ;;  %5254 = vmatmul.msk.bf16.vlgmr.msrb.gmra.mxu2 %vm2492_vm0, %v6209_v48  ;;  %v5130_v62 = vld [vmem:[#allocation5 + $0xb60] sm:$0xf0] }
  0x6b   :  { %v5064_v31 = vld [vmem:[#allocation5 + $0xac0] sm:$0xf]  ;;  %2602 = vmatpush.bf16.msra.mxu2 %v4109_v23  ;;  %v4809_v37 = vor.u32 %v5546_v30, %v4808_v29  ;;  %2564 = vmatpush.bf16.msrb.mxu1 %v5097_v27  ;;  %v517_v23 = vunpack.c.h.b16 %v96_v5  ;;  %v3946_v27 = vld [vmem:[#allocation5 + $0x220] sm:$0xf0]  ;;  %v4685_v29 = vor.u32 %v5510_v16, %v4682_v17  ;;  %v6213_v34 = vpack.c.b16 %v516_v18, %v516_v18 }
  0x6c   :  { %v5610_v32 = vld [vmem:[#allocation5 + $0xadc] sm:$0xf0]  ;;  %v5638_v30 = vld [vmem:[#allocation5 + $0xbc4] sm:$0xf]  ;;  %v3949_v38 = vor.u32 %v5326_v26, %v3946_v27 }
  0x6d   :  { %v5065_v40 = vor.u32 %v5610_v32, %v5064_v31  ;;  %v4776_v42 = vld [vmem:[#allocation5 + $0x880] sm:$0xf]  ;;  %2552 = vmatpush.bf16.msrb.mxu0 %v4809_v37  ;;  %2591 = vmatpush.bf16.msrb.mxu3 %v3789_v41  ;;  %v5194_v31 = vld [vmem:[#allocation5 + $0xbe0] sm:$0xf0]  ;;  %v6215_v39 = vpack.c.b16 %v517_v23, %v517_v23 }
  0x6e   :  { %v5538_v43 = vld [vmem:[#allocation5 + $0x89c] sm:$0xf0]  ;;  %v5438_v32 = vld [vmem:[#allocation5 + $0x584] sm:$0xf] }
  0x6f   :  { %v5032_v44 = vld [vmem:[#allocation5 + $0xa80] sm:$0xf]  ;;  %2603 = vmatpush.bf16.msra.mxu2 %v4077_v36  ;;  %v4777_v50 = vor.u32 %v5538_v43, %v4776_v42  ;;  %2565 = vmatpush.bf16.msrb.mxu1 %v5065_v40  ;;  %v5502_v36 = vld [vmem:[#allocation5 + $0x784] sm:$0xf]  ;;  %v5197_v42 = vor.u32 %v5638_v30, %v5194_v31  ;;  %v4397_v43 = vor.u32 %v5438_v32, %v4394_v35 }
  0x70   :  { %v5602_v45 = vld [vmem:[#allocation5 + $0xa9c] sm:$0xf0]  ;;  %v4650_v37 = vld [vmem:[#allocation5 + $0x7a0] sm:$0xf0] }
  0x71   :  { %v5033_v54 = vor.u32 %v5602_v45, %v5032_v44  ;;  %v4744_v56 = vld [vmem:[#allocation5 + $0x840] sm:$0xf]  ;;  %2553 = vmatpush.bf16.msrb.mxu0 %v4777_v50  ;;  %2592 = vmatpush.bf16.msrb.mxu3 %v3757_v55  ;;  %v5566_v40 = vld [vmem:[#allocation5 + $0x984] sm:$0xf]  ;;  %v4653_v44 = vor.u32 %v5502_v36, %v4650_v37 }
  0x72   :  { %v5530_v58 = vld [vmem:[#allocation5 + $0x85c] sm:$0xf0]  ;;  %v4906_v41 = vld [vmem:[#allocation5 + $0x9a0] sm:$0xf0] }
  0x73   :  { %v5000_v59 = vld [vmem:[#allocation5 + $0xa40] sm:$0xf]  ;;  %2604 = vmatpush.bf16.msra.mxu2 %v4045_v49  ;;  %v4745_v2 = vor.u32 %v5530_v58, %v4744_v56  ;;  %2566 = vmatpush.bf16.msrb.mxu1 %v5033_v54  ;;  %v5630_v45 = vld [vmem:[#allocation5 + $0xb84] sm:$0xf]  ;;  %v4909_v49 = vor.u32 %v5566_v40, %v4906_v41 }
  0x74   :  { %v5594_v61 = vld [vmem:[#allocation5 + $0xa5c] sm:$0xf0]  ;;  %v4362_v50 = vld [vmem:[#allocation5 + $0x560] sm:$0xf0]  ;;  %v5165_v56 = vor.u32 %v5630_v45, %v5162_v46 }
  0x75   :  { %v4712_v4 = vld [vmem:[#allocation5 + $0x800] sm:$0xf]  ;;  %v5001_v6 = vor.u32 %v5594_v61, %v5000_v59  ;;  %2554 = vmatpush.bf16.msrb.mxu0 %v4745_v2  ;;  %2593 = vmatpush.bf16.msrb.mxu3 %v3725_v7  ;;  %v5558_v54 = vld [vmem:[#allocation5 + $0x944] sm:$0xf]  ;;  %v4365_v58 = vor.u32 %v5430_v47, %v4362_v50  ;;  %v4621_v59 = vor.u32 %v5494_v51, %v4618_v52 }
  0x76   :  { %v5522_v8 = vld [vmem:[#allocation5 + $0x81c] sm:$0xf0]  ;;  %v4874_v55 = vld [vmem:[#allocation5 + $0x960] sm:$0xf0] }
  0x77   :  { %v4968_v10 = vld [vmem:[#allocation5 + $0xa00] sm:$0xf]  ;;  %2605 = vmatpush.bf16.msra.mxu2 %v4013_v1  ;;  %v4713_v20 = vor.u32 %v5522_v8, %v4712_v4  ;;  %2567 = vmatpush.bf16.msrb.mxu1 %v5001_v6  ;;  %v5622_v61 = vld [vmem:[#allocation5 + $0xb44] sm:$0xf]  ;;  %v4877_v0 = vor.u32 %v5558_v54, %v4874_v55 }
  0x78   :  { %v5586_v11 = vld [vmem:[#allocation5 + $0xa1c] sm:$0xf0]  ;;  %v5422_v63 = vld [vmem:[#allocation5 + $0x504] sm:$0xf]  ;;  %v5133_v6 = vor.u32 %v5622_v61, %v5130_v62  ;;  %v3920_v61 = vld [vmem:[#allocation5 + $0x1c8] sm:$0xf] }
  0x79   :  { %v4969_v24 = vor.u32 %v5586_v11, %v4968_v10  ;;  %2555 = vmatpush.bf16.msrb.mxu0 %v4713_v20  ;;  %2594 = vmatpush.bf16.msrb.mxu3 %v3693_v25  ;;  %v4330_v1 = vld [vmem:[#allocation5 + $0x520] sm:$0xf0]  ;;  %v5323_v62 = vld [vmem:[#allocation5 + $0x1e4] sm:$0xf0] }
  0x7a   :  { %v5486_v2 = vld [vmem:[#allocation5 + $0x704] sm:$0xf]  ;;  %v4333_v7 = vor.u32 %v5422_v63, %v4330_v1  ;;  %v4432_v63 = vld [vmem:[#allocation5 + $0x5c8] sm:$0xf] }
  0x7b   :  { %2606 = vmatpush.bf16.msra.mxu2 %v3981_v19  ;;  %2568 = vmatpush.bf16.msrb.mxu1 %v4969_v24  ;;  %v4586_v3 = vld [vmem:[#allocation5 + $0x720] sm:$0xf0]  ;;  %v5451_v1 = vld [vmem:[#allocation5 + $0x5e4] sm:$0xf0] }
  0x7c   :  { %2556 = vmatmul.bf16.vlgmr.msrb.gmra.mxu0 %v6213_v34  ;;  %2595 = vmatmul.bf16.vlgmr.msrb.gmra.mxu3 %v6199_v57  ;;  %v5550_v4 = vld [vmem:[#allocation5 + $0x904] sm:$0xf]  ;;  %v4589_v8 = vor.u32 %v5486_v2, %v4586_v3 }
  0x7d   :  { %2613 = vmatpush.bf16.msra.mxu0 %v4429_v28  ;;  %2639 = vmatpush.bf16.msra.mxu3 %v4941_v33  ;;  %v4842_v5 = vld [vmem:[#allocation5 + $0x920] sm:$0xf0] }
  0x7e   :  { %2569 = vmatmul.bf16.vlgmr.msrb.gmra.mxu1 %v6215_v39  ;;  %v5614_v10 = vld [vmem:[#allocation5 + $0xb04] sm:$0xf]  ;;  %v4845_v13 = vor.u32 %v5550_v4, %v4842_v5 }
  0x7f   :  { %2626 = vmatpush.bf16.msra.mxu1 %v4685_v29  ;;  %2607 = vmatpush.bf16.msra.mxu2 %v3949_v38  ;;  %v5098_v11 = vld [vmem:[#allocation5 + $0xb20] sm:$0xf0] }
  0x80   :  { %v4298_v14 = vld [vmem:[#allocation5 + $0x4e0] sm:$0xf0]  ;;  %v5101_v19 = vor.u32 %v5614_v10, %v5098_v11  ;;  %v3921_v10 = vor.u32 %v5323_v62, %v3920_v61  ;;  %v4688_v11 = vld [vmem:[#allocation5 + $0x7c8] sm:$0xf] }
  0x81   :  { %2614 = vmatpush.bf16.msra.mxu0 %v4397_v43  ;;  %2640 = vmatpush.bf16.msra.mxu3 %v4909_v49  ;;  %v5478_v15 = vld [vmem:[#allocation5 + $0x6c4] sm:$0xf]  ;;  %v4301_v20 = vor.u32 %v5414_v12, %v4298_v14  ;;  %v5515_v12 = vld [vmem:[#allocation5 + $0x7e4] sm:$0xf0] }
  0x82   :  { %2608 = vmatmul.bf16.vlgmr.msra.gmra.mxu2 %v6205_v9  ;;  %v4554_v16 = vld [vmem:[#allocation5 + $0x6e0] sm:$0xf0]  ;;  %v5291_v61 = vld [vmem:[#allocation5 + $0xe4] sm:$0xf0] }
  0x83   :  { %2652 = vmatpush.bf16.msrb.mxu2 %v5197_v42  ;;  %2627 = vmatpush.bf16.msra.mxu1 %v4653_v44  ;;  %v5542_v17 = vld [vmem:[#allocation5 + $0x8c4] sm:$0xf]  ;;  %v4557_v21 = vor.u32 %v5478_v15, %v4554_v16  ;;  %v4176_v15 = vld [vmem:[#allocation5 + $0x3c8] sm:$0xf] }
  0x84   :  { %v4810_v18 = vld [vmem:[#allocation5 + $0x8e0] sm:$0xf0]  ;;  %v5387_v16 = vld [vmem:[#allocation5 + $0x3e4] sm:$0xf0] }
  0x85   :  { %2615 = vmatpush.bf16.msra.mxu0 %v4365_v58  ;;  %2641 = vmatpush.bf16.msra.mxu3 %v4877_v0  ;;  %v5066_v23 = vld [vmem:[#allocation5 + $0xae0] sm:$0xf0]  ;;  %v4813_v25 = vor.u32 %v5542_v17, %v4810_v18  ;;  %v3888_v17 = vld [vmem:[#allocation5 + $0x188] sm:$0xf] }
  0x86   :  { %v5406_v24 = vld [vmem:[#allocation5 + $0x484] sm:$0xf]  ;;  %v5069_v31 = vor.u32 %v5606_v22, %v5066_v23  ;;  %v4689_v22 = vor.u32 %v5515_v12, %v4688_v11  ;;  %v4177_v23 = vor.u32 %v5387_v16, %v4176_v15  ;;  %v4304_v62 = vld [vmem:[#allocation5 + $0x4c8] sm:$0xf] }
  0x87   :  { %2653 = vmatpush.bf16.msrb.mxu2 %v5165_v56  ;;  %2628 = vmatpush.bf16.msra.mxu1 %v4621_v59  ;;  %v4266_v26 = vld [vmem:[#allocation5 + $0x4a0] sm:$0xf0]  ;;  %v4272_v11 = vld [vmem:[#allocation5 + $0x488] sm:$0xf] }
  0x88   :  { %v5470_v27 = vld [vmem:[#allocation5 + $0x684] sm:$0xf]  ;;  %v4269_v32 = vor.u32 %v5406_v24, %v4266_v26  ;;  %v4656_v24 = vld [vmem:[#allocation5 + $0x788] sm:$0xf] }
  0x89   :  { %2616 = vmatpush.bf16.msra.mxu0 %v4333_v7  ;;  %2642 = vmatpush.bf16.msra.mxu3 %v4845_v13  ;;  %v4522_v28 = vld [vmem:[#allocation5 + $0x6a0] sm:$0xf0]  ;;  %v4433_v13 = vor.u32 %v5451_v1, %v4432_v63  ;;  %v5419_v63 = vld [vmem:[#allocation5 + $0x4e4] sm:$0xf0] }
  0x8a   :  { %v5534_v29 = vld [vmem:[#allocation5 + $0x884] sm:$0xf]  ;;  %v4525_v33 = vor.u32 %v5470_v27, %v4522_v28  ;;  %v4144_v28 = vld [vmem:[#allocation5 + $0x388] sm:$0xf] }
  0x8b   :  { %2654 = vmatpush.bf16.msrb.mxu2 %v5133_v6  ;;  %2629 = vmatpush.bf16.msra.mxu1 %v4589_v8  ;;  %v4778_v30 = vld [vmem:[#allocation5 + $0x8a0] sm:$0xf0]  ;;  %v5411_v12 = vld [vmem:[#allocation5 + $0x4a4] sm:$0xf0] }
  0x8c   :  { %v5598_v35 = vld [vmem:[#allocation5 + $0xa84] sm:$0xf]  ;;  %v4781_v38 = vor.u32 %v5534_v29, %v4778_v30  ;;  %v5379_v29 = vld [vmem:[#allocation5 + $0x3a4] sm:$0xf0] }
  0x8d   :  { %2617 = vmatpush.bf16.msra.mxu0 %v4301_v20  ;;  %v5034_v36 = vld [vmem:[#allocation5 + $0xaa0] sm:$0xf0]  ;;  %2643 = vmatpush.bf16.msra.mxu3 %v4813_v25  ;;  %v4400_v20 = vld [vmem:[#allocation5 + $0x588] sm:$0xf] }
  0x8e   :  { %v5398_v37 = vld [vmem:[#allocation5 + $0x444] sm:$0xf]  ;;  %v5037_v45 = vor.u32 %v5598_v35, %v5034_v36  ;;  %v5507_v25 = vld [vmem:[#allocation5 + $0x7a4] sm:$0xf0]  ;;  %v4145_v36 = vor.u32 %v5379_v29, %v4144_v28 }
  0x8f   :  { %2655 = vmatpush.bf16.msrb.mxu2 %v5101_v19  ;;  %2630 = vmatpush.bf16.msra.mxu1 %v4557_v21  ;;  %v4234_v40 = vld [vmem:[#allocation5 + $0x460] sm:$0xf0]  ;;  %v5315_v19 = vld [vmem:[#allocation5 + $0x1a4] sm:$0xf0]  ;;  %v4657_v35 = vor.u32 %v5507_v25, %v4656_v24 }
  0x90   :  { %v5462_v41 = vld [vmem:[#allocation5 + $0x644] sm:$0xf]  ;;  %v4237_v50 = vor.u32 %v5398_v37, %v4234_v40  ;;  %v5443_v21 = vld [vmem:[#allocation5 + $0x5a4] sm:$0xf0]  ;;  %v3889_v26 = vor.u32 %v5315_v19, %v3888_v17 }
  0x91   :  { %v4490_v42 = vld [vmem:[#allocation5 + $0x660] sm:$0xf0]  ;;  %2618 = vmatpush.bf16.msra.mxu0 %v4269_v32  ;;  %2644 = vmatpush.bf16.msra.mxu3 %v4781_v38  ;;  %v4401_v27 = vor.u32 %v5443_v21, %v4400_v20  ;;  %v3856_v30 = vld [vmem:[#allocation5 + $0x148] sm:$0xf] }
  0x92   :  { %v5526_v43 = vld [vmem:[#allocation5 + $0x844] sm:$0xf]  ;;  %v4493_v51 = vor.u32 %v5462_v41, %v4490_v42  ;;  %v4368_v32 = vld [vmem:[#allocation5 + $0x548] sm:$0xf] }
  0x93   :  { %v4746_v44 = vld [vmem:[#allocation5 + $0x860] sm:$0xf0]  ;;  %2656 = vmatpush.bf16.msrb.mxu2 %v5069_v31  ;;  %2631 = vmatpush.bf16.msra.mxu1 %v4525_v33  ;;  %v5307_v31 = vld [vmem:[#allocation5 + $0x164] sm:$0xf0] }
  0x94   :  { %v5590_v46 = vld [vmem:[#allocation5 + $0xa44] sm:$0xf]  ;;  %v4749_v56 = vor.u32 %v5526_v43, %v4746_v44  ;;  %v5435_v33 = vld [vmem:[#allocation5 + $0x564] sm:$0xf0]  ;;  %v3857_v40 = vor.u32 %v5307_v31, %v3856_v30 }
  0x95   :  { %v5002_v47 = vld [vmem:[#allocation5 + $0xa60] sm:$0xf0]  ;;  %2619 = vmatpush.bf16.msra.mxu0 %v4237_v50  ;;  %v4624_v37 = vld [vmem:[#allocation5 + $0x748] sm:$0xf]  ;;  %v4369_v41 = vor.u32 %v5435_v33, %v4368_v32 }
  0x96   :  { %v5390_v49 = vld [vmem:[#allocation5 + $0x404] sm:$0xf]  ;;  %v5005_v0 = vor.u32 %v5590_v46, %v5002_v47  ;;  %2645 = vmatpush.bf16.msra.mxu3 %v4749_v56  ;;  %v5499_v38 = vld [vmem:[#allocation5 + $0x764] sm:$0xf0] }
  0x97   :  { %v4202_v52 = vld [vmem:[#allocation5 + $0x420] sm:$0xf0]  ;;  %2657 = vmatpush.bf16.msrb.mxu2 %v5037_v45  ;;  %2632 = vmatpush.bf16.msra.mxu1 %v4493_v51  ;;  %v4112_v42 = vld [vmem:[#allocation5 + $0x348] sm:$0xf] }
  0x98   :  { %v5454_v54 = vld [vmem:[#allocation5 + $0x604] sm:$0xf]  ;;  %v4205_v4 = vor.u32 %v5390_v49, %v4202_v52  ;;  %v5371_v43 = vld [vmem:[#allocation5 + $0x364] sm:$0xf0]  ;;  %v4625_v49 = vor.u32 %v5499_v38, %v4624_v37 }
  0x99   :  { %v4458_v55 = vld [vmem:[#allocation5 + $0x620] sm:$0xf0]  ;;  %v3824_v44 = vld [vmem:[#allocation5 + $0x108] sm:$0xf]  ;;  %v4113_v50 = vor.u32 %v5371_v43, %v4112_v42 }
  0x9a   :  { %v5518_v58 = vld [vmem:[#allocation5 + $0x804] sm:$0xf]  ;;  %v4461_v5 = vor.u32 %v5454_v54, %v4458_v55  ;;  %2620 = vmatpush.bf16.msra.mxu0 %v4205_v4  ;;  %v5299_v45 = vld [vmem:[#allocation5 + $0x124] sm:$0xf0] }
  0x9b   :  { %v4714_v59 = vld [vmem:[#allocation5 + $0x820] sm:$0xf0]  ;;  %2658 = vmatpush.bf16.msrb.mxu2 %v5005_v0  ;;  %v4336_v46 = vld [vmem:[#allocation5 + $0x508] sm:$0xf]  ;;  %v3825_v54 = vor.u32 %v5299_v45, %v3824_v44 }
  0x9c   :  { %v5646_v2 = vld [vmem:[#allocation5 + $0xc04] sm:$0xf]  ;;  %v4717_v8 = vor.u32 %v5518_v58, %v4714_v59  ;;  %2633 = vmatpush.bf16.msra.mxu1 %v4461_v5  ;;  %v5427_v47 = vld [vmem:[#allocation5 + $0x524] sm:$0xf0]  ;;  %v4305_v5 = vor.u32 %v5419_v63, %v4304_v62  ;;  %v4178_v63 = vld [vmem:[#allocation5 + $0x3e8] sm:$0xf0] }
  0x9d   :  { %v5226_v3 = vld [vmem:[#allocation5 + $0xc20] sm:$0xf0]  ;;  %2621 = vmatmul.bf16.vlgmr.msra.gmra.mxu0 %v6197_v53  ;;  %v4592_v51 = vld [vmem:[#allocation5 + $0x708] sm:$0xf]  ;;  %v4337_v55 = vor.u32 %v5427_v47, %v4336_v46 }
  0x9e   :  { %v5582_v6 = vld [vmem:[#allocation5 + $0xa04] sm:$0xf]  ;;  %v5229_v14 = vor.u32 %v5646_v2, %v5226_v3  ;;  %2646 = vmatpush.bf16.msra.mxu3 %v4717_v8  ;;  %2704 = vmatpush.bf16.msrb.mxu0 %v4433_v13  ;;  %v5491_v52 = vld [vmem:[#allocation5 + $0x724] sm:$0xf0] }
  0x9f   :  { %v4970_v7 = vld [vmem:[#allocation5 + $0xa20] sm:$0xf0]  ;;  %2634 = vmatmul.bf16.vlgmr.msra.gmra.mxu1 %v6201_v60  ;;  %v4080_v56 = vld [vmem:[#allocation5 + $0x308] sm:$0xf]  ;;  %v4593_v0 = vor.u32 %v5491_v52, %v4592_v51 }
  0xa0   :  { %v4973_v18 = vor.u32 %v5582_v6, %v4970_v7  ;;  %2678 = vmatpush.bf16.msrb.mxu1 %v3921_v10  ;;  %v5363_v58 = vld [vmem:[#allocation5 + $0x324] sm:$0xf0] }
  0xa1   :  { %2647 = vmatmul.bf16.vlgmr.msra.gmra.mxu3 %v6213_v34  ;;  %v3792_v59 = vld [vmem:[#allocation5 + $0xc8] sm:$0xf]  ;;  %v4081_v1 = vor.u32 %v5363_v58, %v4080_v56  ;;  %v5319_v58 = vld [vmem:[#allocation5 + $0x1cc] sm:$0xf] }
  0xa2   :  { %2672 = vmatpush.bf16.msrb.mxu3 %v5229_v14  ;;  %2659 = vmatpush.bf16.msrb.mxu2 %v4973_v18  ;;  %v4560_v2 = vld [vmem:[#allocation5 + $0x6c8] sm:$0xf]  ;;  %v3793_v4 = vor.u32 %v5291_v61, %v3792_v59  ;;  %v4273_v18 = vor.u32 %v5411_v12, %v4272_v11  ;;  %v3922_v59 = vld [vmem:[#allocation5 + $0x1e8] sm:$0xf0] }
  0xa3   :  { %2705 = vmatpush.bf16.msrb.mxu0 %v4401_v27  ;;  %v5483_v3 = vld [vmem:[#allocation5 + $0x6e4] sm:$0xf0]  ;;  %v5383_v61 = vld [vmem:[#allocation5 + $0x3cc] sm:$0xf] }
  0xa4   :  { %2679 = vmatpush.bf16.msrb.mxu1 %v3889_v26  ;;  %v4048_v6 = vld [vmem:[#allocation5 + $0x2c8] sm:$0xf]  ;;  %v4561_v13 = vor.u32 %v5483_v3, %v4560_v2  ;;  %v3890_v11 = vld [vmem:[#allocation5 + $0x1a8] sm:$0xf0] }
  0xa5   :  { %2660 = vmatmul.bf16.vlgmr.msrb.gmra.mxu2 %v6215_v39  ;;  %v5355_v7 = vld [vmem:[#allocation5 + $0x2e4] sm:$0xf0]  ;;  %v5375_v12 = vld [vmem:[#allocation5 + $0x38c] sm:$0xf] }
  0xa6   :  { %2717 = vmatpush.bf16.msra.mxu2 %v4689_v22  ;;  %2691 = vmatpush.bf16.msra.mxu3 %v4177_v23  ;;  %v3760_v8 = vld [vmem:[#allocation5 + $0x88] sm:$0xf]  ;;  %v4049_v14 = vor.u32 %v5355_v7, %v4048_v6  ;;  %v4181_v7 = vor.u32 %v5383_v61, %v4178_v63 }
  0xa7   :  { %2706 = vmatpush.bf16.msrb.mxu0 %v4369_v41  ;;  %v5283_v10 = vld [vmem:[#allocation5 + $0xa4] sm:$0xf0] }
  0xa8   :  { %2680 = vmatpush.bf16.msrb.mxu1 %v3857_v40  ;;  %v4528_v15 = vld [vmem:[#allocation5 + $0x688] sm:$0xf]  ;;  %v3761_v17 = vor.u32 %v5283_v10, %v3760_v8  ;;  %v5311_v10 = vld [vmem:[#allocation5 + $0x18c] sm:$0xf] }
  0xa9   :  { %v5475_v16 = vld [vmem:[#allocation5 + $0x6a4] sm:$0xf0] }
  0xaa   :  { %2718 = vmatpush.bf16.msra.mxu2 %v4657_v35  ;;  %2692 = vmatpush.bf16.msra.mxu3 %v4145_v36  ;;  %v4016_v19 = vld [vmem:[#allocation5 + $0x288] sm:$0xf]  ;;  %v4529_v25 = vor.u32 %v5475_v16, %v4528_v15 }
  0xab   :  { %2707 = vmatpush.bf16.msrb.mxu0 %v4337_v55  ;;  %v5347_v20 = vld [vmem:[#allocation5 + $0x2a4] sm:$0xf0] }
  0xac   :  { %2681 = vmatpush.bf16.msrb.mxu1 %v3825_v54  ;;  %v3728_v21 = vld [vmem:[#allocation5 + $0x48] sm:$0xf]  ;;  %v4017_v26 = vor.u32 %v5347_v20, %v4016_v19 }
  0xad   :  { %v5275_v22 = vld [vmem:[#allocation5 + $0x64] sm:$0xf0] }
  0xae   :  { %2719 = vmatpush.bf16.msra.mxu2 %v4625_v49  ;;  %2693 = vmatpush.bf16.msra.mxu3 %v4113_v50  ;;  %v4240_v23 = vld [vmem:[#allocation5 + $0x448] sm:$0xf]  ;;  %v3729_v30 = vor.u32 %v5275_v22, %v3728_v21  ;;  %v5303_v22 = vld [vmem:[#allocation5 + $0x14c] sm:$0xf] }
  0xaf   :  { %2708 = vmatpush.bf16.msrb.mxu0 %v4305_v5  ;;  %v5403_v24 = vld [vmem:[#allocation5 + $0x464] sm:$0xf0] }
  0xb0   :  { %2682 = vmatpush.bf16.msrb.mxu1 %v3793_v4  ;;  %v3984_v27 = vld [vmem:[#allocation5 + $0x248] sm:$0xf]  ;;  %v4241_v31 = vor.u32 %v5403_v24, %v4240_v23  ;;  %v3925_v4 = vor.u32 %v5319_v58, %v3922_v59  ;;  %v3858_v23 = vld [vmem:[#allocation5 + $0x168] sm:$0xf0] }
  0xb1   :  { %5255 = vmatmul.msk.bf16.vlgmr.msrb.gmra.mxu3 %vm2492_vm0, %v6209_v48  ;;  %v4496_v28 = vld [vmem:[#allocation5 + $0x648] sm:$0xf]  ;;  %v5367_v24 = vld [vmem:[#allocation5 + $0x34c] sm:$0xf] }
  0xb2   :  { %2720 = vmatpush.bf16.msra.mxu2 %v4593_v0  ;;  %2694 = vmatpush.bf16.msra.mxu3 %v4081_v1  ;;  %v5467_v29 = vld [vmem:[#allocation5 + $0x664] sm:$0xf0] }
  0xb3   :  { %2709 = vmatpush.bf16.msrb.mxu0 %v4273_v18  ;;  %v5339_v32 = vld [vmem:[#allocation5 + $0x264] sm:$0xf0]  ;;  %v4497_v40 = vor.u32 %v5467_v29, %v4496_v28  ;;  %v3861_v29 = vor.u32 %v5303_v22, %v3858_v23 }
  0xb4   :  { %2683 = vmatpush.bf16.msrb.mxu1 %v3761_v17  ;;  %v3696_v33 = vld [vmem:[#allocation5 + $0x8] sm:$0xf]  ;;  %v3985_v44 = vor.u32 %v5339_v32, %v3984_v27  ;;  %v3893_v17 = vor.u32 %v5311_v10, %v3890_v11 }
  0xb5   :  { %v5267_v35 = vld [vmem:[#allocation5 + $0x24] sm:$0xf0] }
  0xb6   :  { %2721 = vmatpush.bf16.msra.mxu2 %v4561_v13  ;;  %2695 = vmatpush.bf16.msra.mxu3 %v4049_v14  ;;  %v4208_v36 = vld [vmem:[#allocation5 + $0x408] sm:$0xf]  ;;  %v3697_v49 = vor.u32 %v5267_v35, %v3696_v33  ;;  %v4146_v13 = vld [vmem:[#allocation5 + $0x3a8] sm:$0xf0] }
  0xb7   :  { %v5395_v37 = vld [vmem:[#allocation5 + $0x424] sm:$0xf0]  ;;  %2710 = vmatpush.bf16.msrb.mxu0 %v4241_v31  ;;  %v4149_v20 = vor.u32 %v5375_v12, %v4146_v13  ;;  %v5295_v35 = vld [vmem:[#allocation5 + $0x10c] sm:$0xf] }
  0xb8   :  { %v4944_v38 = vld [vmem:[#allocation5 + $0x9c8] sm:$0xf]  ;;  %2684 = vmatpush.bf16.msrb.mxu1 %v3729_v30  ;;  %v4209_v50 = vor.u32 %v5395_v37, %v4208_v36  ;;  %v3826_v36 = vld [vmem:[#allocation5 + $0x128] sm:$0xf0] }
  0xb9   :  { %v5579_v41 = vld [vmem:[#allocation5 + $0x9e4] sm:$0xf0]  ;;  %v5359_v37 = vld [vmem:[#allocation5 + $0x30c] sm:$0xf] }
  0xba   :  { %2722 = vmatpush.bf16.msra.mxu2 %v4529_v25  ;;  %v5232_v42 = vld [vmem:[#allocation5 + $0xc08] sm:$0xf]  ;;  %2696 = vmatpush.bf16.msra.mxu3 %v4017_v26  ;;  %v4945_v55 = vor.u32 %v5579_v41, %v4944_v38  ;;  %v4114_v25 = vld [vmem:[#allocation5 + $0x368] sm:$0xf0] }
  0xbb   :  { %v5651_v43 = vld [vmem:[#allocation5 + $0xc24] sm:$0xf0]  ;;  %2711 = vmatpush.bf16.msrb.mxu0 %v4209_v50  ;;  %v4117_v32 = vor.u32 %v5367_v24, %v4114_v25  ;;  %v4082_v38 = vld [vmem:[#allocation5 + $0x328] sm:$0xf0] }
  0xbc   :  { %v3952_v45 = vld [vmem:[#allocation5 + $0x208] sm:$0xf]  ;;  %v5233_v56 = vor.u32 %v5651_v43, %v5232_v42  ;;  %2685 = vmatpush.bf16.msrb.mxu1 %v3697_v49  ;;  %v3829_v43 = vor.u32 %v5295_v35, %v3826_v36  ;;  %v5287_v49 = vld [vmem:[#allocation5 + $0xcc] sm:$0xf] }
  0xbd   :  { %v4464_v46 = vld [vmem:[#allocation5 + $0x608] sm:$0xf]  ;;  %v3794_v50 = vld [vmem:[#allocation5 + $0xe8] sm:$0xf0] }
  0xbe   :  { %v5459_v47 = vld [vmem:[#allocation5 + $0x624] sm:$0xf0]  ;;  %2723 = vmatpush.bf16.msra.mxu2 %v4497_v40  ;;  %2697 = vmatpush.bf16.msra.mxu3 %v3985_v44  ;;  %v3797_v58 = vor.u32 %v5287_v49, %v3794_v50  ;;  %v5271_v13 = vld [vmem:[#allocation5 + $0x4c] sm:$0xf] }
  0xbf   :  { %v5331_v51 = vld [vmem:[#allocation5 + $0x224] sm:$0xf0]  ;;  %v4465_v62 = vor.u32 %v5459_v47, %v4464_v46  ;;  %2763 = vmatpush.bf16.msra.mxu0 %v5233_v56  ;;  %2686 = vmatmul.bf16.vlgmr.msrb.gmra.mxu1 %v6199_v57  ;;  %v4085_v46 = vor.u32 %v5359_v37, %v4082_v38  ;;  %v5575_v35 = vld [vmem:[#allocation5 + $0x9cc] sm:$0xf] }
  0xc0   :  { %v5200_v52 = vld [vmem:[#allocation5 + $0xbc8] sm:$0xf]  ;;  %v3953_v2 = vor.u32 %v5331_v51, %v3952_v45  ;;  %2730 = vmatpush.bf16.msra.mxu1 %v4945_v55  ;;  %2712 = vmatmul.bf16.vlgmr.msrb.gmra.mxu0 %v6197_v53  ;;  %v5351_v51 = vld [vmem:[#allocation5 + $0x2cc] sm:$0xf] }
  0xc1   :  { %v5643_v54 = vld [vmem:[#allocation5 + $0xbe4] sm:$0xf0]  ;;  %v4946_v36 = vld [vmem:[#allocation5 + $0x9e8] sm:$0xf0] }
  0xc2   :  { %v4912_v0 = vld [vmem:[#allocation5 + $0x988] sm:$0xf]  ;;  %v5201_v3 = vor.u32 %v5643_v54, %v5200_v52  ;;  %2724 = vmatpush.bf16.msra.mxu2 %v4465_v62  ;;  %2698 = vmatpush.bf16.msra.mxu3 %v3953_v2  ;;  %v4050_v52 = vld [vmem:[#allocation5 + $0x2e8] sm:$0xf0] }
  0xc3   :  { %v5571_v1 = vld [vmem:[#allocation5 + $0x9a4] sm:$0xf0]  ;;  %2782 = vmatpush.bf16.msrb.mxu0 %v4181_v7  ;;  %v4053_v62 = vor.u32 %v5351_v51, %v4050_v52  ;;  %v5343_v2 = vld [vmem:[#allocation5 + $0x28c] sm:$0xf] }
  0xc4   :  { %v5168_v5 = vld [vmem:[#allocation5 + $0xb88] sm:$0xf]  ;;  %v4913_v8 = vor.u32 %v5571_v1, %v4912_v0  ;;  %v5279_v0 = vld [vmem:[#allocation5 + $0x8c] sm:$0xf] }
  0xc5   :  { %v5635_v6 = vld [vmem:[#allocation5 + $0xba4] sm:$0xf0]  ;;  %2699 = vmatmul.bf16.vlgmr.msra.gmra.mxu3 %v6205_v9  ;;  %2725 = vmatmul.bf16.vlgmr.msra.gmra.mxu2 %v6201_v60  ;;  %v3762_v1 = vld [vmem:[#allocation5 + $0xa8] sm:$0xf0] }
  0xc6   :  { %v4880_v14 = vld [vmem:[#allocation5 + $0x948] sm:$0xf]  ;;  %2743 = vmatpush.bf16.msrb.mxu3 %v5201_v3  ;;  %2769 = vmatpush.bf16.msrb.mxu2 %v3925_v4  ;;  %v5169_v16 = vor.u32 %v5635_v6, %v5168_v5  ;;  %v4018_v3 = vld [vmem:[#allocation5 + $0x2a8] sm:$0xf0]  ;;  %v3765_v7 = vor.u32 %v5279_v0, %v3762_v1 }
  0xc7   :  { %v5563_v15 = vld [vmem:[#allocation5 + $0x964] sm:$0xf0]  ;;  %2731 = vmatpush.bf16.msra.mxu1 %v4913_v8  ;;  %2783 = vmatpush.bf16.msrb.mxu0 %v4149_v20  ;;  %v4021_v11 = vor.u32 %v5343_v2, %v4018_v3  ;;  %v4434_v20 = vld [vmem:[#allocation5 + $0x5e8] sm:$0xf0] }
  0xc8   :  { %v5136_v18 = vld [vmem:[#allocation5 + $0xb48] sm:$0xf]  ;;  %v4881_v21 = vor.u32 %v5563_v15, %v4880_v14  ;;  %v3730_v14 = vld [vmem:[#allocation5 + $0x68] sm:$0xf0] }
  0xc9   :  { %v5627_v19 = vld [vmem:[#allocation5 + $0xb64] sm:$0xf0]  ;;  %v5335_v15 = vld [vmem:[#allocation5 + $0x24c] sm:$0xf]  ;;  %v3733_v22 = vor.u32 %v5271_v13, %v3730_v14 }
  0xca   :  { %v4848_v26 = vld [vmem:[#allocation5 + $0x908] sm:$0xf]  ;;  %2744 = vmatpush.bf16.msrb.mxu3 %v5169_v16  ;;  %2770 = vmatpush.bf16.msrb.mxu2 %v3893_v17  ;;  %v5137_v28 = vor.u32 %v5627_v19, %v5136_v18  ;;  %v3986_v16 = vld [vmem:[#allocation5 + $0x268] sm:$0xf0] }
  0xcb   :  { %v5555_v27 = vld [vmem:[#allocation5 + $0x924] sm:$0xf0]  ;;  %2732 = vmatpush.bf16.msra.mxu1 %v4881_v21  ;;  %2784 = vmatpush.bf16.msrb.mxu0 %v4117_v32  ;;  %v5447_v19 = vld [vmem:[#allocation5 + $0x5cc] sm:$0xf]  ;;  %v3989_v25 = vor.u32 %v5335_v15, %v3986_v16 }
  0xcc   :  { %v5104_v30 = vld [vmem:[#allocation5 + $0xb08] sm:$0xf]  ;;  %v4849_v33 = vor.u32 %v5555_v27, %v4848_v26  ;;  %v5263_v27 = vld [vmem:[#allocation5 + $0xc] sm:$0xf] }
  0xcd   :  { %v5619_v31 = vld [vmem:[#allocation5 + $0xb24] sm:$0xf0]  ;;  %v5511_v32 = vld [vmem:[#allocation5 + $0x7cc] sm:$0xf] }
  0xce   :  { %v4816_v40 = vld [vmem:[#allocation5 + $0x8c8] sm:$0xf]  ;;  %2745 = vmatpush.bf16.msrb.mxu3 %v5137_v28  ;;  %2771 = vmatpush.bf16.msrb.mxu2 %v3861_v29  ;;  %v5105_v42 = vor.u32 %v5619_v31, %v5104_v30  ;;  %v3698_v28 = vld [vmem:[#allocation5 + $0x28] sm:$0xf0]  ;;  %v4437_v30 = vor.u32 %v5447_v19, %v4434_v20 }
  0xcf   :  { %v5547_v41 = vld [vmem:[#allocation5 + $0x8e4] sm:$0xf0]  ;;  %2733 = vmatpush.bf16.msra.mxu1 %v4849_v33  ;;  %2785 = vmatpush.bf16.msrb.mxu0 %v4085_v46  ;;  %v5327_v29 = vld [vmem:[#allocation5 + $0x20c] sm:$0xf]  ;;  %v4949_v46 = vor.u32 %v5575_v35, %v4946_v36 }
  0xd0   :  { %v5072_v44 = vld [vmem:[#allocation5 + $0xac8] sm:$0xf]  ;;  %v4817_v47 = vor.u32 %v5547_v41, %v4816_v40  ;;  %5256 = vmatmul.msk.bf16.vlgmr.msra.gmra.mxu0 %vm2492_vm0, %v6209_v48  ;;  %v3954_v31 = vld [vmem:[#allocation5 + $0x228] sm:$0xf0] }
  0xd1   :  { %v5611_v45 = vld [vmem:[#allocation5 + $0xae4] sm:$0xf0]  ;;  %v4690_v33 = vld [vmem:[#allocation5 + $0x7e8] sm:$0xf0] }
  0xd2   :  { %v4784_v54 = vld [vmem:[#allocation5 + $0x888] sm:$0xf]  ;;  %2746 = vmatpush.bf16.msrb.mxu3 %v5105_v42  ;;  %2772 = vmatpush.bf16.msrb.mxu2 %v3829_v43  ;;  %v5073_v56 = vor.u32 %v5611_v45, %v5072_v44  ;;  %v5639_v37 = vld [vmem:[#allocation5 + $0xbcc] sm:$0xf]  ;;  %v3701_v43 = vor.u32 %v5263_v27, %v3698_v28  ;;  %v3957_v44 = vor.u32 %v5327_v29, %v3954_v31 }
  0xd3   :  { %v5539_v55 = vld [vmem:[#allocation5 + $0x8a4] sm:$0xf0]  ;;  %2734 = vmatpush.bf16.msra.mxu1 %v4817_v47  ;;  %2786 = vmatpush.bf16.msrb.mxu0 %v4053_v62  ;;  %v5202_v40 = vld [vmem:[#allocation5 + $0xbe8] sm:$0xf0]  ;;  %v4693_v45 = vor.u32 %v5511_v32, %v4690_v33 }
  0xd4   :  { %v5040_v59 = vld [vmem:[#allocation5 + $0xa88] sm:$0xf]  ;;  %v4785_v63 = vor.u32 %v5539_v55, %v4784_v54  ;;  %v5439_v41 = vld [vmem:[#allocation5 + $0x58c] sm:$0xf]  ;;  %v5205_v50 = vor.u32 %v5639_v37, %v5202_v40 }
  0xd5   :  { %v5603_v61 = vld [vmem:[#allocation5 + $0xaa4] sm:$0xf0]  ;;  %v4402_v42 = vld [vmem:[#allocation5 + $0x5a8] sm:$0xf0]  ;;  %v2518_v32 = vpop.f32.mrf.mxu1 }
  0xd6   :  { %v4752_v4 = vld [vmem:[#allocation5 + $0x848] sm:$0xf]  ;;  %2747 = vmatpush.bf16.msrb.mxu3 %v5073_v56  ;;  %2773 = vmatpush.bf16.msrb.mxu2 %v3797_v58  ;;  %v5041_v6 = vor.u32 %v5603_v61, %v5040_v59  ;;  %v5503_v47 = vld [vmem:[#allocation5 + $0x78c] sm:$0xf]  ;;  %v4405_v51 = vor.u32 %v5439_v41, %v4402_v42  ;;  %v6234_v61 = vld [vmem:[#allocation7] sm:$0xff] }
  0xd7   :  { %v5531_v5 = vld [vmem:[#allocation5 + $0x864] sm:$0xf0]  ;;  %2735 = vmatpush.bf16.msra.mxu1 %v4785_v63  ;;  %2787 = vmatpush.bf16.msrb.mxu0 %v4021_v11  ;;  %v4658_v49 = vld [vmem:[#allocation5 + $0x7a8] sm:$0xf0]  ;;  %v492_v11 = vperm.slane %v6234_v61, 0 }
  0xd8   :  { %v5008_v8 = vld [vmem:[#allocation5 + $0xa48] sm:$0xf]  ;;  %v4753_v12 = vor.u32 %v5531_v5, %v4752_v4  ;;  %v5567_v52 = vld [vmem:[#allocation5 + $0x98c] sm:$0xf]  ;;  %v4661_v62 = vor.u32 %v5503_v47, %v4658_v49 }
  0xd9   :  { %v5595_v10 = vld [vmem:[#allocation5 + $0xa64] sm:$0xf0]  ;;  %v4914_v54 = vld [vmem:[#allocation5 + $0x9a8] sm:$0xf0] }
  0xda   :  { %v4720_v17 = vld [vmem:[#allocation5 + $0x808] sm:$0xf]  ;;  %2748 = vmatpush.bf16.msrb.mxu3 %v5041_v6  ;;  %2774 = vmatpush.bf16.msrb.mxu2 %v3765_v7  ;;  %v5009_v21 = vor.u32 %v5595_v10, %v5008_v8  ;;  %v5631_v55 = vld [vmem:[#allocation5 + $0xb8c] sm:$0xf]  ;;  %v4917_v63 = vor.u32 %v5567_v52, %v4914_v54 }
  0xdb   :  { %v5523_v18 = vld [vmem:[#allocation5 + $0x824] sm:$0xf0]  ;;  %2736 = vmatpush.bf16.msra.mxu1 %v4753_v12  ;;  %2788 = vmatpush.bf16.msrb.mxu0 %v3989_v25  ;;  %v5170_v56 = vld [vmem:[#allocation5 + $0xba8] sm:$0xf0] }
  0xdc   :  { %v4976_v23 = vld [vmem:[#allocation5 + $0xa08] sm:$0xf]  ;;  %v4721_v26 = vor.u32 %v5523_v18, %v4720_v17  ;;  %v5431_v58 = vld [vmem:[#allocation5 + $0x54c] sm:$0xf]  ;;  %v5173_v3 = vor.u32 %v5631_v55, %v5170_v56 }
  0xdd   :  { %v5587_v24 = vld [vmem:[#allocation5 + $0xa24] sm:$0xf0]  ;;  %v4370_v59 = vld [vmem:[#allocation5 + $0x568] sm:$0xf0]  ;;  %v2531_v42 = vpop.f32.mrf.mxu2 }
  0xde   :  { %2749 = vmatpush.bf16.msrb.mxu3 %v5009_v21  ;;  %2775 = vmatpush.bf16.msrb.mxu2 %v3733_v22  ;;  %v4977_v38 = vor.u32 %v5587_v24, %v4976_v23  ;;  %v5495_v0 = vld [vmem:[#allocation5 + $0x74c] sm:$0xf]  ;;  %v4373_v4 = vor.u32 %v5431_v58, %v4370_v59  ;;  %v2505_v21 = vpop.f32.mrf.mxu0 }
  0xdf   :  { %2737 = vmatpush.bf16.msra.mxu1 %v4721_v26  ;;  %2789 = vmatpush.bf16.msrb.mxu0 %v3957_v44  ;;  %v4626_v1 = vld [vmem:[#allocation5 + $0x768] sm:$0xf0]  ;;  %v2506_v25 = vadd.f32 %v2505_v21, %v492_v11 }
  0xe0   :  { %v5559_v2 = vld [vmem:[#allocation5 + $0x94c] sm:$0xf]  ;;  %v4629_v12 = vor.u32 %v5495_v0, %v4626_v1 }
  0xe1   :  { %v4882_v5 = vld [vmem:[#allocation5 + $0x968] sm:$0xf0]  ;;  %v2519_v37 = vadd.f32 %v2518_v32, %v2506_v25  ;;  %v5388_v32 = vld [vmem:[#allocation5 + $0x3ec] sm:$0xf0] }
  0xe2   :  { %2738 = vmatmul.bf16.vlgmr.msra.gmra.mxu1 %v6213_v34  ;;  %2750 = vmatpush.bf16.msrb.mxu3 %v4977_v38  ;;  %v5623_v6 = vld [vmem:[#allocation5 + $0xb4c] sm:$0xf]  ;;  %v4885_v13 = vor.u32 %v5559_v2, %v4882_v5 }
  0xe3   :  { %2795 = vmatpush.bf16.msrb.mxu1 %v4437_v30  ;;  %2776 = vmatpush.bf16.msrb.mxu2 %v3701_v43  ;;  %v5138_v7 = vld [vmem:[#allocation5 + $0xb68] sm:$0xf0] }
  0xe4   :  { %2834 = vmatpush.bf16.msra.mxu0 %v5205_v50  ;;  %v5423_v8 = vld [vmem:[#allocation5 + $0x50c] sm:$0xf]  ;;  %v5141_v16 = vor.u32 %v5623_v6, %v5138_v7 }
  0xe5   :  { %2751 = vmatmul.bf16.vlgmr.msrb.gmra.mxu3 %v6215_v39  ;;  %v4338_v10 = vld [vmem:[#allocation5 + $0x528] sm:$0xf0]  ;;  %2790 = vmatmul.bf16.vlgmr.msrb.gmra.mxu0 %v6205_v9 }
  0xe6   :  { %2808 = vmatpush.bf16.msra.mxu3 %v4693_v45  ;;  %2777 = vmatmul.bf16.vlgmr.msrb.gmra.mxu2 %v6199_v57  ;;  %v5487_v14 = vld [vmem:[#allocation5 + $0x70c] sm:$0xf]  ;;  %v4341_v17 = vor.u32 %v5423_v8, %v4338_v10  ;;  %v2532_v45 = vadd.f32 %v2531_v42, %v2519_v37  ;;  %v2507_v56 = vpop.f32.mrf.mxu0  ;;  %v2520_v10 = vpop.f32.mrf.mxu1  ;;  %v4696_v37 = vld [vmem:[#allocation5 + $0x7d0] sm:$0xf] }
  0xe7   :  { %2821 = vmatpush.bf16.msra.mxu2 %v4949_v46  ;;  %2796 = vmatpush.bf16.msrb.mxu1 %v4405_v51  ;;  %v4594_v15 = vld [vmem:[#allocation5 + $0x728] sm:$0xf0]  ;;  %v2544_v46 = vpop.f32.mrf.mxu3  ;;  %v5508_v56 = vld [vmem:[#allocation5 + $0x7ac] sm:$0xf0] }
  0xe8   :  { %2835 = vmatpush.bf16.msra.mxu0 %v5173_v3  ;;  %v5551_v18 = vld [vmem:[#allocation5 + $0x90c] sm:$0xf]  ;;  %v4597_v26 = vor.u32 %v5487_v14, %v4594_v15  ;;  %v6240_v58 = vadd.f32 %v2544_v46, %v2532_v45  ;;  %v2533_v14 = vpop.f32.mrf.mxu2  ;;  %v5316_v45 = vld [vmem:[#allocation5 + $0x1ac] sm:$0xf0] }
  0xe9   :  { %v4850_v19 = vld [vmem:[#allocation5 + $0x928] sm:$0xf0]  ;;  %v5300_v14 = vld [vmem:[#allocation5 + $0x12c] sm:$0xf0] }
  0xea   :  { %2809 = vmatpush.bf16.msra.mxu3 %v4661_v62  ;;  %v5615_v20 = vld [vmem:[#allocation5 + $0xb0c] sm:$0xf]  ;;  %v4853_v27 = vor.u32 %v5551_v18, %v4850_v19 }
  0xeb   :  { %2822 = vmatpush.bf16.msra.mxu2 %v4917_v63  ;;  %2797 = vmatpush.bf16.msrb.mxu1 %v4373_v4  ;;  %v5106_v22 = vld [vmem:[#allocation5 + $0xb28] sm:$0xf0] }
  0xec   :  { %v5415_v23 = vld [vmem:[#allocation5 + $0x4cc] sm:$0xf]  ;;  %2836 = vmatpush.bf16.msra.mxu0 %v5141_v16  ;;  %v5109_v30 = vor.u32 %v5615_v20, %v5106_v22 }
  0xed   :  { %v4306_v24 = vld [vmem:[#allocation5 + $0x4e8] sm:$0xf0] }
  0xee   :  { %2810 = vmatpush.bf16.msra.mxu3 %v4629_v12  ;;  %v5479_v28 = vld [vmem:[#allocation5 + $0x6cc] sm:$0xf]  ;;  %v4309_v31 = vor.u32 %v5415_v23, %v4306_v24 }
  0xef   :  { %2823 = vmatpush.bf16.msra.mxu2 %v4885_v13  ;;  %v4562_v29 = vld [vmem:[#allocation5 + $0x6e8] sm:$0xf0]  ;;  %2798 = vmatpush.bf16.msrb.mxu1 %v4341_v17  ;;  %v2546_v21 = vpop.f32.mrf.mxu3 }
  0xf0   :  { %v5543_v33 = vld [vmem:[#allocation5 + $0x8cc] sm:$0xf]  ;;  %v4565_v43 = vor.u32 %v5479_v28, %v4562_v29  ;;  %2837 = vmatpush.bf16.msra.mxu0 %v5109_v30  ;;  %v3928_v29 = vld [vmem:[#allocation5 + $0x1d0] sm:$0xf] }
  0xf1   :  { %v4818_v35 = vld [vmem:[#allocation5 + $0x8e8] sm:$0xf0]  ;;  %v5324_v30 = vld [vmem:[#allocation5 + $0x1ec] sm:$0xf0] }
  0xf2   :  { %v5607_v36 = vld [vmem:[#allocation5 + $0xacc] sm:$0xf]  ;;  %2811 = vmatpush.bf16.msra.mxu3 %v4597_v26  ;;  %v4821_v44 = vor.u32 %v5543_v33, %v4818_v35  ;;  %v4440_v33 = vld [vmem:[#allocation5 + $0x5d0] sm:$0xf]  ;;  %v3929_v42 = vor.u32 %v5324_v30, %v3928_v29 }
  0xf3   :  { %v5074_v38 = vld [vmem:[#allocation5 + $0xae8] sm:$0xf0]  ;;  %2824 = vmatpush.bf16.msra.mxu2 %v4853_v27  ;;  %2799 = vmatpush.bf16.msrb.mxu1 %v4309_v31  ;;  %v4184_v31 = vld [vmem:[#allocation5 + $0x3d0] sm:$0xf] }
  0xf4   :  { %v5407_v40 = vld [vmem:[#allocation5 + $0x48c] sm:$0xf]  ;;  %v5077_v50 = vor.u32 %v5607_v36, %v5074_v38  ;;  %v5452_v36 = vld [vmem:[#allocation5 + $0x5ec] sm:$0xf0] }
  0xf5   :  { %v4274_v41 = vld [vmem:[#allocation5 + $0x4a8] sm:$0xf0]  ;;  %v5516_v38 = vld [vmem:[#allocation5 + $0x7ec] sm:$0xf0]  ;;  %v4441_v46 = vor.u32 %v5452_v36, %v4440_v33 }
  0xf6   :  { %v5471_v47 = vld [vmem:[#allocation5 + $0x68c] sm:$0xf]  ;;  %v4277_v51 = vor.u32 %v5407_v40, %v4274_v41  ;;  %2812 = vmatpush.bf16.msra.mxu3 %v4565_v43  ;;  %2838 = vmatpush.bf16.msra.mxu0 %v5077_v50  ;;  %v4185_v43 = vor.u32 %v5388_v32, %v4184_v31  ;;  %v5380_v50 = vld [vmem:[#allocation5 + $0x3ac] sm:$0xf0] }
  0xf7   :  { %v4530_v49 = vld [vmem:[#allocation5 + $0x6a8] sm:$0xf0]  ;;  %2825 = vmatpush.bf16.msra.mxu2 %v4821_v44  ;;  %v3896_v44 = vld [vmem:[#allocation5 + $0x190] sm:$0xf] }
  0xf8   :  { %v5535_v52 = vld [vmem:[#allocation5 + $0x88c] sm:$0xf]  ;;  %v4533_v0 = vor.u32 %v5471_v47, %v4530_v49  ;;  %2800 = vmatpush.bf16.msrb.mxu1 %v4277_v51  ;;  %v4697_v47 = vor.u32 %v5516_v38, %v4696_v37  ;;  %v4152_v49 = vld [vmem:[#allocation5 + $0x390] sm:$0xf] }
  0xf9   :  { %v4786_v54 = vld [vmem:[#allocation5 + $0x8a8] sm:$0xf0]  ;;  %v4408_v51 = vld [vmem:[#allocation5 + $0x590] sm:$0xf]  ;;  %v2557_v10 = vpop.f32.mrf.mxu0 }
  0xfa   :  { %v5599_v55 = vld [vmem:[#allocation5 + $0xa8c] sm:$0xf]  ;;  %v4789_v1 = vor.u32 %v5535_v52, %v4786_v54  ;;  %2813 = vmatpush.bf16.msra.mxu3 %v4533_v0  ;;  %v2583_v52 = vpop.f32.mrf.mxu2  ;;  %v5444_v54 = vld [vmem:[#allocation5 + $0x5ac] sm:$0xf0] }
  0xfb   :  { %v5042_v59 = vld [vmem:[#allocation5 + $0xaa8] sm:$0xf0]  ;;  %v5308_v0 = vld [vmem:[#allocation5 + $0x16c] sm:$0xf0] }
  0xfc   :  { %v5399_v62 = vld [vmem:[#allocation5 + $0x44c] sm:$0xf]  ;;  %v5045_v4 = vor.u32 %v5599_v55, %v5042_v59  ;;  %2826 = vmatpush.bf16.msra.mxu2 %v4789_v1  ;;  %v4664_v55 = vld [vmem:[#allocation5 + $0x790] sm:$0xf]  ;;  %v3897_v59 = vor.u32 %v5316_v45, %v3896_v44  ;;  %v4409_v1 = vor.u32 %v5444_v54, %v4408_v51 }
  0xfd   :  { %v4242_v63 = vld [vmem:[#allocation5 + $0x468] sm:$0xf0]  ;;  %v4344_v21 = vld [vmem:[#allocation5 + $0x510] sm:$0xf] }
  0xfe   :  { %v5463_v2 = vld [vmem:[#allocation5 + $0x64c] sm:$0xf]  ;;  %v4245_v5 = vor.u32 %v5399_v62, %v4242_v63  ;;  %2839 = vmatpush.bf16.msra.mxu0 %v5045_v4  ;;  %v4153_v62 = vor.u32 %v5380_v50, %v4152_v49  ;;  %v3864_v63 = vld [vmem:[#allocation5 + $0x150] sm:$0xf] }
  0xff   :  { %v4498_v3 = vld [vmem:[#allocation5 + $0x668] sm:$0xf0]  ;;  %v5372_v4 = vld [vmem:[#allocation5 + $0x36c] sm:$0xf0]  ;;  %v6249_v45 = vpop.f32.mrf.mxu3 }
 0x100   :  { %v5527_v6 = vld [vmem:[#allocation5 + $0x84c] sm:$0xf]  ;;  %v4501_v17 = vor.u32 %v5463_v2, %v4498_v3  ;;  %2801 = vmatpush.bf16.msrb.mxu1 %v4245_v5  ;;  %v4665_v2 = vor.u32 %v5508_v56, %v4664_v55  ;;  %v4120_v3 = vld [vmem:[#allocation5 + $0x350] sm:$0xf] }
 0x101   :  { %v4754_v7 = vld [vmem:[#allocation5 + $0x868] sm:$0xf0]  ;;  %v4376_v5 = vld [vmem:[#allocation5 + $0x550] sm:$0xf] }
 0x102   :  { %v5591_v8 = vld [vmem:[#allocation5 + $0xa4c] sm:$0xf]  ;;  %v4757_v18 = vor.u32 %v5527_v6, %v4754_v7  ;;  %2814 = vmatpush.bf16.msra.mxu3 %v4501_v17  ;;  %v5436_v6 = vld [vmem:[#allocation5 + $0x56c] sm:$0xf0] }
 0x103   :  { %v5010_v11 = vld [vmem:[#allocation5 + $0xa68] sm:$0xf0]  ;;  %v4632_v7 = vld [vmem:[#allocation5 + $0x750] sm:$0xf] }
 0x104   :  { %v5391_v12 = vld [vmem:[#allocation5 + $0x40c] sm:$0xf]  ;;  %v5013_v22 = vor.u32 %v5591_v8, %v5010_v11  ;;  %2827 = vmatpush.bf16.msra.mxu2 %v4757_v18  ;;  %v5500_v8 = vld [vmem:[#allocation5 + $0x76c] sm:$0xf0]  ;;  %v3865_v11 = vor.u32 %v5308_v0, %v3864_v63  ;;  %v2570_v18 = vpop.f32.mrf.mxu1 }
 0x105   :  { %v4210_v13 = vld [vmem:[#allocation5 + $0x428] sm:$0xf0]  ;;  %v4633_v17 = vor.u32 %v5500_v8, %v4632_v7  ;;  %v3800_v29 = vld [vmem:[#allocation5 + $0xd0] sm:$0xf] }
 0x106   :  { %v5647_v15 = vld [vmem:[#allocation5 + $0xc0c] sm:$0xf]  ;;  %v4213_v23 = vor.u32 %v5391_v12, %v4210_v13  ;;  %2840 = vmatpush.bf16.msra.mxu0 %v5013_v22  ;;  %v4121_v12 = vor.u32 %v5372_v4, %v4120_v3  ;;  %v3832_v13 = vld [vmem:[#allocation5 + $0x110] sm:$0xf]  ;;  %v2585_v22 = vpop.f32.mrf.mxu2 }
 0x107   :  { %v5234_v16 = vld [vmem:[#allocation5 + $0xc28] sm:$0xf0]  ;;  %v5292_v30 = vld [vmem:[#allocation5 + $0xec] sm:$0xf0] }
 0x108   :  { %v5455_v19 = vld [vmem:[#allocation5 + $0x60c] sm:$0xf]  ;;  %v5237_v28 = vor.u32 %v5647_v15, %v5234_v16  ;;  %2802 = vmatpush.bf16.msrb.mxu1 %v4213_v23  ;;  %v2558_v15 = vadd.f32 %v2557_v10, %v6240_v58  ;;  %v4377_v16 = vor.u32 %v5436_v6, %v4376_v5  ;;  %v5428_v23 = vld [vmem:[#allocation5 + $0x52c] sm:$0xf0] }
 0x109   :  { %v4466_v20 = vld [vmem:[#allocation5 + $0x628] sm:$0xf0]  ;;  %v4345_v31 = vor.u32 %v5428_v23, %v4344_v21  ;;  %v4056_v33 = vld [vmem:[#allocation5 + $0x2d0] sm:$0xf] }
 0x10a   :  { %v5519_v24 = vld [vmem:[#allocation5 + $0x80c] sm:$0xf]  ;;  %v4469_v35 = vor.u32 %v5455_v19, %v4466_v20  ;;  %v4088_v19 = vld [vmem:[#allocation5 + $0x310] sm:$0xf] }
 0x10b   :  { %v4722_v25 = vld [vmem:[#allocation5 + $0x828] sm:$0xf0]  ;;  %2803 = vmatmul.bf16.vlgmr.msrb.gmra.mxu1 %v6197_v53  ;;  %v5364_v20 = vld [vmem:[#allocation5 + $0x32c] sm:$0xf0] }
 0x10c   :  { %v5583_v26 = vld [vmem:[#allocation5 + $0xa0c] sm:$0xf]  ;;  %v4725_v40 = vor.u32 %v5519_v24, %v4722_v25  ;;  %2854 = vmatpush.bf16.msra.mxu1 %v5237_v28  ;;  %2815 = vmatpush.bf16.msra.mxu3 %v4469_v35  ;;  %v4600_v24 = vld [vmem:[#allocation5 + $0x710] sm:$0xf]  ;;  %v4089_v28 = vor.u32 %v5364_v20, %v4088_v19  ;;  %v2572_v54 = vpop.f32.mrf.mxu1 }
 0x10d   :  { %v4978_v27 = vld [vmem:[#allocation5 + $0xa28] sm:$0xf0]  ;;  %v5492_v25 = vld [vmem:[#allocation5 + $0x72c] sm:$0xf0]  ;;  %v3898_v54 = vld [vmem:[#allocation5 + $0x1b0] sm:$0xf0] }
 0x10e   :  { %v4981_v41 = vor.u32 %v5583_v26, %v4978_v27  ;;  %2828 = vmatpush.bf16.msra.mxu2 %v4725_v40  ;;  %v2571_v26 = vadd.f32 %v2570_v18, %v2558_v15  ;;  %v3833_v27 = vor.u32 %v5300_v14, %v3832_v13  ;;  %v4601_v32 = vor.u32 %v5492_v25, %v4600_v24  ;;  %v5356_v35 = vld [vmem:[#allocation5 + $0x2ec] sm:$0xf0] }
 0x10f   :  { %2816 = vmatmul.bf16.vlgmr.msra.gmra.mxu3 %v6201_v60  ;;  %v4312_v36 = vld [vmem:[#allocation5 + $0x4d0] sm:$0xf] }
 0x110   :  { %2841 = vmatpush.bf16.msra.mxu0 %v4981_v41  ;;  %2860 = vmatpush.bf16.msrb.mxu3 %v3929_v42  ;;  %v6247_v58 = vadd.f32 %v2583_v52, %v2571_v26  ;;  %v5420_v37 = vld [vmem:[#allocation5 + $0x4ec] sm:$0xf0]  ;;  %v3801_v41 = vor.u32 %v5292_v30, %v3800_v29  ;;  %v4057_v42 = vor.u32 %v5356_v35, %v4056_v33  ;;  %v3930_v33 = vld [vmem:[#allocation5 + $0x1f0] sm:$0xf0]  ;;  %v493_v35 = vperm.slane %v6234_v61, 1 }
 0x111   :  { %2873 = vmatpush.bf16.msrb.mxu1 %v4185_v43  ;;  %2829 = vmatmul.bf16.vlgmr.msra.gmra.mxu2 %v6213_v34  ;;  %v4568_v38 = vld [vmem:[#allocation5 + $0x6d0] sm:$0xf] }
 0x112   :  { %2886 = vmatpush.bf16.msrb.mxu2 %v4441_v46  ;;  %v5484_v40 = vld [vmem:[#allocation5 + $0x6ec] sm:$0xf0]  ;;  %v2559_v46 = vpop.f32.mrf.mxu0 }
 0x113   :  { %2842 = vmatmul.bf16.vlgmr.msra.gmra.mxu0 %v6215_v39  ;;  %v3768_v43 = vld [vmem:[#allocation5 + $0x90] sm:$0xf]  ;;  %v4569_v49 = vor.u32 %v5484_v40, %v4568_v38 }
 0x114   :  { %2899 = vmatpush.bf16.msrb.mxu0 %v4697_v47  ;;  %2861 = vmatpush.bf16.msrb.mxu3 %v3897_v59  ;;  %v5284_v44 = vld [vmem:[#allocation5 + $0xac] sm:$0xf0]  ;;  %v4313_v47 = vor.u32 %v5420_v37, %v4312_v36 }
 0x115   :  { %2874 = vmatpush.bf16.msrb.mxu1 %v4153_v62  ;;  %v4024_v50 = vld [vmem:[#allocation5 + $0x290] sm:$0xf]  ;;  %v6253_v62 = vpop.f32.mrf.mxu2  ;;  %v3769_v63 = vor.u32 %v5284_v44, %v3768_v43  ;;  %v5384_v43 = vld [vmem:[#allocation5 + $0x3d4] sm:$0xf] }
 0x116   :  { %2887 = vmatpush.bf16.msrb.mxu2 %v4409_v1  ;;  %v5348_v51 = vld [vmem:[#allocation5 + $0x2ac] sm:$0xf0]  ;;  %v4186_v44 = vld [vmem:[#allocation5 + $0x3f0] sm:$0xf0] }
 0x117   :  { %v4280_v52 = vld [vmem:[#allocation5 + $0x490] sm:$0xf]  ;;  %v4025_v0 = vor.u32 %v5348_v51, %v4024_v50 }
 0x118   :  { %2900 = vmatpush.bf16.msrb.mxu0 %v4665_v2  ;;  %2862 = vmatpush.bf16.msrb.mxu3 %v3865_v11  ;;  %v5412_v55 = vld [vmem:[#allocation5 + $0x4ac] sm:$0xf0] }
 0x119   :  { %2875 = vmatpush.bf16.msrb.mxu1 %v4121_v12  ;;  %v4536_v56 = vld [vmem:[#allocation5 + $0x690] sm:$0xf]  ;;  %v4281_v3 = vor.u32 %v5412_v55, %v4280_v52  ;;  %v5312_v52 = vld [vmem:[#allocation5 + $0x194] sm:$0xf] }
 0x11a   :  { %2888 = vmatpush.bf16.msrb.mxu2 %v4377_v16  ;;  %v5476_v59 = vld [vmem:[#allocation5 + $0x6ac] sm:$0xf0] }
 0x11b   :  { %5257 = vmatmul.msk.bf16.vlgmr.msra.gmra.mxu1 %vm2492_vm0, %v6209_v48  ;;  %v3736_v1 = vld [vmem:[#allocation5 + $0x50] sm:$0xf]  ;;  %v4537_v4 = vor.u32 %v5476_v59, %v4536_v56  ;;  %v2597_v56 = vadd.f32 %v6249_v45, %v493_v35  ;;  %v4189_v59 = vor.u32 %v5384_v43, %v4186_v44  ;;  %v5352_v44 = vld [vmem:[#allocation5 + $0x2d4] sm:$0xf] }
 0x11c   :  { %2901 = vmatpush.bf16.msrb.mxu0 %v4633_v17  ;;  %2863 = vmatpush.bf16.msrb.mxu3 %v3833_v27  ;;  %v5276_v2 = vld [vmem:[#allocation5 + $0x6c] sm:$0xf0]  ;;  %v2598_v17 = vpop.f32.mrf.mxu3 }
 0x11d   :  { %2876 = vmatpush.bf16.msrb.mxu1 %v4089_v28  ;;  %v3992_v5 = vld [vmem:[#allocation5 + $0x250] sm:$0xf]  ;;  %v3737_v12 = vor.u32 %v5276_v2, %v3736_v1  ;;  %v2611_v26 = vpop.f32.mrf.mxu2  ;;  %v4154_v1 = vld [vmem:[#allocation5 + $0x3b0] sm:$0xf0]  ;;  %v2610_v45 = vadd.f32 %v6253_v62, %v2597_v56 }
 0x11e   :  { %2889 = vmatpush.bf16.msrb.mxu2 %v4345_v31  ;;  %v5340_v6 = vld [vmem:[#allocation5 + $0x26c] sm:$0xf0] }
 0x11f   :  { %v4248_v7 = vld [vmem:[#allocation5 + $0x450] sm:$0xf]  ;;  %v3993_v13 = vor.u32 %v5340_v6, %v3992_v5 }
 0x120   :  { %2902 = vmatpush.bf16.msrb.mxu0 %v4601_v32  ;;  %2864 = vmatpush.bf16.msrb.mxu3 %v3801_v41  ;;  %v5404_v8 = vld [vmem:[#allocation5 + $0x46c] sm:$0xf0]  ;;  %v5320_v32 = vld [vmem:[#allocation5 + $0x1d4] sm:$0xf] }
 0x121   :  { %2877 = vmatpush.bf16.msrb.mxu1 %v4057_v42  ;;  %v4504_v10 = vld [vmem:[#allocation5 + $0x650] sm:$0xf]  ;;  %v4249_v18 = vor.u32 %v5404_v8, %v4248_v7  ;;  %v3933_v46 = vor.u32 %v5320_v32, %v3930_v33  ;;  %v5304_v8 = vld [vmem:[#allocation5 + $0x154] sm:$0xf] }
 0x122   :  { %2890 = vmatpush.bf16.msrb.mxu2 %v4313_v47  ;;  %v5468_v11 = vld [vmem:[#allocation5 + $0x66c] sm:$0xf0] }
 0x123   :  { %v3704_v14 = vld [vmem:[#allocation5 + $0x10] sm:$0xf]  ;;  %v4505_v19 = vor.u32 %v5468_v11, %v4504_v10  ;;  %v3866_v10 = vld [vmem:[#allocation5 + $0x170] sm:$0xf0] }
 0x124   :  { %2903 = vmatpush.bf16.msrb.mxu0 %v4569_v49  ;;  %2865 = vmatpush.bf16.msrb.mxu3 %v3769_v63  ;;  %v5268_v15 = vld [vmem:[#allocation5 + $0x2c] sm:$0xf0]  ;;  %v3869_v17 = vor.u32 %v5304_v8, %v3866_v10 }
 0x125   :  { %2878 = vmatpush.bf16.msrb.mxu1 %v4025_v0  ;;  %v3960_v16 = vld [vmem:[#allocation5 + $0x210] sm:$0xf]  ;;  %v3705_v30 = vor.u32 %v5268_v15, %v3704_v14  ;;  %v5376_v0 = vld [vmem:[#allocation5 + $0x394] sm:$0xf] }
 0x126   :  { %2891 = vmatpush.bf16.msrb.mxu2 %v4281_v3  ;;  %v5332_v20 = vld [vmem:[#allocation5 + $0x22c] sm:$0xf0]  ;;  %v3901_v3 = vor.u32 %v5312_v52, %v3898_v54  ;;  %v4157_v11 = vor.u32 %v5376_v0, %v4154_v1  ;;  %v5368_v14 = vld [vmem:[#allocation5 + $0x354] sm:$0xf] }
 0x127   :  { %v4216_v21 = vld [vmem:[#allocation5 + $0x410] sm:$0xf]  ;;  %v3961_v31 = vor.u32 %v5332_v20, %v3960_v16  ;;  %v4122_v15 = vld [vmem:[#allocation5 + $0x370] sm:$0xf0] }
 0x128   :  { %2904 = vmatpush.bf16.msrb.mxu0 %v4537_v4  ;;  %v5396_v22 = vld [vmem:[#allocation5 + $0x42c] sm:$0xf0]  ;;  %2866 = vmatpush.bf16.msrb.mxu3 %v3737_v12  ;;  %v2622_v12 = vpop.f32.mrf.mxu0  ;;  %v4125_v62 = vor.u32 %v5368_v14, %v4122_v15 }
 0x129   :  { %v4472_v23 = vld [vmem:[#allocation5 + $0x610] sm:$0xf]  ;;  %2879 = vmatpush.bf16.msrb.mxu1 %v3993_v13  ;;  %v4217_v36 = vor.u32 %v5396_v22, %v4216_v21  ;;  %v2623_v21 = vadd.f32 %v2622_v12, %v2610_v45  ;;  %v2635_v22 = vpop.f32.mrf.mxu1  ;;  %v5272_v12 = vld [vmem:[#allocation5 + $0x54] sm:$0xf] }
 0x12a   :  { %v5460_v24 = vld [vmem:[#allocation5 + $0x62c] sm:$0xf0]  ;;  %2892 = vmatpush.bf16.msrb.mxu2 %v4249_v18 }
 0x12b   :  { %v4952_v25 = vld [vmem:[#allocation5 + $0x9d0] sm:$0xf]  ;;  %v4473_v37 = vor.u32 %v5460_v24, %v4472_v23  ;;  %v5296_v24 = vld [vmem:[#allocation5 + $0x114] sm:$0xf]  ;;  %v2636_v35 = vadd.f32 %v2635_v22, %v2623_v21 }
 0x12c   :  { %v5580_v27 = vld [vmem:[#allocation5 + $0x9ec] sm:$0xf0]  ;;  %2905 = vmatpush.bf16.msrb.mxu0 %v4505_v19  ;;  %2867 = vmatpush.bf16.msrb.mxu3 %v3705_v30 }
 0x12d   :  { %v5208_v28 = vld [vmem:[#allocation5 + $0xbd0] sm:$0xf]  ;;  %v4953_v40 = vor.u32 %v5580_v27, %v4952_v25  ;;  %2880 = vmatpush.bf16.msrb.mxu1 %v3961_v31  ;;  %v3834_v25 = vld [vmem:[#allocation5 + $0x130] sm:$0xf0] }
 0x12e   :  { %v5644_v29 = vld [vmem:[#allocation5 + $0xbec] sm:$0xf0]  ;;  %2893 = vmatpush.bf16.msrb.mxu2 %v4217_v36  ;;  %v5360_v27 = vld [vmem:[#allocation5 + $0x314] sm:$0xf]  ;;  %v3837_v30 = vor.u32 %v5296_v24, %v3834_v25 }
 0x12f   :  { %v5240_v38 = vld [vmem:[#allocation5 + $0xc10] sm:$0xf]  ;;  %v5209_v41 = vor.u32 %v5644_v29, %v5208_v28  ;;  %2868 = vmatmul.bf16.vlgmr.msrb.gmra.mxu3 %v6199_v57  ;;  %v4090_v28 = vld [vmem:[#allocation5 + $0x330] sm:$0xf0] }
 0x130   :  { %v5652_v42 = vld [vmem:[#allocation5 + $0xc2c] sm:$0xf0]  ;;  %2906 = vmatpush.bf16.msrb.mxu0 %v4473_v37  ;;  %2912 = vmatpush.bf16.msra.mxu3 %v4953_v40  ;;  %v5288_v37 = vld [vmem:[#allocation5 + $0xd4] sm:$0xf]  ;;  %v2648_v40 = vpop.f32.mrf.mxu3 }
 0x131   :  { %v4920_v47 = vld [vmem:[#allocation5 + $0x990] sm:$0xf]  ;;  %v5241_v55 = vor.u32 %v5652_v42, %v5240_v38  ;;  %2925 = vmatpush.bf16.msra.mxu1 %v5209_v41  ;;  %2894 = vmatmul.bf16.vlgmr.msrb.gmra.mxu2 %v6197_v53  ;;  %v3802_v38 = vld [vmem:[#allocation5 + $0xf0] sm:$0xf0]  ;;  %v2649_v41 = vadd.f32 %v2648_v40, %v2636_v35  ;;  %v4093_v42 = vor.u32 %v5360_v27, %v4090_v28  ;;  %v2637_v0 = vpop.f32.mrf.mxu1 }
 0x132   :  { %v5572_v49 = vld [vmem:[#allocation5 + $0x9ac] sm:$0xf0]  ;;  %2881 = vmatmul.bf16.vlgmr.msrb.gmra.mxu1 %v6205_v9  ;;  %v5264_v25 = vld [vmem:[#allocation5 + $0x14] sm:$0xf] }
 0x133   :  { %v5176_v50 = vld [vmem:[#allocation5 + $0xb90] sm:$0xf]  ;;  %v4921_v63 = vor.u32 %v5572_v49, %v4920_v47  ;;  %2945 = vmatpush.bf16.msra.mxu2 %v5241_v55  ;;  %2907 = vmatmul.bf16.vlgmr.msrb.gmra.mxu0 %v6201_v60  ;;  %v2624_v47 = vpop.f32.mrf.mxu0  ;;  %v2661_v55 = vpop.f32.mrf.mxu2  ;;  %v4442_v28 = vld [vmem:[#allocation5 + $0x5f0] sm:$0xf0] }
 0x134   :  { %v5636_v51 = vld [vmem:[#allocation5 + $0xbac] sm:$0xf0]  ;;  %2951 = vmatpush.bf16.msra.mxu0 %v3933_v46  ;;  %v4058_v46 = vld [vmem:[#allocation5 + $0x2f0] sm:$0xf0]  ;;  %v6262_v1 = vadd.f32 %v2661_v55, %v2649_v41 }
 0x135   :  { %v5177_v2 = vor.u32 %v5636_v51, %v5176_v50  ;;  %v4888_v4 = vld [vmem:[#allocation5 + $0x950] sm:$0xf]  ;;  %2913 = vmatpush.bf16.msra.mxu3 %v4921_v63  ;;  %v3805_v50 = vor.u32 %v5288_v37, %v3802_v38  ;;  %v3770_v63 = vld [vmem:[#allocation5 + $0xb0] sm:$0xf0] }
 0x136   :  { %v5564_v5 = vld [vmem:[#allocation5 + $0x96c] sm:$0xf0]  ;;  %v4954_v35 = vld [vmem:[#allocation5 + $0x9f0] sm:$0xf0] }
 0x137   :  { %v5144_v6 = vld [vmem:[#allocation5 + $0xb50] sm:$0xf]  ;;  %2964 = vmatpush.bf16.msrb.mxu2 %v4189_v59  ;;  %v4889_v13 = vor.u32 %v5564_v5, %v4888_v4  ;;  %2926 = vmatpush.bf16.msra.mxu1 %v5177_v2  ;;  %v5280_v59 = vld [vmem:[#allocation5 + $0x94] sm:$0xf]  ;;  %v4061_v2 = vor.u32 %v5352_v44, %v4058_v46 }
 0x138   :  { %v5628_v7 = vld [vmem:[#allocation5 + $0xb6c] sm:$0xf0]  ;;  %2952 = vmatpush.bf16.msra.mxu0 %v3901_v3  ;;  %v5344_v4 = vld [vmem:[#allocation5 + $0x294] sm:$0xf]  ;;  %v2650_v14 = vpop.f32.mrf.mxu3 }
 0x139   :  { %v5145_v16 = vor.u32 %v5628_v7, %v5144_v6  ;;  %v4856_v18 = vld [vmem:[#allocation5 + $0x910] sm:$0xf]  ;;  %2914 = vmatpush.bf16.msra.mxu3 %v4889_v13  ;;  %v4026_v5 = vld [vmem:[#allocation5 + $0x2b0] sm:$0xf0]  ;;  %v3773_v7 = vor.u32 %v5280_v59, %v3770_v63 }
 0x13a   :  { %v5556_v19 = vld [vmem:[#allocation5 + $0x92c] sm:$0xf0]  ;;  %v3738_v13 = vld [vmem:[#allocation5 + $0x70] sm:$0xf0]  ;;  %v4029_v15 = vor.u32 %v5344_v4, %v4026_v5 }
 0x13b   :  { %v5112_v20 = vld [vmem:[#allocation5 + $0xb10] sm:$0xf]  ;;  %2965 = vmatpush.bf16.msrb.mxu2 %v4157_v11  ;;  %v4857_v26 = vor.u32 %v5556_v19, %v4856_v18  ;;  %2927 = vmatpush.bf16.msra.mxu1 %v5145_v16  ;;  %v3994_v18 = vld [vmem:[#allocation5 + $0x270] sm:$0xf0]  ;;  %v3741_v21 = vor.u32 %v5272_v12, %v3738_v13  ;;  %v2663_v27 = vpop.f32.mrf.mxu2 }
 0x13c   :  { %v5620_v23 = vld [vmem:[#allocation5 + $0xb2c] sm:$0xf0]  ;;  %2953 = vmatpush.bf16.msra.mxu0 %v3869_v17  ;;  %v5336_v17 = vld [vmem:[#allocation5 + $0x254] sm:$0xf] }
 0x13d   :  { %v5113_v29 = vor.u32 %v5620_v23, %v5112_v20  ;;  %v4824_v31 = vld [vmem:[#allocation5 + $0x8d0] sm:$0xf]  ;;  %2915 = vmatpush.bf16.msra.mxu3 %v4857_v26  ;;  %v5448_v26 = vld [vmem:[#allocation5 + $0x5d4] sm:$0xf] }
 0x13e   :  { %v5548_v32 = vld [vmem:[#allocation5 + $0x8ec] sm:$0xf0]  ;;  %v5328_v38 = vld [vmem:[#allocation5 + $0x214] sm:$0xf]  ;;  %v4445_v41 = vor.u32 %v5448_v26, %v4442_v28  ;;  %v2687_v26 = vpop.f32.mrf.mxu1 }
 0x13f   :  { %v5080_v33 = vld [vmem:[#allocation5 + $0xad0] sm:$0xf]  ;;  %2966 = vmatpush.bf16.msrb.mxu2 %v4125_v62  ;;  %v4825_v43 = vor.u32 %v5548_v32, %v4824_v31  ;;  %2928 = vmatpush.bf16.msra.mxu1 %v5113_v29  ;;  %v3706_v62 = vld [vmem:[#allocation5 + $0x30] sm:$0xf0]  ;;  %v3997_v31 = vor.u32 %v5336_v17, %v3994_v18 }
 0x140   :  { %v5612_v36 = vld [vmem:[#allocation5 + $0xaec] sm:$0xf0]  ;;  %2954 = vmatpush.bf16.msra.mxu0 %v3837_v30  ;;  %v5512_v29 = vld [vmem:[#allocation5 + $0x7d4] sm:$0xf]  ;;  %v3709_v37 = vor.u32 %v5264_v25, %v3706_v62  ;;  %v494_v25 = vperm.slane %v6234_v61, 2 }
 0x141   :  { %v5081_v49 = vor.u32 %v5612_v36, %v5080_v33  ;;  %v4792_v51 = vld [vmem:[#allocation5 + $0x890] sm:$0xf]  ;;  %2916 = vmatpush.bf16.msra.mxu3 %v4825_v43  ;;  %5258 = vmatmul.msk.bf16.vlgmr.msra.gmra.mxu2 %vm2492_vm0, %v6209_v48  ;;  %v4698_v30 = vld [vmem:[#allocation5 + $0x7f0] sm:$0xf0] }
 0x142   :  { %v5540_v52 = vld [vmem:[#allocation5 + $0x8ac] sm:$0xf0]  ;;  %v5576_v33 = vld [vmem:[#allocation5 + $0x9d4] sm:$0xf] }
 0x143   :  { %v5048_v54 = vld [vmem:[#allocation5 + $0xa90] sm:$0xf]  ;;  %2967 = vmatpush.bf16.msrb.mxu2 %v4093_v42  ;;  %v4793_v3 = vor.u32 %v5540_v52, %v4792_v51  ;;  %2929 = vmatpush.bf16.msra.mxu1 %v5081_v49  ;;  %v3962_v40 = vld [vmem:[#allocation5 + $0x230] sm:$0xf0]  ;;  %v4701_v42 = vor.u32 %v5512_v29, %v4698_v30  ;;  %v4957_v47 = vor.u32 %v5576_v33, %v4954_v35  ;;  %v2674_v49 = vpop.f32.mrf.mxu3 }
 0x144   :  { %v5604_v56 = vld [vmem:[#allocation5 + $0xaac] sm:$0xf0]  ;;  %2955 = vmatpush.bf16.msra.mxu0 %v3805_v50  ;;  %v5640_v43 = vld [vmem:[#allocation5 + $0xbd4] sm:$0xf]  ;;  %v3965_v55 = vor.u32 %v5328_v38, %v3962_v40 }
 0x145   :  { %v5049_v6 = vor.u32 %v5604_v56, %v5048_v54  ;;  %v4760_v8 = vld [vmem:[#allocation5 + $0x850] sm:$0xf]  ;;  %2917 = vmatpush.bf16.msra.mxu3 %v4793_v3  ;;  %v5210_v44 = vld [vmem:[#allocation5 + $0xbf0] sm:$0xf0]  ;;  %v6267_v54 = vadd.f32 %v2674_v49, %v6262_v1 }
 0x146   :  { %v5532_v10 = vld [vmem:[#allocation5 + $0x86c] sm:$0xf0]  ;;  %v5440_v46 = vld [vmem:[#allocation5 + $0x594] sm:$0xf]  ;;  %v5213_v63 = vor.u32 %v5640_v43, %v5210_v44 }
 0x147   :  { %v5016_v45 = vld [vmem:[#allocation5 + $0xa50] sm:$0xf]  ;;  %2968 = vmatpush.bf16.msrb.mxu2 %v4061_v2  ;;  %v4761_v16 = vor.u32 %v5532_v10, %v4760_v8  ;;  %2930 = vmatpush.bf16.msra.mxu1 %v5049_v6  ;;  %v4410_v50 = vld [vmem:[#allocation5 + $0x5b0] sm:$0xf0] }
 0x148   :  { %v5596_v11 = vld [vmem:[#allocation5 + $0xa6c] sm:$0xf0]  ;;  %2956 = vmatpush.bf16.msra.mxu0 %v3773_v7  ;;  %v5504_v51 = vld [vmem:[#allocation5 + $0x794] sm:$0xf]  ;;  %v4413_v0 = vor.u32 %v5440_v46, %v4410_v50 }
 0x149   :  { %v4728_v19 = vld [vmem:[#allocation5 + $0x810] sm:$0xf]  ;;  %v5017_v20 = vor.u32 %v5596_v11, %v5016_v45  ;;  %2918 = vmatpush.bf16.msra.mxu3 %v4761_v16  ;;  %v4666_v52 = vld [vmem:[#allocation5 + $0x7b0] sm:$0xf0]  ;;  %v2713_v16 = vpop.f32.mrf.mxu0 }
 0x14a   :  { %v5524_v22 = vld [vmem:[#allocation5 + $0x82c] sm:$0xf0]  ;;  %v5568_v56 = vld [vmem:[#allocation5 + $0x994] sm:$0xf]  ;;  %v4669_v2 = vor.u32 %v5504_v51, %v4666_v52 }
 0x14b   :  { %v4984_v23 = vld [vmem:[#allocation5 + $0xa10] sm:$0xf]  ;;  %2969 = vmatpush.bf16.msrb.mxu2 %v4029_v15  ;;  %v4729_v32 = vor.u32 %v5524_v22, %v4728_v19  ;;  %2931 = vmatpush.bf16.msra.mxu1 %v5017_v20  ;;  %v4922_v59 = vld [vmem:[#allocation5 + $0x9b0] sm:$0xf0]  ;;  %v2676_v19 = vpop.f32.mrf.mxu3 }
 0x14c   :  { %v5588_v24 = vld [vmem:[#allocation5 + $0xa2c] sm:$0xf0]  ;;  %2957 = vmatpush.bf16.msra.mxu0 %v3741_v21  ;;  %v5632_v3 = vld [vmem:[#allocation5 + $0xb94] sm:$0xf]  ;;  %v4925_v6 = vor.u32 %v5568_v56, %v4922_v59 }
 0x14d   :  { %v4985_v36 = vor.u32 %v5588_v24, %v4984_v23  ;;  %2919 = vmatpush.bf16.msra.mxu3 %v4729_v32  ;;  %v5178_v4 = vld [vmem:[#allocation5 + $0xbb0] sm:$0xf0] }
 0x14e   :  { %v5432_v5 = vld [vmem:[#allocation5 + $0x554] sm:$0xf]  ;;  %v5181_v11 = vor.u32 %v5632_v3, %v5178_v4  ;;  %v2689_v3 = vpop.f32.mrf.mxu1 }
 0x14f   :  { %2970 = vmatpush.bf16.msrb.mxu2 %v3997_v31  ;;  %2932 = vmatpush.bf16.msra.mxu1 %v4985_v36  ;;  %v4378_v7 = vld [vmem:[#allocation5 + $0x570] sm:$0xf0]  ;;  %v4160_v3 = vld [vmem:[#allocation5 + $0x398] sm:$0xf] }
 0x150   :  { %2958 = vmatpush.bf16.msra.mxu0 %v3709_v37  ;;  %2920 = vmatmul.bf16.vlgmr.msra.gmra.mxu3 %v6213_v34  ;;  %v5496_v1 = vld [vmem:[#allocation5 + $0x754] sm:$0xf]  ;;  %v4381_v12 = vor.u32 %v5432_v5, %v4378_v7  ;;  %v2688_v37 = vadd.f32 %v2687_v26, %v494_v25 }
 0x151   :  { %2977 = vmatpush.bf16.msrb.mxu3 %v4445_v41  ;;  %v4634_v8 = vld [vmem:[#allocation5 + $0x770] sm:$0xf0]  ;;  %v2715_v46 = vpop.f32.mrf.mxu0 }
 0x152   :  { %v5560_v10 = vld [vmem:[#allocation5 + $0x954] sm:$0xf]  ;;  %2933 = vmatmul.bf16.vlgmr.msra.gmra.mxu1 %v6215_v39  ;;  %v4637_v13 = vor.u32 %v5496_v1, %v4634_v8  ;;  %v5389_v46 = vld [vmem:[#allocation5 + $0x3f4] sm:$0xf0] }
 0x153   :  { %2990 = vmatpush.bf16.msrb.mxu1 %v4701_v42  ;;  %2971 = vmatpush.bf16.msrb.mxu2 %v3965_v55  ;;  %v4890_v45 = vld [vmem:[#allocation5 + $0x970] sm:$0xf0]  ;;  %v2700_v50 = vpop.f32.mrf.mxu3 }
 0x154   :  { %3003 = vmatpush.bf16.msrb.mxu0 %v4957_v47  ;;  %v5624_v14 = vld [vmem:[#allocation5 + $0xb54] sm:$0xf]  ;;  %v4893_v18 = vor.u32 %v5560_v10, %v4890_v45  ;;  %v2701_v56 = vadd.f32 %v2700_v50, %v2688_v37 }
 0x155   :  { %2959 = vmatmul.bf16.vlgmr.msra.gmra.mxu0 %v6199_v57  ;;  %2978 = vmatpush.bf16.msrb.mxu3 %v4413_v0  ;;  %v5146_v15 = vld [vmem:[#allocation5 + $0xb70] sm:$0xf0]  ;;  %v2726_v0 = vpop.f32.mrf.mxu2 }
 0x156   :  { %v5424_v17 = vld [vmem:[#allocation5 + $0x514] sm:$0xf]  ;;  %2972 = vmatmul.bf16.vlgmr.msrb.gmra.mxu2 %v6205_v9  ;;  %v5149_v62 = vor.u32 %v5624_v14, %v5146_v15 }
 0x157   :  { %3016 = vmatpush.bf16.msra.mxu2 %v5213_v63  ;;  %2991 = vmatpush.bf16.msrb.mxu1 %v4669_v2  ;;  %v4346_v20 = vld [vmem:[#allocation5 + $0x530] sm:$0xf0] }
 0x158   :  { %3004 = vmatpush.bf16.msrb.mxu0 %v4925_v6  ;;  %v5488_v21 = vld [vmem:[#allocation5 + $0x714] sm:$0xf]  ;;  %v4349_v27 = vor.u32 %v5424_v17, %v4346_v20  ;;  %v2714_v6 = vadd.f32 %v2713_v16, %v2701_v56 }
 0x159   :  { %v4602_v22 = vld [vmem:[#allocation5 + $0x730] sm:$0xf0]  ;;  %2979 = vmatpush.bf16.msrb.mxu3 %v4381_v12 }
 0x15a   :  { %v5552_v23 = vld [vmem:[#allocation5 + $0x914] sm:$0xf]  ;;  %v4605_v28 = vor.u32 %v5488_v21, %v4602_v22 }
 0x15b   :  { %v4858_v24 = vld [vmem:[#allocation5 + $0x930] sm:$0xf0]  ;;  %3017 = vmatpush.bf16.msra.mxu2 %v5181_v11  ;;  %2992 = vmatpush.bf16.msrb.mxu1 %v4637_v13  ;;  %v6274_v13 = vadd.f32 %v2726_v0, %v2714_v6  ;;  %v5381_v6 = vld [vmem:[#allocation5 + $0x3b4] sm:$0xf0] }
 0x15c   :  { %v5616_v29 = vld [vmem:[#allocation5 + $0xb14] sm:$0xf]  ;;  %3005 = vmatpush.bf16.msrb.mxu0 %v4893_v18  ;;  %v4861_v32 = vor.u32 %v5552_v23, %v4858_v24  ;;  %v6276_v24 = vpop.f32.mrf.mxu0 }
 0x15d   :  { %v5114_v30 = vld [vmem:[#allocation5 + $0xb30] sm:$0xf0]  ;;  %2980 = vmatpush.bf16.msrb.mxu3 %v4349_v27 }
 0x15e   :  { %v5416_v31 = vld [vmem:[#allocation5 + $0x4d4] sm:$0xf]  ;;  %v5117_v61 = vor.u32 %v5616_v29, %v5114_v30  ;;  %v3936_v29 = vld [vmem:[#allocation5 + $0x1d8] sm:$0xf] }
 0x15f   :  { %v4314_v33 = vld [vmem:[#allocation5 + $0x4f0] sm:$0xf0]  ;;  %3018 = vmatpush.bf16.msra.mxu2 %v5149_v62  ;;  %2993 = vmatpush.bf16.msrb.mxu1 %v4605_v28  ;;  %v2702_v28 = vpop.f32.mrf.mxu3  ;;  %v5325_v30 = vld [vmem:[#allocation5 + $0x1f4] sm:$0xf0] }
 0x160   :  { %v5480_v35 = vld [vmem:[#allocation5 + $0x6d4] sm:$0xf]  ;;  %v4317_v41 = vor.u32 %v5416_v31, %v4314_v33  ;;  %3006 = vmatpush.bf16.msrb.mxu0 %v4861_v32  ;;  %v4448_v31 = vld [vmem:[#allocation5 + $0x5d8] sm:$0xf]  ;;  %v2728_v32 = vpop.f32.mrf.mxu2 }
 0x161   :  { %v4570_v36 = vld [vmem:[#allocation5 + $0x6f0] sm:$0xf0]  ;;  %v5365_v32 = vld [vmem:[#allocation5 + $0x334] sm:$0xf0] }
 0x162   :  { %v5544_v38 = vld [vmem:[#allocation5 + $0x8d4] sm:$0xf]  ;;  %v4573_v42 = vor.u32 %v5480_v35, %v4570_v36  ;;  %2981 = vmatpush.bf16.msrb.mxu3 %v4317_v41  ;;  %v5453_v35 = vld [vmem:[#allocation5 + $0x5f4] sm:$0xf0] }
 0x163   :  { %v4826_v40 = vld [vmem:[#allocation5 + $0x8f0] sm:$0xf0]  ;;  %3019 = vmatpush.bf16.msra.mxu2 %v5117_v61  ;;  %v4449_v50 = vor.u32 %v5453_v35, %v4448_v31  ;;  %v5493_v35 = vld [vmem:[#allocation5 + $0x734] sm:$0xf0] }
 0x164   :  { %v5608_v43 = vld [vmem:[#allocation5 + $0xad4] sm:$0xf]  ;;  %v4829_v49 = vor.u32 %v5544_v38, %v4826_v40  ;;  %2994 = vmatpush.bf16.msrb.mxu1 %v4573_v42  ;;  %v4192_v42 = vld [vmem:[#allocation5 + $0x3d8] sm:$0xf] }
 0x165   :  { %v5082_v44 = vld [vmem:[#allocation5 + $0xaf0] sm:$0xf0]  ;;  %v4193_v0 = vor.u32 %v5389_v46, %v4192_v42  ;;  %v6283_v46 = vld [vmem:[#allocation7] sm:$0xff] }
 0x166   :  { %v5408_v47 = vld [vmem:[#allocation5 + $0x494] sm:$0xf]  ;;  %v5085_v2 = vor.u32 %v5608_v43, %v5082_v44  ;;  %3007 = vmatpush.bf16.msrb.mxu0 %v4829_v49  ;;  %v3937_v44 = vor.u32 %v5325_v30, %v3936_v29  ;;  %v5517_v49 = vld [vmem:[#allocation5 + $0x7f4] sm:$0xf0] }
 0x167   :  { %v4282_v51 = vld [vmem:[#allocation5 + $0x4b0] sm:$0xf0]  ;;  %v4096_v30 = vld [vmem:[#allocation5 + $0x318] sm:$0xf] }
 0x168   :  { %v5472_v52 = vld [vmem:[#allocation5 + $0x694] sm:$0xf]  ;;  %v4285_v4 = vor.u32 %v5408_v47, %v4282_v51  ;;  %3020 = vmatpush.bf16.msra.mxu2 %v5085_v2  ;;  %v4704_v47 = vld [vmem:[#allocation5 + $0x7d8] sm:$0xf] }
 0x169   :  { %v4538_v55 = vld [vmem:[#allocation5 + $0x6b0] sm:$0xf0]  ;;  %v4705_v2 = vor.u32 %v5517_v49, %v4704_v47  ;;  %v495_v47 = vperm.slane %v6283_v46, 3 }
 0x16a   :  { %v5536_v59 = vld [vmem:[#allocation5 + $0x894] sm:$0xf]  ;;  %v4541_v5 = vor.u32 %v5472_v52, %v4538_v55  ;;  %2982 = vmatpush.bf16.msrb.mxu3 %v4285_v4  ;;  %v3904_v52 = vld [vmem:[#allocation5 + $0x198] sm:$0xf]  ;;  %v2767_v4 = vpop.f32.mrf.mxu0 }
 0x16b   :  { %v4794_v63 = vld [vmem:[#allocation5 + $0x8b0] sm:$0xf0]  ;;  %v5317_v55 = vld [vmem:[#allocation5 + $0x1b4] sm:$0xf0]  ;;  %v2778_v4 = vpop.f32.mrf.mxu2 }
 0x16c   :  { %v5600_v7 = vld [vmem:[#allocation5 + $0xa94] sm:$0xf]  ;;  %v4797_v10 = vor.u32 %v5536_v59, %v4794_v63  ;;  %2995 = vmatpush.bf16.msrb.mxu1 %v4541_v5  ;;  %v4416_v59 = vld [vmem:[#allocation5 + $0x598] sm:$0xf]  ;;  %v3905_v5 = vor.u32 %v5317_v55, %v3904_v52 }
 0x16d   :  { %v5050_v1 = vld [vmem:[#allocation5 + $0xab0] sm:$0xf0]  ;;  %v5445_v63 = vld [vmem:[#allocation5 + $0x5b4] sm:$0xf0] }
 0x16e   :  { %v5400_v8 = vld [vmem:[#allocation5 + $0x454] sm:$0xf]  ;;  %v5053_v17 = vor.u32 %v5600_v7, %v5050_v1  ;;  %3008 = vmatpush.bf16.msrb.mxu0 %v4797_v10  ;;  %v4672_v7 = vld [vmem:[#allocation5 + $0x798] sm:$0xf] }
 0x16f   :  { %v4250_v45 = vld [vmem:[#allocation5 + $0x470] sm:$0xf0]  ;;  %v5509_v1 = vld [vmem:[#allocation5 + $0x7b4] sm:$0xf0] }
 0x170   :  { %v5464_v11 = vld [vmem:[#allocation5 + $0x654] sm:$0xf]  ;;  %v4253_v20 = vor.u32 %v5400_v8, %v4250_v45  ;;  %3021 = vmatpush.bf16.msra.mxu2 %v5053_v17  ;;  %v4417_v8 = vor.u32 %v5445_v63, %v4416_v59  ;;  %v3872_v10 = vld [vmem:[#allocation5 + $0x158] sm:$0xf]  ;;  %v2752_v63 = vpop.f32.mrf.mxu3 }
 0x171   :  { %v4506_v12 = vld [vmem:[#allocation5 + $0x670] sm:$0xf0]  ;;  %v5309_v45 = vld [vmem:[#allocation5 + $0x174] sm:$0xf0] }
 0x172   :  { %v5528_v14 = vld [vmem:[#allocation5 + $0x854] sm:$0xf]  ;;  %v4509_v16 = vor.u32 %v5464_v11, %v4506_v12  ;;  %2983 = vmatpush.bf16.msrb.mxu3 %v4253_v20  ;;  %v4384_v11 = vld [vmem:[#allocation5 + $0x558] sm:$0xf] }
 0x173   :  { %v4762_v15 = vld [vmem:[#allocation5 + $0x870] sm:$0xf0]  ;;  %v5437_v12 = vld [vmem:[#allocation5 + $0x574] sm:$0xf0] }
 0x174   :  { %v5592_v18 = vld [vmem:[#allocation5 + $0xa54] sm:$0xf]  ;;  %v4765_v25 = vor.u32 %v5528_v14, %v4762_v15  ;;  %2996 = vmatpush.bf16.msrb.mxu1 %v4509_v16  ;;  %v4161_v14 = vor.u32 %v5381_v6, %v4160_v3  ;;  %v4673_v15 = vor.u32 %v5509_v1, %v4672_v7  ;;  %v4128_v17 = vld [vmem:[#allocation5 + $0x358] sm:$0xf]  ;;  %v2779_v1 = vadd.f32 %v2778_v4, %v495_v47 }
 0x175   :  { %v5018_v19 = vld [vmem:[#allocation5 + $0xa70] sm:$0xf0]  ;;  %v5373_v20 = vld [vmem:[#allocation5 + $0x374] sm:$0xf0] }
 0x176   :  { %v5392_v21 = vld [vmem:[#allocation5 + $0x414] sm:$0xf]  ;;  %v5021_v33 = vor.u32 %v5592_v18, %v5018_v19  ;;  %3009 = vmatpush.bf16.msrb.mxu0 %v4765_v25  ;;  %v2739_v18 = vpop.f32.mrf.mxu1  ;;  %v3873_v19 = vor.u32 %v5309_v45, %v3872_v10  ;;  %v4640_v16 = vld [vmem:[#allocation5 + $0x758] sm:$0xf]  ;;  %v4129_v28 = vor.u32 %v5373_v20, %v4128_v17 }
 0x177   :  { %v4218_v22 = vld [vmem:[#allocation5 + $0x430] sm:$0xf0]  ;;  %v3840_v25 = vld [vmem:[#allocation5 + $0x118] sm:$0xf] }
 0x178   :  { %v5456_v23 = vld [vmem:[#allocation5 + $0x614] sm:$0xf]  ;;  %v4221_v38 = vor.u32 %v5392_v21, %v4218_v22  ;;  %3022 = vmatpush.bf16.msra.mxu2 %v5021_v33  ;;  %v5501_v21 = vld [vmem:[#allocation5 + $0x774] sm:$0xf0]  ;;  %v2740_v22 = vadd.f32 %v2739_v18, %v6274_v13 }
 0x179   :  { %v4474_v62 = vld [vmem:[#allocation5 + $0x630] sm:$0xf0]  ;;  %v4641_v29 = vor.u32 %v5501_v21, %v4640_v16  ;;  %v4608_v33 = vld [vmem:[#allocation5 + $0x718] sm:$0xf] }
 0x17a   :  { %v5520_v26 = vld [vmem:[#allocation5 + $0x814] sm:$0xf]  ;;  %v4477_v40 = vor.u32 %v5456_v23, %v4474_v62  ;;  %2984 = vmatpush.bf16.msrb.mxu3 %v4221_v38  ;;  %v4385_v23 = vor.u32 %v5437_v12, %v4384_v11  ;;  %v5301_v62 = vld [vmem:[#allocation5 + $0x134] sm:$0xf0]  ;;  %v2791_v38 = vpop.f32.mrf.mxu0  ;;  %v4609_v42 = vor.u32 %v5493_v35, %v4608_v33  ;;  %v2754_v35 = vpop.f32.mrf.mxu3 }
 0x17b   :  { %v4730_v27 = vld [vmem:[#allocation5 + $0x830] sm:$0xf0]  ;;  %v3841_v31 = vor.u32 %v5301_v62, %v3840_v25  ;;  %v5285_v59 = vld [vmem:[#allocation5 + $0xb4] sm:$0xf0]  ;;  %v6289_v18 = vadd.f32 %v2791_v38, %v2779_v1 }
 0x17c   :  { %v5648_v36 = vld [vmem:[#allocation5 + $0xc14] sm:$0xf]  ;;  %v4733_v43 = vor.u32 %v5520_v26, %v4730_v27  ;;  %2997 = vmatpush.bf16.msrb.mxu1 %v4477_v40  ;;  %v4352_v26 = vld [vmem:[#allocation5 + $0x518] sm:$0xf] }
 0x17d   :  { %v5242_v37 = vld [vmem:[#allocation5 + $0xc30] sm:$0xf0]  ;;  %2985 = vmatmul.bf16.vlgmr.msrb.gmra.mxu3 %v6197_v53  ;;  %v5429_v27 = vld [vmem:[#allocation5 + $0x534] sm:$0xf0] }
 0x17e   :  { %v5584_v61 = vld [vmem:[#allocation5 + $0xa14] sm:$0xf]  ;;  %v5245_v51 = vor.u32 %v5648_v36, %v5242_v37  ;;  %3010 = vmatpush.bf16.msrb.mxu0 %v4733_v43  ;;  %v4353_v13 = vor.u32 %v5429_v27, %v4352_v26  ;;  %v3808_v36 = vld [vmem:[#allocation5 + $0xd8] sm:$0xf]  ;;  %v2741_v52 = vpop.f32.mrf.mxu1 }
 0x17f   :  { %v4986_v41 = vld [vmem:[#allocation5 + $0xa30] sm:$0xf0]  ;;  %2998 = vmatmul.bf16.vlgmr.msrb.gmra.mxu1 %v6201_v60  ;;  %v5293_v37 = vld [vmem:[#allocation5 + $0xf4] sm:$0xf0]  ;;  %v5321_v52 = vld [vmem:[#allocation5 + $0x1dc] sm:$0xf] }
 0x180   :  { %v4989_v56 = vor.u32 %v5584_v61, %v4986_v41  ;;  %3042 = vmatpush.bf16.msra.mxu1 %v3937_v44  ;;  %3036 = vmatpush.bf16.msra.mxu3 %v5245_v51  ;;  %v4320_v40 = vld [vmem:[#allocation5 + $0x4d8] sm:$0xf]  ;;  %v4097_v41 = vor.u32 %v5365_v32, %v4096_v30  ;;  %v3809_v49 = vor.u32 %v5293_v37, %v3808_v36 }
 0x181   :  { %3011 = vmatmul.bf16.vlgmr.msrb.gmra.mxu0 %v6213_v34  ;;  %v5421_v61 = vld [vmem:[#allocation5 + $0x4f4] sm:$0xf0] }
 0x182   :  { %3068 = vmatpush.bf16.msra.mxu0 %v4449_v50  ;;  %3023 = vmatpush.bf16.msra.mxu2 %v4989_v56  ;;  %v4064_v43 = vld [vmem:[#allocation5 + $0x2d8] sm:$0xf]  ;;  %v4321_v55 = vor.u32 %v5421_v61, %v4320_v40 }
 0x183   :  { %v5357_v44 = vld [vmem:[#allocation5 + $0x2f4] sm:$0xf0] }
 0x184   :  { %3055 = vmatpush.bf16.msrb.mxu3 %v4193_v0  ;;  %3043 = vmatpush.bf16.msra.mxu1 %v3905_v5  ;;  %v4576_v50 = vld [vmem:[#allocation5 + $0x6d8] sm:$0xf]  ;;  %v4065_v0 = vor.u32 %v5357_v44, %v4064_v43  ;;  %v2753_v5 = vadd.f32 %v2752_v63, %v2740_v22  ;;  %v4194_v63 = vld [vmem:[#allocation5 + $0x3f8] sm:$0xf0] }
 0x185   :  { %3024 = vmatmul.bf16.vlgmr.msra.gmra.mxu2 %v6215_v39  ;;  %v5485_v51 = vld [vmem:[#allocation5 + $0x6f4] sm:$0xf0] }
 0x186   :  { %3081 = vmatpush.bf16.msrb.mxu2 %v4705_v2  ;;  %3069 = vmatpush.bf16.msra.mxu0 %v4417_v8  ;;  %v3776_v56 = vld [vmem:[#allocation5 + $0x98] sm:$0xf]  ;;  %v4577_v6 = vor.u32 %v5485_v51, %v4576_v50  ;;  %v6287_v12 = vadd.f32 %v6276_v24, %v2753_v5 }
 0x187   :  { %v4288_v2 = vld [vmem:[#allocation5 + $0x498] sm:$0xf]  ;;  %v3777_v8 = vor.u32 %v5285_v59, %v3776_v56  ;;  %v3938_v56 = vld [vmem:[#allocation5 + $0x1f8] sm:$0xf0] }
 0x188   :  { %3056 = vmatpush.bf16.msrb.mxu3 %v4161_v14  ;;  %3044 = vmatpush.bf16.msra.mxu1 %v3873_v19  ;;  %v5413_v3 = vld [vmem:[#allocation5 + $0x4b4] sm:$0xf0]  ;;  %v2793_v19 = vpop.f32.mrf.mxu0  ;;  %v5385_v59 = vld [vmem:[#allocation5 + $0x3dc] sm:$0xf] }
 0x189   :  { %v4032_v7 = vld [vmem:[#allocation5 + $0x298] sm:$0xf]  ;;  %v4289_v14 = vor.u32 %v5413_v3, %v4288_v2 }
 0x18a   :  { %3082 = vmatpush.bf16.msrb.mxu2 %v4673_v15  ;;  %3070 = vmatpush.bf16.msra.mxu0 %v4385_v23  ;;  %v5349_v10 = vld [vmem:[#allocation5 + $0x2b4] sm:$0xf0] }
 0x18b   :  { %v4544_v45 = vld [vmem:[#allocation5 + $0x698] sm:$0xf]  ;;  %v4033_v21 = vor.u32 %v5349_v10, %v4032_v7  ;;  %v4197_v7 = vor.u32 %v5385_v59, %v4194_v63  ;;  %v5313_v10 = vld [vmem:[#allocation5 + $0x19c] sm:$0xf] }
 0x18c   :  { %3057 = vmatpush.bf16.msrb.mxu3 %v4129_v28  ;;  %3045 = vmatpush.bf16.msra.mxu1 %v3841_v31  ;;  %v5477_v11 = vld [vmem:[#allocation5 + $0x6b4] sm:$0xf0]  ;;  %v3810_v59 = vld [vmem:[#allocation5 + $0xf8] sm:$0xf0] }
 0x18d   :  { %v3744_v15 = vld [vmem:[#allocation5 + $0x58] sm:$0xf]  ;;  %5259 = vmatmul.msk.bf16.vlgmr.msra.gmra.mxu3 %vm2492_vm0, %v6209_v48  ;;  %v4545_v22 = vor.u32 %v5477_v11, %v4544_v45  ;;  %v3906_v11 = vld [vmem:[#allocation5 + $0x1b8] sm:$0xf0] }
 0x18e   :  { %3083 = vmatpush.bf16.msrb.mxu2 %v4641_v29  ;;  %3071 = vmatpush.bf16.msra.mxu0 %v4353_v13  ;;  %v5277_v17 = vld [vmem:[#allocation5 + $0x74] sm:$0xf0]  ;;  %v2780_v13 = vpop.f32.mrf.mxu2  ;;  %v5353_v63 = vld [vmem:[#allocation5 + $0x2dc] sm:$0xf] }
 0x18f   :  { %v4256_v20 = vld [vmem:[#allocation5 + $0x458] sm:$0xf]  ;;  %v3745_v25 = vor.u32 %v5277_v17, %v3744_v15  ;;  %v4162_v15 = vld [vmem:[#allocation5 + $0x3b8] sm:$0xf0] }
 0x190   :  { %3058 = vmatpush.bf16.msrb.mxu3 %v4097_v41  ;;  %3046 = vmatpush.bf16.msra.mxu1 %v3809_v49  ;;  %v5405_v16 = vld [vmem:[#allocation5 + $0x474] sm:$0xf0] }
 0x191   :  { %v4000_v23 = vld [vmem:[#allocation5 + $0x258] sm:$0xf]  ;;  %v4257_v27 = vor.u32 %v5405_v16, %v4256_v20  ;;  %v3909_v16 = vor.u32 %v5313_v10, %v3906_v11  ;;  %v5281_v11 = vld [vmem:[#allocation5 + $0x9c] sm:$0xf] }
 0x192   :  { %3084 = vmatpush.bf16.msrb.mxu2 %v4609_v42  ;;  %3072 = vmatpush.bf16.msra.mxu0 %v4321_v55  ;;  %v5341_v24 = vld [vmem:[#allocation5 + $0x274] sm:$0xf0] }
 0x193   :  { %v4512_v62 = vld [vmem:[#allocation5 + $0x658] sm:$0xf]  ;;  %v4001_v36 = vor.u32 %v5341_v24, %v4000_v23  ;;  %v2804_v24 = vpop.f32.mrf.mxu1 }
 0x194   :  { %3059 = vmatpush.bf16.msrb.mxu3 %v4065_v0  ;;  %3047 = vmatpush.bf16.msra.mxu1 %v3777_v8  ;;  %v5469_v26 = vld [vmem:[#allocation5 + $0x674] sm:$0xf0] }
 0x195   :  { %v3712_v28 = vld [vmem:[#allocation5 + $0x18] sm:$0xf]  ;;  %v4513_v37 = vor.u32 %v5469_v26, %v4512_v62  ;;  %v3874_v26 = vld [vmem:[#allocation5 + $0x178] sm:$0xf0] }
 0x196   :  { %3085 = vmatpush.bf16.msrb.mxu2 %v4577_v6  ;;  %3073 = vmatpush.bf16.msra.mxu0 %v4289_v14  ;;  %v5269_v29 = vld [vmem:[#allocation5 + $0x34] sm:$0xf0]  ;;  %v3941_v6 = vor.u32 %v5321_v52, %v3938_v56  ;;  %v5377_v14 = vld [vmem:[#allocation5 + $0x39c] sm:$0xf] }
 0x197   :  { %v4224_v30 = vld [vmem:[#allocation5 + $0x418] sm:$0xf]  ;;  %v3713_v41 = vor.u32 %v5269_v29, %v3712_v28  ;;  %v4130_v28 = vld [vmem:[#allocation5 + $0x378] sm:$0xf0]  ;;  %v2805_v29 = vadd.f32 %v2804_v24, %v6289_v18 }
 0x198   :  { %v5397_v31 = vld [vmem:[#allocation5 + $0x434] sm:$0xf0]  ;;  %3060 = vmatpush.bf16.msrb.mxu3 %v4033_v21  ;;  %3048 = vmatpush.bf16.msra.mxu1 %v3745_v25  ;;  %v4165_v21 = vor.u32 %v5377_v14, %v4162_v15  ;;  %v5305_v25 = vld [vmem:[#allocation5 + $0x15c] sm:$0xf] }
 0x199   :  { %v4960_v32 = vld [vmem:[#allocation5 + $0x9d8] sm:$0xf]  ;;  %v4225_v47 = vor.u32 %v5397_v31, %v4224_v30  ;;  %v4098_v18 = vld [vmem:[#allocation5 + $0x338] sm:$0xf0] }
 0x19a   :  { %v5581_v33 = vld [vmem:[#allocation5 + $0x9f4] sm:$0xf0]  ;;  %3086 = vmatpush.bf16.msrb.mxu2 %v4545_v22  ;;  %3074 = vmatpush.bf16.msra.mxu0 %v4257_v27  ;;  %v5369_v27 = vld [vmem:[#allocation5 + $0x35c] sm:$0xf] }
 0x19b   :  { %v3968_v38 = vld [vmem:[#allocation5 + $0x218] sm:$0xf]  ;;  %v4961_v49 = vor.u32 %v5581_v33, %v4960_v32  ;;  %v3877_v33 = vor.u32 %v5305_v25, %v3874_v26  ;;  %v4133_v35 = vor.u32 %v5369_v27, %v4130_v28  ;;  %v5289_v52 = vld [vmem:[#allocation5 + $0xdc] sm:$0xf] }
 0x19c   :  { %v5248_v40 = vld [vmem:[#allocation5 + $0xc18] sm:$0xf]  ;;  %3061 = vmatpush.bf16.msrb.mxu3 %v4001_v36  ;;  %3049 = vmatpush.bf16.msra.mxu1 %v3713_v41  ;;  %v3778_v15 = vld [vmem:[#allocation5 + $0xb8] sm:$0xf0] }
 0x19d   :  { %v5653_v61 = vld [vmem:[#allocation5 + $0xc34] sm:$0xf0]  ;;  %v3781_v24 = vor.u32 %v5281_v11, %v3778_v15  ;;  %v5273_v28 = vld [vmem:[#allocation5 + $0x5c] sm:$0xf] }
 0x19e   :  { %v5333_v42 = vld [vmem:[#allocation5 + $0x234] sm:$0xf0]  ;;  %v5249_v55 = vor.u32 %v5653_v61, %v5248_v40  ;;  %3087 = vmatpush.bf16.msrb.mxu2 %v4513_v37  ;;  %3075 = vmatpush.bf16.msra.mxu0 %v4225_v47  ;;  %v5297_v37 = vld [vmem:[#allocation5 + $0x11c] sm:$0xf] }
 0x19f   :  { %v4480_v43 = vld [vmem:[#allocation5 + $0x618] sm:$0xf]  ;;  %v3969_v0 = vor.u32 %v5333_v42, %v3968_v38  ;;  %3050 = vmatmul.bf16.vlgmr.msra.gmra.mxu1 %v6199_v57  ;;  %v3842_v40 = vld [vmem:[#allocation5 + $0x138] sm:$0xf0] }
 0x1a0   :  { %v5461_v44 = vld [vmem:[#allocation5 + $0x634] sm:$0xf0]  ;;  %3094 = vmatpush.bf16.msrb.mxu1 %v4961_v49  ;;  %v5361_v61 = vld [vmem:[#allocation5 + $0x31c] sm:$0xf]  ;;  %v3845_v47 = vor.u32 %v5297_v37, %v3842_v40 }
 0x1a1   :  { %v5216_v50 = vld [vmem:[#allocation5 + $0xbd8] sm:$0xf]  ;;  %v4481_v2 = vor.u32 %v5461_v44, %v4480_v43  ;;  %3062 = vmatpush.bf16.msrb.mxu3 %v3969_v0  ;;  %3076 = vmatmul.bf16.vlgmr.msra.gmra.mxu0 %v6197_v53  ;;  %v2843_v43 = vpop.f32.mrf.mxu0  ;;  %v4101_v49 = vor.u32 %v5361_v61, %v4098_v18  ;;  %v4066_v0 = vld [vmem:[#allocation5 + $0x2f8] sm:$0xf0] }
 0x1a2   :  { %v5645_v51 = vld [vmem:[#allocation5 + $0xbf4] sm:$0xf0]  ;;  %3127 = vmatpush.bf16.msrb.mxu0 %v5249_v55  ;;  %v2806_v55 = vpop.f32.mrf.mxu1  ;;  %v4450_v40 = vld [vmem:[#allocation5 + $0x5f8] sm:$0xf0] }
 0x1a3   :  { %v4928_v3 = vld [vmem:[#allocation5 + $0x998] sm:$0xf]  ;;  %v5217_v5 = vor.u32 %v5645_v51, %v5216_v50  ;;  %3088 = vmatpush.bf16.msrb.mxu2 %v4481_v2  ;;  %v4674_v15 = vld [vmem:[#allocation5 + $0x7b8] sm:$0xf0] }
 0x1a4   :  { %v5573_v4 = vld [vmem:[#allocation5 + $0x9b4] sm:$0xf0]  ;;  %3063 = vmatmul.bf16.vlgmr.msrb.gmra.mxu3 %v6205_v9 }
 0x1a5   :  { %v5184_v1 = vld [vmem:[#allocation5 + $0xb98] sm:$0xf]  ;;  %v4929_v45 = vor.u32 %v5573_v4, %v4928_v3  ;;  %3107 = vmatpush.bf16.msra.mxu3 %v5217_v5  ;;  %v2817_v4 = vpop.f32.mrf.mxu3  ;;  %v2830_v5 = vpop.f32.mrf.mxu2 }
 0x1a6   :  { %v5637_v8 = vld [vmem:[#allocation5 + $0xbb4] sm:$0xf0]  ;;  %3146 = vmatpush.bf16.msra.mxu0 %v4197_v7  ;;  %3089 = vmatmul.bf16.vlgmr.msrb.gmra.mxu2 %v6201_v60  ;;  %v2818_v7 = vadd.f32 %v2817_v4, %v2805_v29  ;;  %v5218_v4 = vld [vmem:[#allocation5 + $0xbf8] sm:$0xf0] }
 0x1a7   :  { %v4896_v17 = vld [vmem:[#allocation5 + $0x958] sm:$0xf]  ;;  %v5185_v20 = vor.u32 %v5637_v8, %v5184_v1  ;;  %3133 = vmatpush.bf16.msra.mxu2 %v3941_v6  ;;  %3095 = vmatpush.bf16.msrb.mxu1 %v4929_v45  ;;  %v3813_v1 = vor.u32 %v5289_v52, %v3810_v59  ;;  %v4069_v8 = vor.u32 %v5353_v63, %v4066_v0  ;;  %v3970_v52 = vld [vmem:[#allocation5 + $0x238] sm:$0xf0] }
 0x1a8   :  { %v5565_v19 = vld [vmem:[#allocation5 + $0x974] sm:$0xf0]  ;;  %v4706_v59 = vld [vmem:[#allocation5 + $0x7f8] sm:$0xf0] }
 0x1a9   :  { %v5152_v22 = vld [vmem:[#allocation5 + $0xb58] sm:$0xf]  ;;  %v4897_v62 = vor.u32 %v5565_v19, %v4896_v17  ;;  %3108 = vmatpush.bf16.msra.mxu3 %v5185_v20  ;;  %v5345_v17 = vld [vmem:[#allocation5 + $0x29c] sm:$0xf]  ;;  %v2831_v20 = vadd.f32 %v2830_v5, %v2818_v7 }
 0x1aa   :  { %v5629_v23 = vld [vmem:[#allocation5 + $0xb74] sm:$0xf0]  ;;  %3147 = vmatpush.bf16.msra.mxu0 %v4165_v21  ;;  %v4034_v19 = vld [vmem:[#allocation5 + $0x2b8] sm:$0xf0]  ;;  %v2856_v29 = vpop.f32.mrf.mxu1 }
 0x1ab   :  { %v4864_v30 = vld [vmem:[#allocation5 + $0x918] sm:$0xf]  ;;  %v5153_v32 = vor.u32 %v5629_v23, %v5152_v22  ;;  %3134 = vmatpush.bf16.msra.mxu2 %v3909_v16  ;;  %3096 = vmatpush.bf16.msrb.mxu1 %v4897_v62  ;;  %v2845_v22 = vpop.f32.mrf.mxu0  ;;  %v2844_v25 = vadd.f32 %v2843_v43, %v2831_v20  ;;  %v4037_v62 = vor.u32 %v5345_v17, %v4034_v19  ;;  %v5577_v63 = vld [vmem:[#allocation5 + $0x9dc] sm:$0xf] }
 0x1ac   :  { %v5557_v31 = vld [vmem:[#allocation5 + $0x934] sm:$0xf0]  ;;  %v4418_v7 = vld [vmem:[#allocation5 + $0x5b8] sm:$0xf0] }
 0x1ad   :  { %v5120_v13 = vld [vmem:[#allocation5 + $0xb18] sm:$0xf]  ;;  %v4865_v38 = vor.u32 %v5557_v31, %v4864_v30  ;;  %3109 = vmatpush.bf16.msra.mxu3 %v5153_v32  ;;  %v3746_v31 = vld [vmem:[#allocation5 + $0x78] sm:$0xf0]  ;;  %v2832_v61 = vpop.f32.mrf.mxu2  ;;  %v2819_v18 = vpop.f32.mrf.mxu3 }
 0x1ae   :  { %v5621_v36 = vld [vmem:[#allocation5 + $0xb34] sm:$0xf0]  ;;  %3148 = vmatpush.bf16.msra.mxu0 %v4133_v35  ;;  %v5337_v32 = vld [vmem:[#allocation5 + $0x25c] sm:$0xf]  ;;  %v6300_v35 = vadd.f32 %v2856_v29, %v2844_v25 }
 0x1af   :  { %v4832_v41 = vld [vmem:[#allocation5 + $0x8d8] sm:$0xf]  ;;  %v5121_v44 = vor.u32 %v5621_v36, %v5120_v13  ;;  %3135 = vmatpush.bf16.msra.mxu2 %v3877_v33  ;;  %3097 = vmatpush.bf16.msrb.mxu1 %v4865_v38  ;;  %v4002_v33 = vld [vmem:[#allocation5 + $0x278] sm:$0xf0] }
 0x1b0   :  { %v5549_v42 = vld [vmem:[#allocation5 + $0x8f4] sm:$0xf0]  ;;  %v5449_v38 = vld [vmem:[#allocation5 + $0x5dc] sm:$0xf] }
 0x1b1   :  { %v5088_v50 = vld [vmem:[#allocation5 + $0xad8] sm:$0xf]  ;;  %v4833_v56 = vor.u32 %v5549_v42, %v4832_v41  ;;  %3110 = vmatpush.bf16.msra.mxu3 %v5121_v44  ;;  %5260 = vmatmul.msk.bf16.vlgmr.msrb.gmra.mxu0 %vm2492_vm0, %v6209_v48  ;;  %v3749_v41 = vor.u32 %v5273_v28, %v3746_v31  ;;  %v4005_v42 = vor.u32 %v5337_v32, %v4002_v33  ;;  %v5569_v17 = vld [vmem:[#allocation5 + $0x99c] sm:$0xf] }
 0x1b2   :  { %v5613_v51 = vld [vmem:[#allocation5 + $0xaf4] sm:$0xf0]  ;;  %3149 = vmatpush.bf16.msra.mxu0 %v4101_v49  ;;  %v4453_v55 = vor.u32 %v5449_v38, %v4450_v40  ;;  %v4930_v20 = vld [vmem:[#allocation5 + $0x9b8] sm:$0xf0] }
 0x1b3   :  { %v4800_v2 = vld [vmem:[#allocation5 + $0x898] sm:$0xf]  ;;  %v5089_v6 = vor.u32 %v5613_v51, %v5088_v50  ;;  %3136 = vmatpush.bf16.msra.mxu2 %v3845_v47  ;;  %3098 = vmatpush.bf16.msrb.mxu1 %v4833_v56  ;;  %v5265_v47 = vld [vmem:[#allocation5 + $0x1c] sm:$0xf] }
 0x1b4   :  { %v5541_v3 = vld [vmem:[#allocation5 + $0x8b4] sm:$0xf0]  ;;  %v3714_v50 = vld [vmem:[#allocation5 + $0x38] sm:$0xf0] }
 0x1b5   :  { %v5056_v10 = vld [vmem:[#allocation5 + $0xa98] sm:$0xf]  ;;  %v4801_v14 = vor.u32 %v5541_v3, %v4800_v2  ;;  %3111 = vmatpush.bf16.msra.mxu3 %v5089_v6  ;;  %v5329_v51 = vld [vmem:[#allocation5 + $0x21c] sm:$0xf]  ;;  %v3717_v5 = vor.u32 %v5265_v47, %v3714_v50 }
 0x1b6   :  { %v5605_v45 = vld [vmem:[#allocation5 + $0xab4] sm:$0xf0]  ;;  %3150 = vmatpush.bf16.msra.mxu0 %v4069_v8  ;;  %v5513_v56 = vld [vmem:[#allocation5 + $0x7dc] sm:$0xf] }
 0x1b7   :  { %v4768_v16 = vld [vmem:[#allocation5 + $0x858] sm:$0xf]  ;;  %v5057_v23 = vor.u32 %v5605_v45, %v5056_v10  ;;  %3137 = vmatpush.bf16.msra.mxu2 %v3813_v1  ;;  %3099 = vmatpush.bf16.msrb.mxu1 %v4801_v14  ;;  %v4962_v2 = vld [vmem:[#allocation5 + $0x9f8] sm:$0xf0]  ;;  %v3973_v1 = vor.u32 %v5329_v51, %v3970_v52  ;;  %v4709_v8 = vor.u32 %v5513_v56, %v4706_v59  ;;  %v2858_v10 = vpop.f32.mrf.mxu1  ;;  %v496_v51 = vperm.slane %v6283_v46, 4 }
 0x1b8   :  { %v5533_v21 = vld [vmem:[#allocation5 + $0x874] sm:$0xf0]  ;;  %v5641_v3 = vld [vmem:[#allocation5 + $0xbdc] sm:$0xf]  ;;  %v4965_v45 = vor.u32 %v5577_v63, %v4962_v2 }
 0x1b9   :  { %v5024_v26 = vld [vmem:[#allocation5 + $0xa58] sm:$0xf]  ;;  %v4769_v30 = vor.u32 %v5533_v21, %v4768_v16  ;;  %3112 = vmatpush.bf16.msra.mxu3 %v5057_v23  ;;  %v5441_v6 = vld [vmem:[#allocation5 + $0x59c] sm:$0xf]  ;;  %v5221_v11 = vor.u32 %v5641_v3, %v5218_v4 }
 0x1ba   :  { %v5597_v27 = vld [vmem:[#allocation5 + $0xa74] sm:$0xf0]  ;;  %3151 = vmatpush.bf16.msra.mxu0 %v4037_v62  ;;  %v5505_v14 = vld [vmem:[#allocation5 + $0x79c] sm:$0xf]  ;;  %v4421_v19 = vor.u32 %v5441_v6, %v4418_v7 }
 0x1bb   :  { %v4736_v13 = vld [vmem:[#allocation5 + $0x818] sm:$0xf]  ;;  %v5025_v37 = vor.u32 %v5597_v27, %v5024_v26  ;;  %3138 = vmatpush.bf16.msra.mxu2 %v3781_v24  ;;  %3100 = vmatpush.bf16.msrb.mxu1 %v4769_v30  ;;  %v5633_v16 = vld [vmem:[#allocation5 + $0xb9c] sm:$0xf]  ;;  %v4677_v25 = vor.u32 %v5505_v14, %v4674_v15  ;;  %v4933_v24 = vor.u32 %v5569_v17, %v4930_v20 }
 0x1bc   :  { %v5525_v36 = vld [vmem:[#allocation5 + $0x834] sm:$0xf0]  ;;  %v5186_v21 = vld [vmem:[#allocation5 + $0xbb8] sm:$0xf0] }
 0x1bd   :  { %v4992_v43 = vld [vmem:[#allocation5 + $0xa18] sm:$0xf]  ;;  %v4737_v49 = vor.u32 %v5525_v36, %v4736_v13  ;;  %3113 = vmatpush.bf16.msra.mxu3 %v5025_v37  ;;  %v5433_v22 = vld [vmem:[#allocation5 + $0x55c] sm:$0xf]  ;;  %v5189_v62 = vor.u32 %v5633_v16, %v5186_v21 }
 0x1be   :  { %v5589_v44 = vld [vmem:[#allocation5 + $0xa34] sm:$0xf0]  ;;  %3152 = vmatpush.bf16.msra.mxu0 %v4005_v42  ;;  %v4386_v23 = vld [vmem:[#allocation5 + $0x578] sm:$0xf0] }
 0x1bf   :  { %v4993_v0 = vor.u32 %v5589_v44, %v4992_v43  ;;  %3139 = vmatpush.bf16.msra.mxu2 %v3749_v41  ;;  %3101 = vmatpush.bf16.msrb.mxu1 %v4737_v49  ;;  %v5497_v26 = vld [vmem:[#allocation5 + $0x75c] sm:$0xf]  ;;  %v4389_v29 = vor.u32 %v5433_v22, %v4386_v23  ;;  %v2882_v47 = vpop.f32.mrf.mxu1 }
 0x1c0   :  { %v4642_v27 = vld [vmem:[#allocation5 + $0x778] sm:$0xf0] }
 0x1c1   :  { %3114 = vmatpush.bf16.msra.mxu3 %v4993_v0  ;;  %v5561_v28 = vld [vmem:[#allocation5 + $0x95c] sm:$0xf]  ;;  %v4645_v36 = vor.u32 %v5497_v26, %v4642_v27 }
 0x1c2   :  { %3102 = vmatmul.bf16.vlgmr.msrb.gmra.mxu1 %v6213_v34  ;;  %3153 = vmatpush.bf16.msra.mxu0 %v3973_v1  ;;  %v4898_v30 = vld [vmem:[#allocation5 + $0x978] sm:$0xf0] }
 0x1c3   :  { %3159 = vmatpush.bf16.msra.mxu1 %v4453_v55  ;;  %3140 = vmatpush.bf16.msra.mxu2 %v3717_v5  ;;  %v5625_v31 = vld [vmem:[#allocation5 + $0xb5c] sm:$0xf]  ;;  %v4901_v37 = vor.u32 %v5561_v28, %v4898_v30  ;;  %v2869_v5 = vpop.f32.mrf.mxu3 }
 0x1c4   :  { %3115 = vmatmul.bf16.vlgmr.msra.gmra.mxu3 %v6215_v39  ;;  %v5154_v32 = vld [vmem:[#allocation5 + $0xb78] sm:$0xf0]  ;;  %v2870_v1 = vadd.f32 %v2869_v5, %v496_v51 }
 0x1c5   :  { %3172 = vmatpush.bf16.msrb.mxu3 %v4709_v8  ;;  %v5425_v33 = vld [vmem:[#allocation5 + $0x51c] sm:$0xf]  ;;  %3154 = vmatmul.bf16.vlgmr.msra.gmra.mxu0 %v6205_v9  ;;  %v5157_v38 = vor.u32 %v5625_v31, %v5154_v32  ;;  %v2895_v8 = vpop.f32.mrf.mxu2 }
 0x1c6   :  { %3198 = vmatpush.bf16.msrb.mxu0 %v5221_v11  ;;  %v4354_v13 = vld [vmem:[#allocation5 + $0x538] sm:$0xf0]  ;;  %3141 = vmatmul.bf16.vlgmr.msra.gmra.mxu2 %v6199_v57  ;;  %v2908_v57 = vpop.f32.mrf.mxu0  ;;  %v2883_v17 = vadd.f32 %v2882_v47, %v2870_v1 }
 0x1c7   :  { %3185 = vmatpush.bf16.msrb.mxu2 %v4965_v45  ;;  %3160 = vmatpush.bf16.msra.mxu1 %v4421_v19  ;;  %v5489_v40 = vld [vmem:[#allocation5 + $0x71c] sm:$0xf]  ;;  %v4357_v41 = vor.u32 %v5425_v33, %v4354_v13  ;;  %v2884_v22 = vpop.f32.mrf.mxu1 }
 0x1c8   :  { %v4610_v61 = vld [vmem:[#allocation5 + $0x738] sm:$0xf0] }
 0x1c9   :  { %3173 = vmatpush.bf16.msrb.mxu3 %v4677_v25  ;;  %v5553_v18 = vld [vmem:[#allocation5 + $0x91c] sm:$0xf]  ;;  %v4613_v9 = vor.u32 %v5489_v40, %v4610_v61 }
 0x1ca   :  { %3199 = vmatpush.bf16.msrb.mxu0 %v5189_v62  ;;  %v4866_v42 = vld [vmem:[#allocation5 + $0x938] sm:$0xf0]  ;;  %v2896_v62 = vadd.f32 %v2895_v8, %v2883_v17 }
 0x1cb   :  { %3186 = vmatpush.bf16.msrb.mxu2 %v4933_v24  ;;  %3161 = vmatpush.bf16.msra.mxu1 %v4389_v29  ;;  %v5617_v43 = vld [vmem:[#allocation5 + $0xb1c] sm:$0xf]  ;;  %v4869_v52 = vor.u32 %v5553_v18, %v4866_v42  ;;  %v2871_v61 = vpop.f32.mrf.mxu3 }
 0x1cc   :  { %v5122_v44 = vld [vmem:[#allocation5 + $0xb38] sm:$0xf0]  ;;  %v6307_v32 = vadd.f32 %v2908_v57, %v2896_v62 }
 0x1cd   :  { %v5417_v49 = vld [vmem:[#allocation5 + $0x4dc] sm:$0xf]  ;;  %3174 = vmatpush.bf16.msrb.mxu3 %v4645_v36  ;;  %v5125_v55 = vor.u32 %v5617_v43, %v5122_v44  ;;  %v2897_v18 = vpop.f32.mrf.mxu2 }
 0x1ce   :  { %v4322_v50 = vld [vmem:[#allocation5 + $0x4f8] sm:$0xf0]  ;;  %3200 = vmatpush.bf16.msrb.mxu0 %v5157_v38  ;;  %v2910_v24 = vpop.f32.mrf.mxu0  ;;  %v5929_v18 = vld [vmem:[#allocation8 + $0xa0] sm:$0xff]  }
 0x1cf   :  { %3187 = vmatpush.bf16.msrb.mxu2 %v4901_v37  ;;  %v5481_v56 = vld [vmem:[#allocation5 + $0x6dc] sm:$0xf]  ;;  %3162 = vmatpush.bf16.msra.mxu1 %v4357_v41  ;;  %v4325_v0 = vor.u32 %v5417_v49, %v4322_v50  ;;  %v5922_v24 = vld [vmem:[#allocation8 + $0x68] sm:$0xff]  }
 0x1d0   :  { %v4578_v59 = vld [vmem:[#allocation5 + $0x6f8] sm:$0xf0]  ;;  %v5708_v61 = vunpack.c.l.bf16 %v5922_v24 }
 0x1d1   :  { %v5545_v63 = vld [vmem:[#allocation5 + $0x8dc] sm:$0xf]  ;;  %3175 = vmatpush.bf16.msrb.mxu3 %v4613_v9  ;;  %v4581_v10 = vor.u32 %v5481_v56, %v4578_v59  ;;  %v5916_v59 = vld [vmem:[#allocation8 + $0x38] sm:$0xff]  }
 0x1d2   :  { %v4834_v2 = vld [vmem:[#allocation5 + $0x8f8] sm:$0xf0]  ;;  %3201 = vmatpush.bf16.msrb.mxu0 %v5125_v55 }
 0x1d3   :  { %v5609_v3 = vld [vmem:[#allocation5 + $0xadc] sm:$0xf]  ;;  %3188 = vmatpush.bf16.msrb.mxu2 %v4869_v52  ;;  %v4837_v46 = vor.u32 %v5545_v63, %v4834_v2  ;;  %3163 = vmatpush.bf16.msra.mxu1 %v4325_v0  ;;  %v5924_v0 = vld [vmem:[#allocation8 + $0x78] sm:$0xff]  }
 0x1d4   :  { %v5090_v4 = vld [vmem:[#allocation5 + $0xaf8] sm:$0xf0]  ;;  %v5932_v2 = vld [vmem:[#allocation8 + $0xb8] sm:$0xff]  }
 0x1d5   :  { %v5409_v6 = vld [vmem:[#allocation5 + $0x49c] sm:$0xf]  ;;  %v5093_v45 = vor.u32 %v5609_v3, %v5090_v4  ;;  %3176 = vmatpush.bf16.msrb.mxu3 %v4581_v10  ;;  %v5940_v4 = vld [vmem:[#allocation8 + $0xf8] sm:$0xff]   ;;  %v5749_v1 = vunpack.c.h.bf16 %v5932_v2  ;;  %v5748_v17 = vunpack.c.l.bf16 %v5932_v2 }
 0x1d6   :  { %v4290_v7 = vld [vmem:[#allocation5 + $0x4b8] sm:$0xf0]  ;;  %v5781_v8 = vunpack.c.h.bf16 %v5940_v4 }
 0x1d7   :  { %v5473_v11 = vld [vmem:[#allocation5 + $0x69c] sm:$0xf]  ;;  %v4293_v19 = vor.u32 %v5409_v6, %v4290_v7  ;;  %3189 = vmatpush.bf16.msrb.mxu2 %v4837_v46  ;;  %3202 = vmatpush.bf16.msrb.mxu0 %v5093_v45  ;;  %v5685_v6 = vunpack.c.h.bf16 %v5916_v59  ;;  %v5717_v7 = vunpack.c.h.bf16 %v5924_v0  ;;  %v6309_v46 = vpop.f32.mrf.mxu2  ;;  %v5684_v45 = vunpack.c.l.bf16 %v5916_v59 }
 0x1d8   :  { %v4546_v14 = vld [vmem:[#allocation5 + $0x6b8] sm:$0xf0]  ;;  %v5736_v59 = vunpack.c.l.bf16 %v5929_v18 }
 0x1d9   :  { %v5537_v15 = vld [vmem:[#allocation5 + $0x89c] sm:$0xf]  ;;  %v4549_v26 = vor.u32 %v5473_v11, %v4546_v14  ;;  %3164 = vmatpush.bf16.msra.mxu1 %v4293_v19 }
 0x1da   :  { %v4802_v20 = vld [vmem:[#allocation5 + $0x8b8] sm:$0xf0] }
 0x1db   :  { %v5601_v16 = vld [vmem:[#allocation5 + $0xa9c] sm:$0xf]  ;;  %v4805_v27 = vor.u32 %v5537_v15, %v4802_v20  ;;  %3177 = vmatpush.bf16.msrb.mxu3 %v4549_v26  ;;  %v5716_v15 = vunpack.c.l.bf16 %v5924_v0  ;;  %v5780_v20 = vunpack.c.l.bf16 %v5940_v4  ;;  %v5930_v26 = vld [vmem:[#allocation8 + $0xa8] sm:$0xff]   ;;  %v5936_v0 = vld [vmem:[#allocation8 + $0xd8] sm:$0xff]  }
 0x1dc   :  { %v5058_v21 = vld [vmem:[#allocation5 + $0xab8] sm:$0xf0] }
 0x1dd   :  { %v5401_v23 = vld [vmem:[#allocation5 + $0x45c] sm:$0xf]  ;;  %v5061_v28 = vor.u32 %v5601_v16, %v5058_v21  ;;  %3190 = vmatpush.bf16.msrb.mxu2 %v4805_v27  ;;  %v5938_v27 = vld [vmem:[#allocation8 + $0xe8] sm:$0xff]  }
 0x1de   :  { %v4258_v25 = vld [vmem:[#allocation5 + $0x478] sm:$0xf0] }
 0x1df   :  { %v5465_v29 = vld [vmem:[#allocation5 + $0x65c] sm:$0xf]  ;;  %v4261_v33 = vor.u32 %v5401_v23, %v4258_v25  ;;  %3203 = vmatpush.bf16.msrb.mxu0 %v5061_v28  ;;  %v5914_v25 = vld [vmem:[#allocation8 + $0x28] sm:$0xff]  }
 0x1e0   :  { %v4514_v30 = vld [vmem:[#allocation5 + $0x678] sm:$0xf0] }
 0x1e1   :  { %v5529_v31 = vld [vmem:[#allocation5 + $0x85c] sm:$0xf]  ;;  %v4517_v41 = vor.u32 %v5465_v29, %v4514_v30  ;;  %3165 = vmatpush.bf16.msra.mxu1 %v4261_v33  ;;  %v5709_v30 = vunpack.c.h.bf16 %v5922_v24  ;;  %v5741_v33 = vunpack.c.h.bf16 %v5930_v26  ;;  %v5918_v24 = vld [vmem:[#allocation8 + $0x48] sm:$0xff]  }
 0x1e2   :  { %v4770_v13 = vld [vmem:[#allocation5 + $0x878] sm:$0xf0] }
 0x1e3   :  { %v5593_v36 = vld [vmem:[#allocation5 + $0xa5c] sm:$0xf]  ;;  %v4773_v44 = vor.u32 %v5529_v31, %v4770_v13  ;;  %3178 = vmatpush.bf16.msrb.mxu3 %v4517_v41  ;;  %v2934_v31 = vpop.f32.mrf.mxu1  ;;  %v5773_v13 = vunpack.c.h.bf16 %v5938_v27  ;;  %v5937_v41 = vld [vmem:[#allocation8 + $0xe0] sm:$0xff]  }
 0x1e4   :  { %v5026_v37 = vld [vmem:[#allocation5 + $0xa78] sm:$0xf0] }
 0x1e5   :  { %v5393_v38 = vld [vmem:[#allocation5 + $0x41c] sm:$0xf]  ;;  %v5029_v47 = vor.u32 %v5593_v36, %v5026_v37  ;;  %3191 = vmatpush.bf16.msrb.mxu2 %v4773_v44  ;;  %v5913_v36 = vld [vmem:[#allocation8 + $0x20] sm:$0xff]  }
 0x1e6   :  { %v4226_v40 = vld [vmem:[#allocation5 + $0x438] sm:$0xf0]  ;;  %v5921_v37 = vld [vmem:[#allocation8 + $0x60] sm:$0xff]   ;;  %v5673_v44 = vunpack.c.h.bf16 %v5913_v36 }
 0x1e7   :  { %v5649_v42 = vld [vmem:[#allocation5 + $0xc1c] sm:$0xf]  ;;  %v4229_v57 = vor.u32 %v5393_v38, %v4226_v40  ;;  %3204 = vmatpush.bf16.msrb.mxu0 %v5029_v47  ;;  %v6314_v38 = vpop.f32.mrf.mxu0  ;;  %v5676_v40 = vunpack.c.l.bf16 %v5914_v25  ;;  %v5705_v47 = vunpack.c.h.bf16 %v5921_v37 }
 0x1e8   :  { %v5250_v43 = vld [vmem:[#allocation5 + $0xc38] sm:$0xf0] }
 0x1e9   :  { %v5457_v49 = vld [vmem:[#allocation5 + $0x61c] sm:$0xf]  ;;  %v5253_v56 = vor.u32 %v5649_v42, %v5250_v43  ;;  %3166 = vmatpush.bf16.msra.mxu1 %v4229_v57  ;;  %v5740_v42 = vunpack.c.l.bf16 %v5930_v26  ;;  %v5772_v43 = vunpack.c.l.bf16 %v5938_v27  ;;  %v2921_v57 = vpop.f32.mrf.mxu3 }
 0x1ea   :  { %v4482_v50 = vld [vmem:[#allocation5 + $0x638] sm:$0xf0] }
 0x1eb   :  { %v5521_v9 = vld [vmem:[#allocation5 + $0x81c] sm:$0xf]  ;;  %v4485_v63 = vor.u32 %v5457_v49, %v4482_v50  ;;  %v5737_v49 = vunpack.c.h.bf16 %v5929_v18  ;;  %v5769_v50 = vunpack.c.h.bf16 %v5937_v41  ;;  %v2936_v4 = vpop.f32.mrf.mxu1  ;;  %v5933_v18 = vld [vmem:[#allocation8 + $0xc0] sm:$0xff]  }
 0x1ec   :  { %v4738_v51 = vld [vmem:[#allocation5 + $0x838] sm:$0xf0]  ;;  %3167 = vmatmul.bf16.vlgmr.msra.gmra.mxu1 %v6197_v53 }
 0x1ed   :  { %v5585_v52 = vld [vmem:[#allocation5 + $0xa1c] sm:$0xf]  ;;  %v4741_v3 = vor.u32 %v5521_v9, %v4738_v51  ;;  %3218 = vmatpush.bf16.msrb.mxu1 %v5253_v56  ;;  %3179 = vmatpush.bf16.msrb.mxu3 %v4485_v63  ;;  %v5912_v9 = vld [vmem:[#allocation8 + $0x18] sm:$0xff]   ;;  %v5672_v51 = vunpack.c.l.bf16 %v5913_v36  ;;  %v5768_v63 = vunpack.c.l.bf16 %v5937_v41  ;;  %v5917_v36 = vld [vmem:[#allocation8 + $0x40] sm:$0xff]  }
 0x1ee   :  { %v4994_v55 = vld [vmem:[#allocation5 + $0xa38] sm:$0xf0]  ;;  %v5928_v56 = vld [vmem:[#allocation8 + $0x98] sm:$0xff]  }
 0x1ef   :  { %v4997_v5 = vor.u32 %v5585_v52, %v4994_v55  ;;  %v5915_v10 = vld [vmem:[#allocation8 + $0x30] sm:$0xff]   ;;  %3192 = vmatpush.bf16.msrb.mxu2 %v4741_v3  ;;  %v5704_v52 = vunpack.c.l.bf16 %v5921_v37  ;;  %v5920_v55 = vld [vmem:[#allocation8 + $0x58] sm:$0xff]   ;;  %v5669_v3 = vunpack.c.h.bf16 %v5912_v9  ;;  %v5925_v37 = vld [vmem:[#allocation8 + $0x80] sm:$0xff]  }
 0x1f0   :  { %v5923_v11 = vld [vmem:[#allocation8 + $0x70] sm:$0xff]   ;;  %v5681_v16 = vunpack.c.h.bf16 %v5915_v10  ;;  %3180 = vmatmul.bf16.vlgmr.msrb.gmra.mxu3 %v6201_v60  ;;  %v5680_v23 = vunpack.c.l.bf16 %v5915_v10  ;;  %v5677_v60 = vunpack.c.h.bf16 %v5914_v25  ;;  %v5765_v10 = vunpack.c.h.bf16 %v5936_v0 }
 0x1f1   :  { %v5931_v14 = vld [vmem:[#allocation8 + $0xb0] sm:$0xff]   ;;  %3205 = vmatpush.bf16.msrb.mxu0 %v4997_v5  ;;  %3492 = vmatpush.msra.mxu3 %v5685_v6  ;;  %v5713_v21 = vunpack.c.h.bf16 %v5923_v11  ;;  %v5712_v62 = vunpack.c.l.bf16 %v5923_v11  ;;  %v5701_v5 = vunpack.c.h.bf16 %v5920_v55  ;;  %v5733_v6 = vunpack.c.h.bf16 %v5928_v56 }
 0x1f2   :  { %v5939_v19 = vld [vmem:[#allocation8 + $0xf0] sm:$0xff]   ;;  %3512 = vmatpush.msra.mxu1 %v5717_v7  ;;  %v5745_v22 = vunpack.c.h.bf16 %v5931_v14  ;;  %3193 = vmatmul.bf16.vlgmr.msrb.gmra.mxu2 %v6213_v34  ;;  %v5744_v28 = vunpack.c.l.bf16 %v5931_v14  ;;  %v2949_v34 = vpop.f32.mrf.mxu2 }
 0x1f3   :  { %3532 = vmatpush.msra.mxu2 %v5749_v1  ;;  %3493 = vmatpush.msra.mxu3 %v5684_v45  ;;  %v5777_v53 = vunpack.c.h.bf16 %v5939_v19  ;;  %v5776_v29 = vunpack.c.l.bf16 %v5939_v19  ;;  %v5911_v7 = vld [vmem:[#allocation8 + $0x10] sm:$0xff]   ;;  %v2962_v1 = vpop.f32.mrf.mxu0  ;;  %v5668_v45 = vunpack.c.l.bf16 %v5912_v9  ;;  %v5948_v9 = vld [vmem:[#allocation8 + $0x138] sm:$0xff]  }
 0x1f4   :  { %3513 = vmatpush.msra.mxu1 %v5716_v15  ;;  %3206 = vmatmul.bf16.vlgmr.msrb.gmra.mxu0 %v6215_v39  ;;  %v2922_v39 = vadd.f32 %v2921_v57, %v6307_v32  ;;  %v5919_v11 = vld [vmem:[#allocation8 + $0x50] sm:$0xff]   ;;  %v5700_v15 = vunpack.c.l.bf16 %v5920_v55  ;;  %v5664_v25 = vunpack.c.l.bf16 %v5911_v7  ;;  %v5720_v57 = vunpack.c.l.bf16 %v5925_v37 }
 0x1f5   :  { %3552 = vmatpush.msra.mxu0 %v5781_v8  ;;  %3533 = vmatpush.msra.mxu2 %v5748_v17  ;;  %v5927_v14 = vld [vmem:[#allocation8 + $0x90] sm:$0xff]   ;;  %v5732_v17 = vunpack.c.l.bf16 %v5928_v56  ;;  %v5696_v26 = vunpack.c.l.bf16 %v5919_v11  ;;  %v5813_v55 = vunpack.c.h.bf16 %v5948_v9  ;;  %v3225_v56 = vmax.f32 %v6267_v54, 0.0 }
 0x1f6   :  { %3494 = vmatpush.msra.mxu3 %v5681_v16  ;;  %3514 = vmatpush.msra.mxu1 %v5713_v21  ;;  %v2935_v2 = vadd.f32 %v2934_v31, %v2922_v39  ;;  %v5935_v19 = vld [vmem:[#allocation8 + $0xd0] sm:$0xff]   ;;  %v5665_v16 = vunpack.c.h.bf16 %v5911_v7  ;;  %v5697_v21 = vunpack.c.h.bf16 %v5919_v11  ;;  %v5728_v27 = vunpack.c.l.bf16 %v5927_v14  ;;  %v5655_v31 = vld [vmem:[#allocation8] sm:$0xff]   ;;  %v5946_v7 = vld [vmem:[#allocation8 + $0x128] sm:$0xff]  }
 0x1f7   :  { %3553 = vmatpush.msra.mxu0 %v5780_v20  ;;  %3534 = vmatpush.msra.mxu2 %v5745_v22  ;;  %v5764_v20 = vunpack.c.l.bf16 %v5936_v0  ;;  %v5910_v22 = vld [vmem:[#allocation8 + $0x8] sm:$0xff]   ;;  %v5752_v39 = vunpack.c.l.bf16 %v5933_v18  ;;  %v5947_v0 = vld [vmem:[#allocation8 + $0x130] sm:$0xff]  }
 0x1f8   :  { %3495 = vmatpush.msra.mxu3 %v5680_v23  ;;  %3515 = vmatpush.msra.mxu1 %v5712_v62  ;;  %v6321_v8 = vadd.f32 %v6309_v46, %v2935_v2  ;;  %v5729_v46 = vunpack.c.h.bf16 %v5927_v14  ;;  %v5761_v23 = vunpack.c.h.bf16 %v5935_v19  ;;  %v5926_v62 = vld [vmem:[#allocation8 + $0x88] sm:$0xff]   ;;  %v3227_v2 = vmax.f32 %v6300_v35, 0.0 }
 0x1f9   :  { %3554 = vmatpush.msra.mxu0 %v5777_v53  ;;  %3535 = vmatpush.msra.mxu2 %v5744_v28  ;;  %v2923_v53 = vpop.f32.mrf.mxu3  ;;  %v5760_v28 = vunpack.c.l.bf16 %v5935_v19  ;;  %v5809_v54 = vunpack.c.h.bf16 %v5947_v0 }
 0x1fa   :  { %3496 = vmatpush.msra.mxu3 %v5677_v60  ;;  %3516 = vmatpush.msra.mxu1 %v5709_v30  ;;  %v6318_v32 = vpop.f32.mrf.mxu2  ;;  %v5693_v60 = vunpack.c.h.bf16 %v5918_v24  ;;  %v5725_v30 = vunpack.c.h.bf16 %v5926_v62 }
 0x1fb   :  { %3555 = vmatpush.msra.mxu0 %v5776_v29  ;;  %3536 = vmatpush.msra.mxu2 %v5741_v33  ;;  %v5661_v29 = vunpack.c.h.bf16 %v5910_v22 }
 0x1fc   :  { %3497 = vmatpush.msra.mxu3 %v5676_v40  ;;  %3517 = vmatpush.msra.mxu1 %v5708_v61  ;;  %v5692_v40 = vunpack.c.l.bf16 %v5918_v24  ;;  %v5724_v61 = vunpack.c.l.bf16 %v5926_v62  ;;  %v2999_v14 = vpop.f32.mrf.mxu1 }
 0x1fd   :  { %3556 = vmatpush.msra.mxu0 %v5773_v13  ;;  %3537 = vmatpush.msra.mxu2 %v5740_v42  ;;  %v5660_v13 = vunpack.c.l.bf16 %v5910_v22  ;;  %v5657_v42 = vunpack.c.h.bf16 %v5655_v31 }
 0x1fe   :  { %3498 = vmatpush.msra.mxu3 %v5673_v44  ;;  %3518 = vmatpush.msra.mxu1 %v5705_v47  ;;  %v5721_v44 = vunpack.c.h.bf16 %v5925_v37  ;;  %v5753_v47 = vunpack.c.h.bf16 %v5933_v18  ;;  %v6332_v1 = vpop.f32.mrf.mxu0  ;;  %v5962_v18 = vld [vmem:[#allocation8 + $0x1a8] sm:$0xff]  }
 0x1ff   :  { %3557 = vmatpush.msra.mxu0 %v5772_v43  ;;  %3538 = vmatpush.msra.mxu2 %v5737_v49  ;;  %v5689_v43 = vunpack.c.h.bf16 %v5917_v36  ;;  %v5656_v49 = vunpack.c.l.bf16 %v5655_v31 }
 0x200   :  { %3499 = vmatpush.msra.mxu3 %v5672_v51  ;;  %3519 = vmatpush.msra.mxu1 %v5704_v52  ;;  %v5956_v51 = vld [vmem:[#allocation8 + $0x178] sm:$0xff]   ;;  %v3224_v52 = vmax.f32 %v6247_v58, 0.0  ;;  %v5812_v58 = vunpack.c.l.bf16 %v5948_v9 }
 0x201   :  { %3558 = vmatpush.msra.mxu0 %v5769_v50  ;;  %3539 = vmatpush.msra.mxu2 %v5736_v59  ;;  %v5688_v50 = vunpack.c.l.bf16 %v5917_v36  ;;  %v3226_v59 = vmax.f32 %v6287_v12, 0.0  ;;  %v2986_v19 = vpop.f32.mrf.mxu3 }
 0x202   :  { %5261 = vmatmul.msk.bf16.vlgmr.msrb.gmra.mxu1 %vm2492_vm0, %v6209_v48  ;;  %3500 = vmatpush.msra.mxu3 %v5669_v3  ;;  %v5934_v48 = vld [vmem:[#allocation8 + $0xc8] sm:$0xff]   ;;  %v2975_v34 = vpop.f32.mrf.mxu2  ;;  %v6329_v3 = vld [vmem:[#allocation7] sm:$0xff] }
 0x203   :  { %3559 = vmatpush.msra.mxu0 %v5768_v63  ;;  %3520 = vmatpush.msra.mxu1 %v5701_v5  ;;  %v5757_v33 = vunpack.c.h.bf16 %v5934_v48  ;;  %v5756_v41 = vunpack.c.l.bf16 %v5934_v48  ;;  %v5845_v63 = vunpack.c.h.bf16 %v5956_v51  ;;  %v497_v4 = vperm.slane %v6329_v3, 5  ;;  %v5955_v5 = vld [vmem:[#allocation8 + $0x170] sm:$0xff]   ;;  %v5964_v48 = vld [vmem:[#allocation8 + $0x1b8] sm:$0xff]  }
 0x204   :  { %3540 = vmatpush.msra.mxu2 %v5733_v6  ;;  %3501 = vmatpush.msra.mxu3 %v5668_v45  ;;  %v5844_v6 = vunpack.c.l.bf16 %v5956_v51  ;;  %v5841_v12 = vunpack.c.h.bf16 %v5955_v5  ;;  %v5954_v45 = vld [vmem:[#allocation8 + $0x168] sm:$0xff]   ;;  %v5840_v11 = vunpack.c.l.bf16 %v5955_v5  ;;  %v5961_v51 = vld [vmem:[#allocation8 + $0x1a0] sm:$0xff]  }
 0x205   :  { %3560 = vmatpush.msra.mxu0 %v5765_v10  ;;  %3521 = vmatpush.msra.mxu1 %v5700_v15  ;;  %v2961_v35 = vadd.f32 %v6314_v38, %v497_v4  ;;  %v5808_v10 = vunpack.c.l.bf16 %v5947_v0  ;;  %v5805_v15 = vunpack.c.h.bf16 %v5946_v7  ;;  %v5836_v22 = vunpack.c.l.bf16 %v5954_v45  ;;  %v5941_v0 = vld [vmem:[#allocation8 + $0x100] sm:$0xff]  }
 0x206   :  { %3541 = vmatpush.msra.mxu2 %v5732_v17  ;;  %3502 = vmatpush.msra.mxu3 %v5665_v16  ;;  %v5837_v17 = vunpack.c.h.bf16 %v5954_v45  ;;  %v3014_v24 = vpop.f32.mrf.mxu0  ;;  %v5949_v5 = vld [vmem:[#allocation8 + $0x140] sm:$0xff]   ;;  %v5960_v45 = vld [vmem:[#allocation8 + $0x198] sm:$0xff]  }
 0x207   :  { %3561 = vmatpush.msra.mxu0 %v5764_v20  ;;  %3522 = vmatpush.msra.mxu1 %v5697_v21  ;;  %v5945_v20 = vld [vmem:[#allocation8 + $0x120] sm:$0xff]   ;;  %v2974_v16 = vadd.f32 %v6318_v32, %v2961_v35  ;;  %v5804_v21 = vunpack.c.l.bf16 %v5946_v7  ;;  %v5785_v7 = vunpack.c.h.bf16 %v5941_v0  ;;  %v5784_v35 = vunpack.c.l.bf16 %v5941_v0 }
 0x208   :  { %3542 = vmatpush.msra.mxu2 %v5729_v46  ;;  %3503 = vmatpush.msra.mxu3 %v5664_v25  ;;  %v5953_v46 = vld [vmem:[#allocation8 + $0x160] sm:$0xff]   ;;  %v5801_v38 = vunpack.c.h.bf16 %v5945_v20  ;;  %v5944_v25 = vld [vmem:[#allocation8 + $0x118] sm:$0xff]  }
 0x209   :  { %3562 = vmatpush.msra.mxu0 %v5761_v23  ;;  %3523 = vmatpush.msra.mxu1 %v5696_v26  ;;  %v5833_v23 = vunpack.c.h.bf16 %v5953_v46  ;;  %v2987_v62 = vadd.f32 %v2986_v19, %v2974_v16  ;;  %v5800_v26 = vunpack.c.l.bf16 %v5945_v20  ;;  %v5832_v32 = vunpack.c.l.bf16 %v5953_v46 }
 0x20a   :  { %3543 = vmatpush.msra.mxu2 %v5728_v27  ;;  %3504 = vmatpush.msra.mxu3 %v5661_v29  ;;  %v3025_v53 = vpop.f32.mrf.mxu2  ;;  %v5952_v27 = vld [vmem:[#allocation8 + $0x158] sm:$0xff]   ;;  %v3001_v29 = vpop.f32.mrf.mxu1  ;;  %v5797_v31 = vunpack.c.h.bf16 %v5944_v25  ;;  %v3228_v19 = vmax.f32 %v6321_v8, 0.0 }
 0x20b   :  { %3563 = vmatpush.msra.mxu0 %v5760_v28  ;;  %3524 = vmatpush.msra.mxu1 %v5693_v60  ;;  %v5963_v28 = vld [vmem:[#allocation8 + $0x1b0] sm:$0xff]   ;;  %v5877_v60 = vunpack.c.h.bf16 %v5964_v48  ;;  %v5829_v34 = vunpack.c.h.bf16 %v5952_v27  ;;  %v3000_v37 = vadd.f32 %v2999_v14, %v2987_v62 }
 0x20c   :  { %3544 = vmatpush.msra.mxu2 %v5725_v30  ;;  %3505 = vmatpush.msra.mxu3 %v5660_v13  ;;  %v5876_v30 = vunpack.c.l.bf16 %v5964_v48  ;;  %v5943_v13 = vld [vmem:[#allocation8 + $0x110] sm:$0xff]   ;;  %v5873_v36 = vunpack.c.h.bf16 %v5963_v28  ;;  %v5972_v48 = vld [vmem:[#allocation8 + $0x1f8] sm:$0xff]  }
 0x20d   :  { %3564 = vmatpush.msra.mxu0 %v5757_v33  ;;  %3525 = vmatpush.msra.mxu1 %v5692_v40  ;;  %v2988_v33 = vpop.f32.mrf.mxu3  ;;  %v5796_v40 = vunpack.c.l.bf16 %v5944_v25  ;;  %v5792_v9 = vunpack.c.l.bf16 %v5943_v13  ;;  %v5958_v25 = vld [vmem:[#allocation8 + $0x188] sm:$0xff]   ;;  %v5908_v29 = vunpack.c.l.bf16 %v5972_v48 }
 0x20e   :  { %3545 = vmatpush.msra.mxu2 %v5724_v61  ;;  %3506 = vmatpush.msra.mxu3 %v5657_v42  ;;  %v5951_v61 = vld [vmem:[#allocation8 + $0x150] sm:$0xff]   ;;  %v5872_v42 = vunpack.c.l.bf16 %v5963_v28  ;;  %v5853_v24 = vunpack.c.h.bf16 %v5958_v25  ;;  %v5852_v62 = vunpack.c.l.bf16 %v5958_v25 }
 0x20f   :  { %3565 = vmatpush.msra.mxu0 %v5756_v41  ;;  %3526 = vmatpush.msra.mxu1 %v5689_v43  ;;  %v5828_v41 = vunpack.c.l.bf16 %v5952_v27  ;;  %v5793_v43 = vunpack.c.h.bf16 %v5943_v13  ;;  %v5970_v13 = vld [vmem:[#allocation8 + $0x1e8] sm:$0xff]  }
 0x210   :  { %3546 = vmatpush.msra.mxu2 %v5721_v44  ;;  %3507 = vmatpush.msra.mxu3 %v5656_v49  ;;  %v5942_v49 = vld [vmem:[#allocation8 + $0x108] sm:$0xff]  }
 0x211   :  { %3566 = vmatpush.msra.mxu0 %v5753_v47  ;;  %3527 = vmatpush.msra.mxu1 %v5688_v50  ;;  %v5825_v47 = vunpack.c.h.bf16 %v5951_v61  ;;  %v5869_v50 = vunpack.c.h.bf16 %v5962_v18 }
 0x212   :  { %3547 = vmatpush.msra.mxu2 %v5720_v57  ;;  %3508 = vmatmul.f32.vlgmr.msra.gmra.mxu3 %v3224_v52  ;;  %v3027_v44 = vpop.f32.mrf.mxu2  ;;  %v3013_v57 = vadd.f32 %v6332_v1, %v3000_v37  ;;  %v5824_v52 = vunpack.c.l.bf16 %v5951_v61  ;;  %v5817_v1 = vunpack.c.h.bf16 %v5949_v5  ;;  %v498_v37 = vperm.slane %v6329_v3, 6 }
 0x213   :  { %3567 = vmatpush.msra.mxu0 %v5752_v39  ;;  %3528 = vmatmul.f32.vlgmr.msra.gmra.mxu1 %v3225_v56  ;;  %v5950_v39 = vld [vmem:[#allocation8 + $0x148] sm:$0xff]   ;;  %v5789_v56 = vunpack.c.h.bf16 %v5942_v49 }
 0x214   :  { %3548 = vmatmul.f32.vlgmr.msra.gmra.mxu2 %v3226_v59  ;;  %3568 = vmatmul.f32.vlgmr.msra.gmra.mxu0 %v3227_v2  ;;  %v5821_v59 = vunpack.c.h.bf16 %v5950_v39  ;;  %v5865_v2 = vunpack.c.h.bf16 %v5961_v51  ;;  %v3026_v4 = vadd.f32 %v3025_v53, %v3013_v57 }
 0x215   :  { %3572 = vmatpush.msrb.mxu3 %v5813_v55  ;;  %3592 = vmatpush.msrb.mxu1 %v5845_v63  ;;  %v5868_v55 = vunpack.c.l.bf16 %v5962_v18  ;;  %v3038_v63 = vpop.f32.mrf.mxu3 }
 0x216   :  { %3612 = vmatpush.msrb.mxu2 %v5877_v60  ;;  %v5971_v60 = vld [vmem:[#allocation8 + $0x1f0] sm:$0xff]  }
 0x217   :  { %3573 = vmatpush.msrb.mxu3 %v5812_v58  ;;  %3593 = vmatpush.msrb.mxu1 %v5844_v6  ;;  %v5788_v58 = vunpack.c.l.bf16 %v5942_v49  ;;  %v5820_v6 = vunpack.c.l.bf16 %v5950_v39  ;;  %v5968_v39 = vld [vmem:[#allocation8 + $0x1d8] sm:$0xff]  }
 0x218   :  { %3613 = vmatpush.msrb.mxu2 %v5876_v30 }
 0x219   :  { %3574 = vmatpush.msrb.mxu3 %v5809_v54  ;;  %3594 = vmatpush.msrb.mxu1 %v5841_v12  ;;  %v5864_v54 = vunpack.c.l.bf16 %v5961_v51  ;;  %v3039_v12 = vadd.f32 %v3038_v63, %v3026_v4  ;;  %v5893_v51 = vunpack.c.h.bf16 %v5968_v39 }
 0x21a   :  { %3614 = vmatpush.msrb.mxu2 %v5873_v36  ;;  %v5904_v36 = vunpack.c.l.bf16 %v5971_v60 }
 0x21b   :  { %3575 = vmatpush.msrb.mxu3 %v5808_v10  ;;  %3595 = vmatpush.msrb.mxu1 %v5840_v11  ;;  %v5816_v10 = vunpack.c.l.bf16 %v5949_v5  ;;  %v5959_v11 = vld [vmem:[#allocation8 + $0x190] sm:$0xff]   ;;  %v3229_v14 = vmax.f32 %v3039_v12, 0.0  ;;  %v5966_v12 = vld [vmem:[#allocation8 + $0x1c8] sm:$0xff]  }
 0x21c   :  { %3615 = vmatpush.msrb.mxu2 %v5872_v42  ;;  %v3051_v46 = vpop.f32.mrf.mxu1  ;;  %v5900_v42 = vunpack.c.l.bf16 %v5970_v13 }
 0x21d   :  { %3576 = vmatpush.msrb.mxu3 %v5805_v15  ;;  %3596 = vmatpush.msrb.mxu1 %v5837_v17  ;;  %v5861_v15 = vunpack.c.h.bf16 %v5960_v45  ;;  %v5860_v17 = vunpack.c.l.bf16 %v5960_v45  ;;  %v3040_v20 = vpop.f32.mrf.mxu3  ;;  %v3052_v61 = vadd.f32 %v3051_v46, %v498_v37  ;;  %v5965_v45 = vld [vmem:[#allocation8 + $0x1c0] sm:$0xff]   ;;  %v3652_v37 = vlaneseq }
 0x21e   :  { %3616 = vmatpush.msrb.mxu2 %v5869_v50  ;;  %v3077_v16 = vpop.f32.mrf.mxu0 }
 0x21f   :  { %3577 = vmatpush.msrb.mxu3 %v5804_v21  ;;  %3597 = vmatpush.msrb.mxu1 %v5836_v22  ;;  %v5857_v21 = vunpack.c.h.bf16 %v5959_v11  ;;  %v5856_v22 = vunpack.c.l.bf16 %v5959_v11  ;;  %v5881_v11 = vunpack.c.h.bf16 %v5965_v45 }
 0x220   :  { %3617 = vmatpush.msrb.mxu2 %v5868_v55 }
 0x221   :  { %3578 = vmatpush.msrb.mxu3 %v5801_v38  ;;  %3598 = vmatpush.msrb.mxu1 %v5833_v23 }
 0x222   :  { %3618 = vmatpush.msrb.mxu2 %v5865_v2  ;;  %v5967_v2 = vld [vmem:[#allocation8 + $0x1d0] sm:$0xff]  }
 0x223   :  { %3579 = vmatpush.msrb.mxu3 %v5800_v26  ;;  %3599 = vmatpush.msrb.mxu1 %v5832_v32  ;;  %v5957_v26 = vld [vmem:[#allocation8 + $0x180] sm:$0xff]   ;;  %v5909_v32 = vunpack.c.h.bf16 %v5972_v48  ;;  %v5889_v4 = vunpack.c.h.bf16 %v5967_v2 }
 0x224   :  { %3619 = vmatpush.msrb.mxu2 %v5864_v54  ;;  %v3053_v8 = vpop.f32.mrf.mxu1  ;;  %v5849_v27 = vunpack.c.h.bf16 %v5957_v26  ;;  %v5848_v28 = vunpack.c.l.bf16 %v5957_v26 }
 0x225   :  { %3580 = vmatpush.msrb.mxu3 %v5797_v31  ;;  %3600 = vmatpush.msrb.mxu1 %v5829_v34  ;;  %v5905_v34 = vunpack.c.h.bf16 %v5971_v60 }
 0x226   :  { %3620 = vmatpush.msrb.mxu2 %v5861_v15  ;;  %v3079_v53 = vpop.f32.mrf.mxu0  ;;  %3632 = vmatpush.msrb.mxu0 %v5909_v32  ;;  %v499_v15 = vperm.slane %v6329_v3, 7  ;;  %v5983_v3 = vld [vmem:[#allocation10] ss:$0 sm:$0xff] }
 0x227   :  { %3581 = vmatpush.msrb.mxu3 %v5796_v40  ;;  %3601 = vmatpush.msrb.mxu1 %v5828_v41  ;;  %v3064_v38 = vpop.f32.mrf.mxu3  ;;  %v5901_v40 = vunpack.c.h.bf16 %v5970_v13 }
 0x228   :  { %3621 = vmatpush.msrb.mxu2 %v5860_v17  ;;  %3633 = vmatpush.msrb.mxu0 %v5908_v29  ;;  %v3065_v41 = vadd.f32 %v3064_v38, %v3052_v61 }
 0x229   :  { %3582 = vmatpush.msrb.mxu3 %v5793_v43  ;;  %3602 = vmatpush.msrb.mxu1 %v5825_v47  ;;  %v3090_v23 = vpop.f32.mrf.mxu2  ;;  %v5969_v43 = vld [vmem:[#allocation8 + $0x1e0] sm:$0xff]  }
 0x22a   :  { %3622 = vmatpush.msrb.mxu2 %v5857_v21  ;;  %3634 = vmatpush.msrb.mxu0 %v5905_v34  ;;  %v5897_v47 = vunpack.c.h.bf16 %v5969_v43  ;;  %v5896_v49 = vunpack.c.l.bf16 %v5969_v43  ;;  %v3078_v50 = vadd.f32 %v3077_v16, %v3065_v41  ;;  %v3653_v41 = vand.u32 127, %v3652_v37 }
 0x22b   :  { %3583 = vmatpush.msrb.mxu3 %v5792_v9  ;;  %3603 = vmatpush.msrb.mxu1 %v5824_v52  ;;  %v5892_v52 = vunpack.c.l.bf16 %v5968_v39 }
 0x22c   :  { %3623 = vmatpush.msrb.mxu2 %v5856_v22  ;;  %3635 = vmatpush.msrb.mxu0 %v5904_v36  ;;  %v3091_v9 = vadd.f32 %v3090_v23, %v3078_v50  ;;  %vm3654_vm1 = vcmp.lt.s32.totalorder %v3653_v41, 10 }
 0x22d   :  { %3584 = vmatpush.msrb.mxu3 %v5789_v56  ;;  %3604 = vmatpush.msrb.mxu1 %v5821_v59 }
 0x22e   :  { %3624 = vmatpush.msrb.mxu2 %v5853_v24  ;;  %v3129_v31 = vpop.f32.mrf.mxu0  ;;  %3636 = vmatpush.msrb.mxu0 %v5901_v40 }
 0x22f   :  { %3585 = vmatpush.msrb.mxu3 %v5788_v58  ;;  %3605 = vmatpush.msrb.mxu1 %v5820_v6  ;;  %v3066_v30 = vpop.f32.mrf.mxu3  ;;  %v5888_v58 = vunpack.c.l.bf16 %v5967_v2 }
 0x230   :  { %3625 = vmatpush.msrb.mxu2 %v5852_v62  ;;  %3637 = vmatpush.msrb.mxu0 %v5900_v42 }
 0x231   :  { %3586 = vmatpush.msrb.mxu3 %v5785_v7  ;;  %3606 = vmatpush.msrb.mxu1 %v5817_v1  ;;  %v3092_v33 = vpop.f32.mrf.mxu2  ;;  %v5885_v7 = vunpack.c.h.bf16 %v5966_v12 }
 0x232   :  { %3626 = vmatpush.msrb.mxu2 %v5849_v27  ;;  %3638 = vmatpush.msrb.mxu0 %v5897_v47 }
 0x233   :  { %3587 = vmatpush.msrb.mxu3 %v5784_v35  ;;  %3607 = vmatpush.msrb.mxu1 %v5816_v10  ;;  %v5884_v35 = vunpack.c.l.bf16 %v5966_v12 }
 0x234   :  { %3588 = vmatmul.f32.vlgmr.msrb.gmra.mxu3 %v3228_v19  ;;  %3608 = vmatmul.f32.vlgmr.msrb.gmra.mxu1 %v3229_v14  ;;  %v5880_v14 = vunpack.c.l.bf16 %v5965_v45 }
 0x235   :  { %3627 = vmatpush.msrb.mxu2 %v5848_v28  ;;  %3639 = vmatpush.msrb.mxu0 %v5896_v49 }
 0x236   :  { %v3131_v18 = vpop.f32.mrf.mxu0 }
 0x237   :  { %3640 = vmatpush.msrb.mxu0 %v5893_v51 }
 0x239   :  { %3641 = vmatpush.msrb.mxu0 %v5892_v52 }
 0x23b   :  { %3642 = vmatpush.msrb.mxu0 %v5889_v4 }
 0x23d   :  { %3643 = vmatpush.msrb.mxu0 %v5888_v58 }
 0x23f   :  { %v3103_v44 = vpop.f32.mrf.mxu1  ;;  %3644 = vmatpush.msrb.mxu0 %v5885_v7 }
 0x240   :  { %v3104_v55 = vadd.f32 %v3103_v44, %v3091_v9 }
 0x241   :  { %3645 = vmatpush.msrb.mxu0 %v5884_v35 }
 0x242   :  { %v3155_v57 = vpop.f32.mrf.mxu0 }
 0x243   :  { %3646 = vmatpush.msrb.mxu0 %v5881_v11 }
 0x245   :  { %3647 = vmatpush.msrb.mxu0 %v5880_v14 }
 0x247   :  { %v3105_v56 = vpop.f32.mrf.mxu1  ;;  %v3116_v59 = vpop.f32.mrf.mxu3 }
 0x248   :  { %v3117_v63 = vadd.f32 %v3116_v59, %v3104_v55 }
 0x249   :  { %v3142_v0 = vpop.f32.mrf.mxu2 }
 0x24a   :  { %v3130_v5 = vadd.f32 %v3129_v31, %v3117_v63  ;;  %v3157_v6 = vpop.f32.mrf.mxu0  ;;  %v3143_v17 = vadd.f32 %v3142_v0, %v499_v15 }
 0x24c   :  { %v3230_v54 = vmax.f32 %v3130_v5, 0.0  ;;  %v3156_v20 = vadd.f32 %v3155_v57, %v3143_v17 }
 0x24e   :  { %3628 = vmatmul.f32.vlgmr.msrb.gmra.mxu2 %v3230_v54 }
 0x24f   :  { %v3118_v1 = vpop.f32.mrf.mxu3 }
 0x251   :  { %v3144_v10 = vpop.f32.mrf.mxu2 }
 0x269   :  { %v3168_v19 = vpop.f32.mrf.mxu1 }
 0x26a   :  { %v3169_v16 = vadd.f32 %v3168_v19, %v3156_v20 }
 0x271   :  { %v3170_v21 = vpop.f32.mrf.mxu1  ;;  %v3207_v46 = vpop.f32.mrf.mxu0 }
 0x273   :  { %v3181_v22 = vpop.f32.mrf.mxu3 }
 0x274   :  { %v3182_v38 = vadd.f32 %v3181_v22, %v3169_v16 }
 0x275   :  { %v3194_v53 = vpop.f32.mrf.mxu2 }
 0x276   :  { %v3195_v23 = vadd.f32 %v3194_v53, %v3182_v38 }
 0x278   :  { %v3208_v25 = vadd.f32 %v3207_v46, %v3195_v23 }
 0x279   :  { %v3209_v24 = vpop.f32.mrf.mxu0 }
 0x27b   :  { %v3183_v8 = vpop.f32.mrf.mxu3 }
 0x27d   :  { %v3196_v62 = vpop.f32.mrf.mxu2 }
 0x27f   :  { %v3220_v26 = vpop.f32.mrf.mxu1 }
 0x280   :  { %v3221_v27 = vadd.f32 %v3220_v26, %v3208_v25 }
 0x282   :  { %v3231_v48 = vmax.f32 %v3221_v27, 0.0 }
 0x284   :  { %3648 = vmatmul.f32.vlgmr.msrb.gmra.mxu0 %v3231_v48 }
 0x287   :  { %v3222_v28 = vpop.f32.mrf.mxu1 }
 0x290   :  { %v3529_v60 = vpop.f32.mrf.mxu1 }
 0x291   :  { %v3569_v33 = vpop.f32.mrf.mxu0 }
 0x295   :  { %v3509_v32 = vpop.f32.mrf.mxu3 }
 0x296   :  { %v3510_v29 = vadd.f32 %v5983_v3, %v3509_v32 }
 0x297   :  { %v3549_v31 = vpop.f32.mrf.mxu2 }
 0x298   :  { %v3530_v30 = vadd.f32 %v3529_v60, %v3510_v29 }
 0x29a   :  { %v3550_v34 = vadd.f32 %v3549_v31, %v3530_v30 }
 0x29c   :  { %v3570_v36 = vadd.f32 %v3569_v33, %v3550_v34 }
 0x2b1   :  { %v3609_v61 = vpop.f32.mrf.mxu1 }
 0x2b7   :  { %v3589_v13 = vpop.f32.mrf.mxu3 }
 0x2b8   :  { %v3590_v40 = vadd.f32 %v3589_v13, %v3570_v36 }
 0x2ba   :  { %v3610_v42 = vadd.f32 %v3609_v61, %v3590_v40 }
 0x2d1   :  { %v3629_v18 = vpop.f32.mrf.mxu2 }
 0x2d2   :  { %v3630_v43 = vadd.f32 %v3629_v18, %v3610_v42 }
 0x301   :  { %v3649_v44 = vpop.f32.mrf.mxu0 }
 0x302   :  { %v3650_v47 = vadd.f32 %v3649_v44, %v3630_v43 }
 0x304   :  { %v3655_v49 = vsel %vm3654_vm1, %v3650_v47, -1e+30 }
 0x305   :  { %3656 = vmax.xlane.f32.xlu0 %v3655_v49 }
 0x378   :  { %v3657_v50 = vpop.xlane.xlu0 %3656 }
 0x379   :  { %v3658_v57 = vsub.f32 %v3655_v49, %v3657_v50 }
 0x37b   :  { %v3659_v9 = vmul.f32 1.442695, %v3658_v57 }
 0x37d   :  { %5984 = vpow2.f32 %v3659_v9 }
 0x383   :  { %v5985_v39 = vpop.eup %5984 }
 0x384   :  { %3661 = vadd.xlane.f32.xlu0 %v5985_v39 }
 0x3f7   :  { %v3662_v51 = vpop.xlane.xlu0 %3661 }
 0x3f8   :  { %5986 = vlog2.f32 %v3662_v51 }
 0x3fe   :  { %v5987_v52 = vpop.eup %5986 }
 0x3ff   :  { %v3664_v55 = vmul.f32 0.6931472, %v5987_v52 }
 0x401   :  { %v3665_v56 = vsub.f32 %v3658_v57, %v3664_v55 }
 0x403   :  { %3666 = vst [vmem:[#allocation11] sm:$0xff] %v3665_v56 }
 0x404   :  { %3677 = dma.vmem_to_hbm [thread:$0]  %s3673_s4, 128, %s3675_s21, [#allocation4]  }
 0x405   :  { %6140 = dma.done.wait [#allocation4], 128  }
 0x406   :  { %6141 = vsyncadd [#allocation4], 4294967168 }
 0x407   :  { %3682 = vsyncpa [#allocation3], 1 }
 0x408   :  { %3683 = vsyncpa [#allocation6], 1 }
 0x409   :  { %3684 = vsyncpa [#allocation9], 1 }
 0x40a   :  { %3685 = vsyncpa [#allocation4], 1 }

</bundles_post_ra>
